<compile_context>
chip_gen: v7x
topology: tpu7x:2x2x1
jax: 0.10.0
libtpu: 0.0.40
codegen_flags: <defaults>
</compile_context>

<pallas_src>
import jax
import jax.numpy as jnp
from jax.experimental import pallas as pl
from jax.experimental.pallas import tpu as pltpu


# ----------------------------------------------------------------------------
# Pallas kernels
# ----------------------------------------------------------------------------
def _leaky(y):
    return jnp.where(y >= 0.0, y, 0.2 * y)


def _feat_kernel(x_ref,
                 w1, b1, w2, b2, w3, b3, w4, b4, w5, b5,
                 o_ref, acc_ref):
    """Fused PointNetfeat trunk + global max-pool for one (batch, point-tile)."""
    t = pl.program_id(1)

    @pl.when(t == 0)
    def _init():
        acc_ref[...] = jnp.full_like(acc_ref, -jnp.inf)

    def layer(h, w_ref, b_ref):
        # bf16 MXU operands, f32 accumulation, f32 (folded-BN bias) + LeakyReLU.
        y = jnp.dot(h.astype(jnp.bfloat16), w_ref[...],
                    preferred_element_type=jnp.float32)
        return _leaky(y + b_ref[...])

    h = x_ref[0]                      # (TILE_N, 3) f32
    h = layer(h, w1, b1)              # 3   -> 64
    h = layer(h, w2, b2)              # 64  -> 64   (point_feat; unused by Cls)
    h = layer(h, w3, b3)              # 64  -> 64
    h = layer(h, w4, b4)              # 64  -> 128
    h = layer(h, w5, b5)              # 128 -> 1024

    # Global max-pool over points: cheap XLU/VPU work hidden under the matmuls.
    acc_ref[...] = jnp.maximum(acc_ref[...],
                               jnp.max(h, axis=0, keepdims=True))

    @pl.when(t == pl.num_programs(1) - 1)
    def _finalize():
        o_ref[0] = acc_ref[...].astype(o_ref.dtype)


def _head_kernel(g_ref, w1, b1, w2, b2, w3, b3, o_ref):
    """Fused classifier head: fc1+bn1+act, fc2+(dropout)+bn2+act, fc3."""
    def dense(h, w_ref, b_ref):
        return jnp.dot(h.astype(jnp.bfloat16), w_ref[...],
                       preferred_element_type=jnp.float32) + b_ref[...]

    h = g_ref[...]                    # (B, 1024) f32
    h = _leaky(dense(h, w1, b1))      # fc1 + bn1 + LeakyReLU
    # Dropout(p=0.3): identity in inference.
    h = _leaky(dense(h, w2, b2))      # fc2 + bn2 + LeakyReLU
    o_ref[...] = dense(h, w3, b3).astype(o_ref.dtype)   # fc3 (no activation)


# ----------------------------------------------------------------------------
# Wrappers
# ----------------------------------------------------------------------------
def pointnet_feat_global(x_bnc, weights, biases, *, tile_n=128):
    """x_bnc: (B, N, 3) f32 -> global feature (B, 1024) f32."""
    B, N, _ = x_bnc.shape
    if N % tile_n != 0 or tile_n % 8 != 0:
        tile_n = N                    # fall back to a single tile per batch
    num_tiles = N // tile_n

    in_specs = [pl.BlockSpec((1, tile_n, 3), lambda b, t: (b, t, 0))]
    args = [x_bnc]
    for w, bias in zip(weights, biases):
        in_specs.append(pl.BlockSpec(w.shape, lambda b, t: (0, 0)))
        in_specs.append(pl.BlockSpec(bias.shape, lambda b, t: (0, 0)))
        args += [w, bias]

    flops = 2 * B * N * sum(int(w.shape[0]) * int(w.shape[1]) for w in weights)
    bytes_accessed = (x_bnc.size * 4 + B * 1024 * 4
                      + sum(w.size * 2 for w in weights)
                      + sum(bias.size * 4 for bias in biases))

    out = pl.pallas_call(
        _feat_kernel,
        out_shape=jax.ShapeDtypeStruct((B, 1, 1024), jnp.float32),
        grid_spec=pltpu.PrefetchScalarGridSpec(
            num_scalar_prefetch=0,
            grid=(B, num_tiles),
            in_specs=in_specs,
            out_specs=pl.BlockSpec((1, 1, 1024), lambda b, t: (b, 0, 0)),
            scratch_shapes=[pltpu.VMEM((1, 1024), jnp.float32)],
        ),
        compiler_params=pltpu.CompilerParams(
            dimension_semantics=("parallel", "arbitrary")),
        cost_estimate=pl.CostEstimate(flops=flops, transcendentals=0,
                                      bytes_accessed=bytes_accessed),
    )(*args)
    return out.reshape(B, 1024)


def pointnet_cls_head(g, weights, biases):
    """g: (B, 1024) f32 -> logits (B, out_dim) f32."""
    B = g.shape[0]
    out_dim = weights[-1].shape[1]

    in_specs = [pl.BlockSpec(g.shape, lambda i: (0, 0))]
    args = [g]
    for w, bias in zip(weights, biases):
        in_specs.append(pl.BlockSpec(w.shape, lambda i: (0, 0)))
        in_specs.append(pl.BlockSpec(bias.shape, lambda i: (0, 0)))
        args += [w, bias]

    flops = 2 * B * sum(int(w.shape[0]) * int(w.shape[1]) for w in weights)
    bytes_accessed = (g.size * 4 + B * out_dim * 4
                      + sum(w.size * 2 for w in weights)
                      + sum(bias.size * 4 for bias in biases))

    return pl.pallas_call(
        _head_kernel,
        out_shape=jax.ShapeDtypeStruct((B, out_dim), jnp.float32),
        grid=(1,),
        in_specs=in_specs,
        out_specs=pl.BlockSpec((B, out_dim), lambda i: (0, 0)),
        cost_estimate=pl.CostEstimate(flops=flops, transcendentals=0,
                                      bytes_accessed=bytes_accessed),
    )(*args)


# ----------------------------------------------------------------------------
# Parameter construction (deterministic, synthetic; BN folded at build time)
# ----------------------------------------------------------------------------
def _make_layer(key, cin, cout, *, bn=True):
    """Linear/1x1-conv weight (cin, cout) with optional eval-mode BN folded in.

    Returns (w_bf16, bias_f32[1, cout]); the BN scale is multiplied into the
    weight columns so the kernel only needs a single bias add.
    """
    k_w, k_b = jax.random.split(key)
    w = jax.random.normal(k_w, (cin, cout), jnp.float32) / jnp.sqrt(float(cin))
    b = jax.random.normal(k_b, (cout,), jnp.float32) * 0.01
    if bn:
        eps = 1e-5
        gamma = jnp.ones((cout,), jnp.float32)
        beta = jnp.zeros((cout,), jnp.float32)
        r_mean = jnp.zeros((cout,), jnp.float32)
        r_var = jnp.ones((cout,), jnp.float32)
        s = gamma * jax.lax.rsqrt(r_var + eps)
        w = w * s[None, :]
        b = b * s + (beta - r_mean * s)
    return w.astype(jnp.bfloat16), b.reshape(1, cout).astype(jnp.float32)


def make_pointnet_cls_params(key, out_dim):
    feat_dims = [(3, 64), (64, 64), (64, 64), (64, 128), (128, 1024)]
    head_dims = [(1024, 512), (512, 256), (256, out_dim)]
    head_bn = [True, True, False]               # fc3 has no BN / activation
    keys = jax.random.split(key, len(feat_dims) + len(head_dims))
    feat = [_make_layer(k, ci, co)
            for k, (ci, co) in zip(keys[:len(feat_dims)], feat_dims)]
    head = [_make_layer(k, ci, co, bn=bn)
            for k, (ci, co), bn in zip(keys[len(feat_dims):], head_dims, head_bn)]
    return feat, head


# ----------------------------------------------------------------------------
# Forward pass
# ----------------------------------------------------------------------------
@jax.jit
def pointnet_cls_forward(x, feat_params, head_params):
    """x: (B, 3, N) float32 -> (B, out_dim) float32."""
    x_bnc = jnp.transpose(x, (0, 2, 1))                       # (B, N, 3)
    fw = [w for w, _ in feat_params]
    fb = [b for _, b in feat_params]
    g = pointnet_feat_global(x_bnc, fw, fb)                   # (B, 1024)
    hw = [w for w, _ in head_params]
    hb = [b for _, b in head_params]
    return pointnet_cls_head(g, hw, hb)                       # (B, out_dim)


# ----------------------------------------------------------------------------
# Main
# ----------------------------------------------------------------------------
if __name__ == "__main__":
    B, N = 2, 512                    # 512 points -> 4 P-tiles of 128 per batch
    OUT_DIM = 8                      # opt['out_dim']

    key = jax.random.PRNGKey(0)
    k_params, k_x = jax.random.split(key)
    feat_params, head_params = make_pointnet_cls_params(k_params, OUT_DIM)
    x = jax.random.normal(k_x, (B, 3, N), jnp.float32)

    out = pointnet_cls_forward(x, feat_params, head_params)
    jax.block_until_ready(out)
    assert out.shape == (B, OUT_DIM), out.shape
    print("KERNEL_OK")
</pallas_src>

<mosaic_0001>
module attributes {stable_mosaic.version = 11 : i64} {
  func.func @_feat_kernel(%arg0: i32, %arg1: i32, %arg2: memref<1x128x3xf32, #tpu.memory_space<vmem>>, %arg3: memref<3x64xbf16, #tpu.memory_space<vmem>>, %arg4: memref<1x64xf32, #tpu.memory_space<vmem>>, %arg5: memref<64x64xbf16, #tpu.memory_space<vmem>>, %arg6: memref<1x64xf32, #tpu.memory_space<vmem>>, %arg7: memref<64x64xbf16, #tpu.memory_space<vmem>>, %arg8: memref<1x64xf32, #tpu.memory_space<vmem>>, %arg9: memref<64x128xbf16, #tpu.memory_space<vmem>>, %arg10: memref<1x128xf32, #tpu.memory_space<vmem>>, %arg11: memref<128x1024xbf16, #tpu.memory_space<vmem>>, %arg12: memref<1x1024xf32, #tpu.memory_space<vmem>>, %arg13: memref<1x1x1024xf32, #tpu.memory_space<vmem>>, %arg14: memref<1x1024xf32, #tpu.memory_space<vmem>>) attributes {dimension_semantics = [#tpu.dimension_semantics<parallel>, #tpu.dimension_semantics<arbitrary>], iteration_bounds = array<i64: 2, 4>, scalar_prefetch = 0 : i64, scratch_operands = 1 : i64, tpu.core_type = #tpu.core_type<tc>, window_params = [{transform_indices = @transform_0, window_bounds = array<i64: 1, 128, 3>}, {pipeline_mode = #tpu.pipeline_mode<synchronous>, transform_indices = @transform_1, window_bounds = array<i64: 3, 64>}, {pipeline_mode = #tpu.pipeline_mode<synchronous>, transform_indices = @transform_2, window_bounds = array<i64: 1, 64>}, {pipeline_mode = #tpu.pipeline_mode<synchronous>, transform_indices = @transform_3, window_bounds = array<i64: 64, 64>}, {pipeline_mode = #tpu.pipeline_mode<synchronous>, transform_indices = @transform_4, window_bounds = array<i64: 1, 64>}, {pipeline_mode = #tpu.pipeline_mode<synchronous>, transform_indices = @transform_5, window_bounds = array<i64: 64, 64>}, {pipeline_mode = #tpu.pipeline_mode<synchronous>, transform_indices = @transform_6, window_bounds = array<i64: 1, 64>}, {pipeline_mode = #tpu.pipeline_mode<synchronous>, transform_indices = @transform_7, window_bounds = array<i64: 64, 128>}, {pipeline_mode = #tpu.pipeline_mode<synchronous>, transform_indices = @transform_8, window_bounds = array<i64: 1, 128>}, {pipeline_mode = #tpu.pipeline_mode<synchronous>, transform_indices = @transform_9, window_bounds = array<i64: 128, 1024>}, {pipeline_mode = #tpu.pipeline_mode<synchronous>, transform_indices = @transform_10, window_bounds = array<i64: 1, 1024>}, {transform_indices = @transform_11, window_bounds = array<i64: 1, 1, 1024>}]} {
    %c0_i32 = arith.constant 0 : i32
    %0 = arith.cmpi eq, %arg1, %c0_i32 : i32
    %1 = arith.extui %0 : i1 to i32
    %c0_i32_0 = arith.constant 0 : i32
    %2 = arith.cmpi ne, %1, %c0_i32_0 : i32
    scf.if %2 {
      %cst_43 = arith.constant 0xFF800000 : f32
      %68 = vector.broadcast %cst_43 : f32 to vector<1x1024xf32>
      %c0_44 = arith.constant 0 : index
      %c0_45 = arith.constant 0 : index
      %69 = vector.load %arg14[%c0_44, %c0_45] : memref<1x1024xf32, #tpu.memory_space<vmem>>, vector<1x1024xf32>
      tpu.vector_store %arg14[%c0_44, %c0_45], %68 {strides = array<i32>} : memref<1x1024xf32, #tpu.memory_space<vmem>>, vector<1x1024xf32>,
    } else {
    }
    %c0 = arith.constant 0 : index
    %c0_1 = arith.constant 0 : index
    %c0_2 = arith.constant 0 : index
    %3 = vector.load %arg2[%c0, %c0_1, %c0_2] : memref<1x128x3xf32, #tpu.memory_space<vmem>>, vector<1x128x3xf32>
    %4 = vector.shape_cast %3 : vector<1x128x3xf32> to vector<128x3xf32>
    %5 = arith.truncf %4 : vector<128x3xf32> to vector<128x3xbf16>
    %c0_3 = arith.constant 0 : index
    %c0_4 = arith.constant 0 : index
    %6 = vector.load %arg3[%c0_3, %c0_4] : memref<3x64xbf16, #tpu.memory_space<vmem>>, vector<3x64xbf16>
    %cst = arith.constant dense<0.000000e+00> : vector<128x64xf32>
    %7 = tpu.matmul %5, %6, %cst {dimension_numbers = #tpu.dot_dimension_numbers<[1], [0], [0], [1], [0, 0, 1, 1], [], []>} : vector<128x3xbf16>, vector<3x64xbf16>, vector<128x64xf32> -> vector<128x64xf32>
    %c0_5 = arith.constant 0 : index
    %c0_6 = arith.constant 0 : index
    %8 = vector.load %arg4[%c0_5, %c0_6] : memref<1x64xf32, #tpu.memory_space<vmem>>, vector<1x64xf32>
    %9 = vector.broadcast %8 : vector<1x64xf32> to vector<128x64xf32>
    %10 = arith.addf %7, %9 : vector<128x64xf32>
    %cst_7 = arith.constant 0.000000e+00 : f32
    %11 = vector.broadcast %cst_7 : f32 to vector<128x64xf32>
    %12 = arith.cmpf oge, %10, %11 : vector<128x64xf32>
    %cst_8 = arith.constant 2.000000e-01 : f32
    %13 = vector.broadcast %cst_8 : f32 to vector<128x64xf32>
    %14 = arith.mulf %13, %10 : vector<128x64xf32>
    %15 = arith.select %12, %10, %14 : vector<128x64xi1>, vector<128x64xf32>
    %16 = arith.truncf %15 : vector<128x64xf32> to vector<128x64xbf16>
    %c0_9 = arith.constant 0 : index
    %c0_10 = arith.constant 0 : index
    %17 = vector.load %arg5[%c0_9, %c0_10] : memref<64x64xbf16, #tpu.memory_space<vmem>>, vector<64x64xbf16>
    %cst_11 = arith.constant dense<0.000000e+00> : vector<128x64xf32>
    %18 = tpu.matmul %16, %17, %cst_11 {dimension_numbers = #tpu.dot_dimension_numbers<[1], [0], [0], [1], [0, 0, 1, 1], [], []>} : vector<128x64xbf16>, vector<64x64xbf16>, vector<128x64xf32> -> vector<128x64xf32>
    %c0_12 = arith.constant 0 : index
    %c0_13 = arith.constant 0 : index
    %19 = vector.load %arg6[%c0_12, %c0_13] : memref<1x64xf32, #tpu.memory_space<vmem>>, vector<1x64xf32>
    %20 = vector.broadcast %19 : vector<1x64xf32> to vector<128x64xf32>
    %21 = arith.addf %18, %20 : vector<128x64xf32>
    %cst_14 = arith.constant 0.000000e+00 : f32
    %22 = vector.broadcast %cst_14 : f32 to vector<128x64xf32>
    %23 = arith.cmpf oge, %21, %22 : vector<128x64xf32>
    %cst_15 = arith.constant 2.000000e-01 : f32
    %24 = vector.broadcast %cst_15 : f32 to vector<128x64xf32>
    %25 = arith.mulf %24, %21 : vector<128x64xf32>
    %26 = arith.select %23, %21, %25 : vector<128x64xi1>, vector<128x64xf32>
    %27 = arith.truncf %26 : vector<128x64xf32> to vector<128x64xbf16>
    %c0_16 = arith.constant 0 : index
    %c0_17 = arith.constant 0 : index
    %28 = vector.load %arg7[%c0_16, %c0_17] : memref<64x64xbf16, #tpu.memory_space<vmem>>, vector<64x64xbf16>
    %cst_18 = arith.constant dense<0.000000e+00> : vector<128x64xf32>
    %29 = tpu.matmul %27, %28, %cst_18 {dimension_numbers = #tpu.dot_dimension_numbers<[1], [0], [0], [1], [0, 0, 1, 1], [], []>} : vector<128x64xbf16>, vector<64x64xbf16>, vector<128x64xf32> -> vector<128x64xf32>
    %c0_19 = arith.constant 0 : index
    %c0_20 = arith.constant 0 : index
    %30 = vector.load %arg8[%c0_19, %c0_20] : memref<1x64xf32, #tpu.memory_space<vmem>>, vector<1x64xf32>
    %31 = vector.broadcast %30 : vector<1x64xf32> to vector<128x64xf32>
    %32 = arith.addf %29, %31 : vector<128x64xf32>
    %cst_21 = arith.constant 0.000000e+00 : f32
    %33 = vector.broadcast %cst_21 : f32 to vector<128x64xf32>
    %34 = arith.cmpf oge, %32, %33 : vector<128x64xf32>
    %cst_22 = arith.constant 2.000000e-01 : f32
    %35 = vector.broadcast %cst_22 : f32 to vector<128x64xf32>
    %36 = arith.mulf %35, %32 : vector<128x64xf32>
    %37 = arith.select %34, %32, %36 : vector<128x64xi1>, vector<128x64xf32>
    %38 = arith.truncf %37 : vector<128x64xf32> to vector<128x64xbf16>
    %c0_23 = arith.constant 0 : index
    %c0_24 = arith.constant 0 : index
    %39 = vector.load %arg9[%c0_23, %c0_24] : memref<64x128xbf16, #tpu.memory_space<vmem>>, vector<64x128xbf16>
    %cst_25 = arith.constant dense<0.000000e+00> : vector<128x128xf32>
    %40 = tpu.matmul %38, %39, %cst_25 {dimension_numbers = #tpu.dot_dimension_numbers<[1], [0], [0], [1], [0, 0, 1, 1], [], []>} : vector<128x64xbf16>, vector<64x128xbf16>, vector<128x128xf32> -> vector<128x128xf32>
    %c0_26 = arith.constant 0 : index
    %c0_27 = arith.constant 0 : index
    %41 = vector.load %arg10[%c0_26, %c0_27] : memref<1x128xf32, #tpu.memory_space<vmem>>, vector<1x128xf32>
    %42 = vector.broadcast %41 : vector<1x128xf32> to vector<128x128xf32>
    %43 = arith.addf %40, %42 : vector<128x128xf32>
    %cst_28 = arith.constant 0.000000e+00 : f32
    %44 = vector.broadcast %cst_28 : f32 to vector<128x128xf32>
    %45 = arith.cmpf oge, %43, %44 : vector<128x128xf32>
    %cst_29 = arith.constant 2.000000e-01 : f32
    %46 = vector.broadcast %cst_29 : f32 to vector<128x128xf32>
    %47 = arith.mulf %46, %43 : vector<128x128xf32>
    %48 = arith.select %45, %43, %47 : vector<128x128xi1>, vector<128x128xf32>
    %49 = arith.truncf %48 : vector<128x128xf32> to vector<128x128xbf16>
    %c0_30 = arith.constant 0 : index
    %c0_31 = arith.constant 0 : index
    %50 = vector.load %arg11[%c0_30, %c0_31] : memref<128x1024xbf16, #tpu.memory_space<vmem>>, vector<128x1024xbf16>
    %cst_32 = arith.constant dense<0.000000e+00> : vector<128x1024xf32>
    %51 = tpu.matmul %49, %50, %cst_32 {dimension_numbers = #tpu.dot_dimension_numbers<[1], [0], [0], [1], [0, 0, 1, 1], [], []>} : vector<128x128xbf16>, vector<128x1024xbf16>, vector<128x1024xf32> -> vector<128x1024xf32>
    %c0_33 = arith.constant 0 : index
    %c0_34 = arith.constant 0 : index
    %52 = vector.load %arg12[%c0_33, %c0_34] : memref<1x1024xf32, #tpu.memory_space<vmem>>, vector<1x1024xf32>
    %53 = vector.broadcast %52 : vector<1x1024xf32> to vector<128x1024xf32>
    %54 = arith.addf %51, %53 : vector<128x1024xf32>
    %cst_35 = arith.constant 0.000000e+00 : f32
    %55 = vector.broadcast %cst_35 : f32 to vector<128x1024xf32>
    %56 = arith.cmpf oge, %54, %55 : vector<128x1024xf32>
    %cst_36 = arith.constant 2.000000e-01 : f32
    %57 = vector.broadcast %cst_36 : f32 to vector<128x1024xf32>
    %58 = arith.mulf %57, %54 : vector<128x1024xf32>
    %59 = arith.select %56, %54, %58 : vector<128x1024xi1>, vector<128x1024xf32>
    %c0_37 = arith.constant 0 : index
    %c0_38 = arith.constant 0 : index
    %60 = vector.load %arg14[%c0_37, %c0_38] : memref<1x1024xf32, #tpu.memory_space<vmem>>, vector<1x1024xf32>
    %cst_39 = arith.constant dense<0xFF800000> : vector<1024xf32>
    %61 = vector.multi_reduction <maximumf>, %59, %cst_39 [0] : vector<128x1024xf32> to vector<1024xf32>
    %62 = vector.shape_cast %61 : vector<1024xf32> to vector<1x1024xf32>
    %63 = arith.maximumf %60, %62 : vector<1x1024xf32>
    %c0_40 = arith.constant 0 : index
    %c0_41 = arith.constant 0 : index
    %64 = vector.load %arg14[%c0_40, %c0_41] : memref<1x1024xf32, #tpu.memory_space<vmem>>, vector<1x1024xf32>
    tpu.vector_store %arg14[%c0_40, %c0_41], %63 {strides = array<i32>} : memref<1x1024xf32, #tpu.memory_space<vmem>>, vector<1x1024xf32>,
    %c3_i32 = arith.constant 3 : i32
    %65 = arith.cmpi eq, %arg1, %c3_i32 : i32
    %66 = arith.extui %65 : i1 to i32
    %c0_i32_42 = arith.constant 0 : i32
    %67 = arith.cmpi ne, %66, %c0_i32_42 : i32
    scf.if %67 {
      %c0_43 = arith.constant 0 : index
      %c0_44 = arith.constant 0 : index
      %68 = vector.load %arg14[%c0_43, %c0_44] : memref<1x1024xf32, #tpu.memory_space<vmem>>, vector<1x1024xf32>
      %c0_45 = arith.constant 0 : index
      %c0_46 = arith.constant 0 : index
      %c0_47 = arith.constant 0 : index
      %69 = vector.load %arg13[%c0_45, %c0_46, %c0_47] : memref<1x1x1024xf32, #tpu.memory_space<vmem>>, vector<1x1x1024xf32>
      %70 = vector.shape_cast %69 : vector<1x1x1024xf32> to vector<1x1024xf32>
      %71 = vector.shape_cast %68 : vector<1x1024xf32> to vector<1x1x1024xf32>
      tpu.vector_store %arg13[%c0_45, %c0_46, %c0_47], %71 {strides = array<i32>} : memref<1x1x1024xf32, #tpu.memory_space<vmem>>, vector<1x1x1024xf32>,
    } else {
    }
    return
  }
  func.func @transform_0(%arg0: i32, %arg1: i32) -> (i32, i32, i32) {
    %c0_i32 = arith.constant 0 : i32
    %c0_i32_0 = arith.constant 0 : i32
    return %arg0, %arg1, %c0_i32 : i32, i32, i32
  }
  func.func @transform_1(%arg0: i32, %arg1: i32) -> (i32, i32) {
    %c0_i32 = arith.constant 0 : i32
    %c0_i32_0 = arith.constant 0 : i32
    %c0_i32_1 = arith.constant 0 : i32
    return %c0_i32, %c0_i32_0 : i32, i32
  }
  func.func @transform_2(%arg0: i32, %arg1: i32) -> (i32, i32) {
    %c0_i32 = arith.constant 0 : i32
    %c0_i32_0 = arith.constant 0 : i32
    %c0_i32_1 = arith.constant 0 : i32
    return %c0_i32, %c0_i32_0 : i32, i32
  }
  func.func @transform_3(%arg0: i32, %arg1: i32) -> (i32, i32) {
    %c0_i32 = arith.constant 0 : i32
    %c0_i32_0 = arith.constant 0 : i32
    %c0_i32_1 = arith.constant 0 : i32
    return %c0_i32, %c0_i32_0 : i32, i32
  }
  func.func @transform_4(%arg0: i32, %arg1: i32) -> (i32, i32) {
    %c0_i32 = arith.constant 0 : i32
    %c0_i32_0 = arith.constant 0 : i32
    %c0_i32_1 = arith.constant 0 : i32
    return %c0_i32, %c0_i32_0 : i32, i32
  }
  func.func @transform_5(%arg0: i32, %arg1: i32) -> (i32, i32) {
    %c0_i32 = arith.constant 0 : i32
    %c0_i32_0 = arith.constant 0 : i32
    %c0_i32_1 = arith.constant 0 : i32
    return %c0_i32, %c0_i32_0 : i32, i32
  }
  func.func @transform_6(%arg0: i32, %arg1: i32) -> (i32, i32) {
    %c0_i32 = arith.constant 0 : i32
    %c0_i32_0 = arith.constant 0 : i32
    %c0_i32_1 = arith.constant 0 : i32
    return %c0_i32, %c0_i32_0 : i32, i32
  }
  func.func @transform_7(%arg0: i32, %arg1: i32) -> (i32, i32) {
    %c0_i32 = arith.constant 0 : i32
    %c0_i32_0 = arith.constant 0 : i32
    %c0_i32_1 = arith.constant 0 : i32
    return %c0_i32, %c0_i32_0 : i32, i32
  }
  func.func @transform_8(%arg0: i32, %arg1: i32) -> (i32, i32) {
    %c0_i32 = arith.constant 0 : i32
    %c0_i32_0 = arith.constant 0 : i32
    %c0_i32_1 = arith.constant 0 : i32
    return %c0_i32, %c0_i32_0 : i32, i32
  }
  func.func @transform_9(%arg0: i32, %arg1: i32) -> (i32, i32) {
    %c0_i32 = arith.constant 0 : i32
    %c0_i32_0 = arith.constant 0 : i32
    %c0_i32_1 = arith.constant 0 : i32
    return %c0_i32, %c0_i32_0 : i32, i32
  }
  func.func @transform_10(%arg0: i32, %arg1: i32) -> (i32, i32) {
    %c0_i32 = arith.constant 0 : i32
    %c0_i32_0 = arith.constant 0 : i32
    %c0_i32_1 = arith.constant 0 : i32
    return %c0_i32, %c0_i32_0 : i32, i32
  }
  func.func @transform_11(%arg0: i32, %arg1: i32) -> (i32, i32, i32) {
    %c0_i32 = arith.constant 0 : i32
    %c0_i32_0 = arith.constant 0 : i32
    %c0_i32_1 = arith.constant 0 : i32
    return %arg0, %c0_i32, %c0_i32_0 : i32, i32, i32
  }
}

module attributes {stable_mosaic.version = 11 : i64} {
  func.func @_head_kernel(%arg0: i32, %arg1: memref<2x1024xf32, #tpu.memory_space<vmem>>, %arg2: memref<1024x512xbf16, #tpu.memory_space<vmem>>, %arg3: memref<1x512xf32, #tpu.memory_space<vmem>>, %arg4: memref<512x256xbf16, #tpu.memory_space<vmem>>, %arg5: memref<1x256xf32, #tpu.memory_space<vmem>>, %arg6: memref<256x8xbf16, #tpu.memory_space<vmem>>, %arg7: memref<1x8xf32, #tpu.memory_space<vmem>>, %arg8: memref<2x8xf32, #tpu.memory_space<vmem>>) attributes {dimension_semantics = [#tpu.dimension_semantics<arbitrary>], iteration_bounds = array<i64: 1>, scalar_prefetch = 0 : i64, scratch_operands = 0 : i64, tpu.core_type = #tpu.core_type<tc>, window_params = [{pipeline_mode = #tpu.pipeline_mode<synchronous>, transform_indices = @transform_0, window_bounds = array<i64: 2, 1024>}, {pipeline_mode = #tpu.pipeline_mode<synchronous>, transform_indices = @transform_1, window_bounds = array<i64: 1024, 512>}, {pipeline_mode = #tpu.pipeline_mode<synchronous>, transform_indices = @transform_2, window_bounds = array<i64: 1, 512>}, {pipeline_mode = #tpu.pipeline_mode<synchronous>, transform_indices = @transform_3, window_bounds = array<i64: 512, 256>}, {pipeline_mode = #tpu.pipeline_mode<synchronous>, transform_indices = @transform_4, window_bounds = array<i64: 1, 256>}, {pipeline_mode = #tpu.pipeline_mode<synchronous>, transform_indices = @transform_5, window_bounds = array<i64: 256, 8>}, {pipeline_mode = #tpu.pipeline_mode<synchronous>, transform_indices = @transform_6, window_bounds = array<i64: 1, 8>}, {pipeline_mode = #tpu.pipeline_mode<synchronous>, transform_indices = @transform_7, window_bounds = array<i64: 2, 8>}]} {
    %c0 = arith.constant 0 : index
    %c0_0 = arith.constant 0 : index
    %0 = vector.load %arg1[%c0, %c0_0] : memref<2x1024xf32, #tpu.memory_space<vmem>>, vector<2x1024xf32>
    %1 = arith.truncf %0 : vector<2x1024xf32> to vector<2x1024xbf16>
    %c0_1 = arith.constant 0 : index
    %c0_2 = arith.constant 0 : index
    %2 = vector.load %arg2[%c0_1, %c0_2] : memref<1024x512xbf16, #tpu.memory_space<vmem>>, vector<1024x512xbf16>
    %cst = arith.constant dense<0.000000e+00> : vector<2x512xf32>
    %3 = tpu.matmul %1, %2, %cst {dimension_numbers = #tpu.dot_dimension_numbers<[1], [0], [0], [1], [0, 0, 1, 1], [], []>} : vector<2x1024xbf16>, vector<1024x512xbf16>, vector<2x512xf32> -> vector<2x512xf32>
    %c0_3 = arith.constant 0 : index
    %c0_4 = arith.constant 0 : index
    %4 = vector.load %arg3[%c0_3, %c0_4] : memref<1x512xf32, #tpu.memory_space<vmem>>, vector<1x512xf32>
    %5 = vector.broadcast %4 : vector<1x512xf32> to vector<2x512xf32>
    %6 = arith.addf %3, %5 : vector<2x512xf32>
    %cst_5 = arith.constant 0.000000e+00 : f32
    %7 = vector.broadcast %cst_5 : f32 to vector<2x512xf32>
    %8 = arith.cmpf oge, %6, %7 : vector<2x512xf32>
    %cst_6 = arith.constant 2.000000e-01 : f32
    %9 = vector.broadcast %cst_6 : f32 to vector<2x512xf32>
    %10 = arith.mulf %9, %6 : vector<2x512xf32>
    %11 = arith.select %8, %6, %10 : vector<2x512xi1>, vector<2x512xf32>
    %12 = arith.truncf %11 : vector<2x512xf32> to vector<2x512xbf16>
    %c0_7 = arith.constant 0 : index
    %c0_8 = arith.constant 0 : index
    %13 = vector.load %arg4[%c0_7, %c0_8] : memref<512x256xbf16, #tpu.memory_space<vmem>>, vector<512x256xbf16>
    %cst_9 = arith.constant dense<0.000000e+00> : vector<2x256xf32>
    %14 = tpu.matmul %12, %13, %cst_9 {dimension_numbers = #tpu.dot_dimension_numbers<[1], [0], [0], [1], [0, 0, 1, 1], [], []>} : vector<2x512xbf16>, vector<512x256xbf16>, vector<2x256xf32> -> vector<2x256xf32>
    %c0_10 = arith.constant 0 : index
    %c0_11 = arith.constant 0 : index
    %15 = vector.load %arg5[%c0_10, %c0_11] : memref<1x256xf32, #tpu.memory_space<vmem>>, vector<1x256xf32>
    %16 = vector.broadcast %15 : vector<1x256xf32> to vector<2x256xf32>
    %17 = arith.addf %14, %16 : vector<2x256xf32>
    %cst_12 = arith.constant 0.000000e+00 : f32
    %18 = vector.broadcast %cst_12 : f32 to vector<2x256xf32>
    %19 = arith.cmpf oge, %17, %18 : vector<2x256xf32>
    %cst_13 = arith.constant 2.000000e-01 : f32
    %20 = vector.broadcast %cst_13 : f32 to vector<2x256xf32>
    %21 = arith.mulf %20, %17 : vector<2x256xf32>
    %22 = arith.select %19, %17, %21 : vector<2x256xi1>, vector<2x256xf32>
    %23 = arith.truncf %22 : vector<2x256xf32> to vector<2x256xbf16>
    %c0_14 = arith.constant 0 : index
    %c0_15 = arith.constant 0 : index
    %24 = vector.load %arg6[%c0_14, %c0_15] : memref<256x8xbf16, #tpu.memory_space<vmem>>, vector<256x8xbf16>
    %cst_16 = arith.constant dense<0.000000e+00> : vector<2x8xf32>
    %25 = tpu.matmul %23, %24, %cst_16 {dimension_numbers = #tpu.dot_dimension_numbers<[1], [0], [0], [1], [0, 0, 1, 1], [], []>} : vector<2x256xbf16>, vector<256x8xbf16>, vector<2x8xf32> -> vector<2x8xf32>
    %c0_17 = arith.constant 0 : index
    %c0_18 = arith.constant 0 : index
    %26 = vector.load %arg7[%c0_17, %c0_18] : memref<1x8xf32, #tpu.memory_space<vmem>>, vector<1x8xf32>
    %27 = vector.broadcast %26 : vector<1x8xf32> to vector<2x8xf32>
    %28 = arith.addf %25, %27 : vector<2x8xf32>
    %c0_19 = arith.constant 0 : index
    %c0_20 = arith.constant 0 : index
    %29 = vector.load %arg8[%c0_19, %c0_20] : memref<2x8xf32, #tpu.memory_space<vmem>>, vector<2x8xf32>
    tpu.vector_store %arg8[%c0_19, %c0_20], %28 {strides = array<i32>} : memref<2x8xf32, #tpu.memory_space<vmem>>, vector<2x8xf32>,
    return
  }
  func.func @transform_0(%arg0: i32) -> (i32, i32) {
    %c0_i32 = arith.constant 0 : i32
    %c0_i32_0 = arith.constant 0 : i32
    %c0_i32_1 = arith.constant 0 : i32
    return %c0_i32, %c0_i32_0 : i32, i32
  }
  func.func @transform_1(%arg0: i32) -> (i32, i32) {
    %c0_i32 = arith.constant 0 : i32
    %c0_i32_0 = arith.constant 0 : i32
    %c0_i32_1 = arith.constant 0 : i32
    return %c0_i32, %c0_i32_0 : i32, i32
  }
  func.func @transform_2(%arg0: i32) -> (i32, i32) {
    %c0_i32 = arith.constant 0 : i32
    %c0_i32_0 = arith.constant 0 : i32
    %c0_i32_1 = arith.constant 0 : i32
    return %c0_i32, %c0_i32_0 : i32, i32
  }
  func.func @transform_3(%arg0: i32) -> (i32, i32) {
    %c0_i32 = arith.constant 0 : i32
    %c0_i32_0 = arith.constant 0 : i32
    %c0_i32_1 = arith.constant 0 : i32
    return %c0_i32, %c0_i32_0 : i32, i32
  }
  func.func @transform_4(%arg0: i32) -> (i32, i32) {
    %c0_i32 = arith.constant 0 : i32
    %c0_i32_0 = arith.constant 0 : i32
    %c0_i32_1 = arith.constant 0 : i32
    return %c0_i32, %c0_i32_0 : i32, i32
  }
  func.func @transform_5(%arg0: i32) -> (i32, i32) {
    %c0_i32 = arith.constant 0 : i32
    %c0_i32_0 = arith.constant 0 : i32
    %c0_i32_1 = arith.constant 0 : i32
    return %c0_i32, %c0_i32_0 : i32, i32
  }
  func.func @transform_6(%arg0: i32) -> (i32, i32) {
    %c0_i32 = arith.constant 0 : i32
    %c0_i32_0 = arith.constant 0 : i32
    %c0_i32_1 = arith.constant 0 : i32
    return %c0_i32, %c0_i32_0 : i32, i32
  }
  func.func @transform_7(%arg0: i32) -> (i32, i32) {
    %c0_i32 = arith.constant 0 : i32
    %c0_i32_0 = arith.constant 0 : i32
    %c0_i32_1 = arith.constant 0 : i32
    return %c0_i32, %c0_i32_0 : i32, i32
  }
}

</mosaic_0001>

<bundles_post_ra>
// kernel: pointnet_cls_forward.2
= control target key start
LH: loop header
LB: loop body
LE: loop exit
PB: predicated region body
PF: predicated region fallthrough
CT: control target
= control target key end

     0   :  { %s3272_s17 = smov 0   ;;  %s3274_s18 = smov 0   ;;  %s4239_s0 = inlined_call_operand.vmem [shape: f32[2,512,3], index: 0, kind: input, shape index: {}]   ;;  %s4240_s1 = inlined_call_operand.vmem [shape: bf16[3,64], index: 1, kind: input, shape index: {}]   ;;  %s4241_s2 = inlined_call_operand.vmem [shape: f32[1,64], index: 2, kind: input, shape index: {}]   ;;  %s4242_s3 = inlined_call_operand.vmem [shape: bf16[64,64], index: 3, kind: input, shape index: {}]   ;;  %s4243_s4 = inlined_call_operand.vmem [shape: f32[1,64], index: 4, kind: input, shape index: {}]   ;;  %s4244_s5 = inlined_call_operand.vmem [shape: bf16[64,64], index: 5, kind: input, shape index: {}]   ;;  %s4245_s6 = inlined_call_operand.vmem [shape: f32[1,64], index: 6, kind: input, shape index: {}]   ;;  %s4246_s7 = inlined_call_operand.vmem [shape: bf16[64,128], index: 7, kind: input, shape index: {}]   ;;  %s4247_s8 = inlined_call_operand.vmem [shape: f32[1,128], index: 8, kind: input, shape index: {}]   ;;  %s4248_s9 = inlined_call_operand.vmem [shape: bf16[128,1024], index: 9, kind: input, shape index: {}]   ;;  %s4249_s10 = inlined_call_operand.vmem [shape: f32[1,1024], index: 10, kind: input, shape index: {}]   ;;  %s4250_s11 = inlined_call_operand.vmem [shape: f32[2,1,1024], index: 11, kind: output, shape index: {}]  }
   0x1   :  { %s3276_s19 = smov 0   ;;  %s3278_s20 = smov 0  }
   0x2   :  { %s3280_s21 = smov 0  }
   0x3 LB: > { %s30_s22 = sadd.s32 1, %s3198_s19  ;;  %s33_s23 = sadd.s32 1, %s3202_s20  ;;  %s3206_s21 = sphi %s3280_s21, %s21_s21   ;;  %s3202_s20 = sphi %s3278_s20, %s4254_s20   ;;  %s3198_s19 = sphi %s3276_s19, %s4253_s19   ;;  %s3194_s18 = sphi %s3274_s18, %s4252_s18   ;;  %s3190_s17 = sphi %s3272_s17, %s4251_s17  }
   0x4   : > { %p31_p0 = scmp.ge.s32.totalorder %s30_s22, 4  ;;  %p2856_p1 = scmp.ge.s32.totalorder %s3206_s21, 1 }
   0x5   : > { %p356_p2 = scmp.lt.s32.totalorder %s3206_s21, 9 }
   0x6   : > { %s4256_s22 = smov (%p31_p0, %s30_s22), 0  ;;  %s4258_s23 = smov (!%p31_p0, %s33_s23), %s3202_s20 }
   0x7   : > { %p357_p3 = pnand %p2856_p1, %p356_p2  ;;  %p35_p4 = scmp.ge.s32.totalorder %s4258_s23, 2 }
   0x8   : > { %s2857_s24 = sshll.u32 (!%p357_p3), %s3190_s17, 4  ;;  %p400_p5 = scmp.lt.s32.totalorder (!%p357_p3), %s3194_s18, 1 }
   0x9   : > { %s4260_s23 = smov (%p35_p4, %s4258_s23), 0  ;;  %360 = sbr.rel (%p357_p3) target bundleno = 1341 (0x53d), region = 64 }
   0xa   : > { %p402_p6 = scmp.lt.s32.totalorder (!%p357_p3), %s2857_s24, 63  ;;  %p2861_p7 = scmp.ne.s32.totalorder (!%p357_p3), %s3190_s17, 0 }
  0x10   : > { %s4262_s18 = smov (!%p400_p5, %s3194_s18), 1  ;;  %s4264_s24 = smov (!%p402_p6, %s2857_s24), 63 }
  0x11   : > { %s2858_s25 = sshll.u32 %s4262_s18, 6  ;;  %s2860_s26 = sshll.u32 %s4262_s18, 3  ;;  %v3208_v0 = vmov (!%p2861_p7), -inf  }
  0x12   : > { %s405_s27 = sadd.s32 %s2858_s25, %s4264_s24  ;;  %s3308_s30 = scalar_lea.vmem %s4250_s11, %s2860_s26  ;;  %418 = vst [vmem:[#allocation2] sm:$0xff] (!%p2861_p7), %v3208_v0 }
  0x13   : > { %s2859_s12 = sshll.u32 %s405_s27, 3  ;;  %417 = sbr.rel (%p2861_p7) target bundleno = 26 (0x1a), region = 68 }
  0x14   : > { %s3313_s15 = scalar_lea.vmem %s4239_s0, %s2859_s12 }
  0x1a PF: > { %v443_v1 = vld [vmem:[%s4240_s1] sm:$0x3]  ;;  %vm476_vm0 = vcmask 1040384   ;;  %vm477_vm1 = vcmask 1041408   ;;  %v3209_v3 = vmov 65535   ;;  %v420_v5 = vld [vmem:[%s3313_s15 + $0x8] sm:$0xff] }
  0x1b   : > { %v419_v2 = vld [vmem:[%s3313_s15] sm:$0xff]  ;;  %v478_v4 = vsel %vm476_vm0, 4294967295, %v3209_v3  ;;  %vm451_vm2 = vcmask 23552   ;;  %v421_v8 = vld [vmem:[%s3313_s15 + $0x10] sm:$0xff]  ;;  %v422_v9 = vld [vmem:[%s3313_s15 + $0x18] sm:$0xff]  ;;  %vm675_vm7 = vcmask 523264  }
  0x1c   : > { %v479_v6 = vsel %vm477_vm1, %v478_v4, 0  ;;  %v435_v7 = vpack.c.bf16 %v420_v5, %v419_v2  ;;  %v423_v11 = vld [vmem:[%s3313_s15 + $0x20] sm:$0xff]  ;;  %v424_v12 = vld [vmem:[%s3313_s15 + $0x28] sm:$0xff]  ;;  %v436_v13 = vpack.c.bf16 %v422_v9, %v421_v8  ;;  %v425_v16 = vld [vmem:[%s3313_s15 + $0x30] sm:$0xff]  ;;  %p2974_p8 = scmp.ne.s32.totalorder %s3190_s17, 3 }
  0x1d   : > { %v481_v10 = vand.u32 %v479_v6, %v443_v1  ;;  %v437_v14 = vpack.c.bf16 %v424_v12, %v423_v11  ;;  %v3156_v15 = vld [vmem:[%s4242_s3] sm:$0xff]   ;;  %v426_v17 = vld [vmem:[%s3313_s15 + $0x38] sm:$0xff]  ;;  %v428_v19 = vld [vmem:[%s3313_s15 + $0x48] sm:$0xff] }
  0x1e   : > { %3024 = vmatprep.mubr.msk.bf16.mxu0 %vm451_vm2, %v435_v7  ;;  %3040 = vmatprep.subr.bf16.mxu1 %v3156_v15  ;;  %v427_v18 = vld [vmem:[%s3313_s15 + $0x40] sm:$0xff]  ;;  %v438_v20 = vpack.c.bf16 %v426_v17, %v425_v16  ;;  %v429_v22 = vld [vmem:[%s3313_s15 + $0x50] sm:$0xff]  ;;  %v430_v23 = vld [vmem:[%s3313_s15 + $0x58] sm:$0xff] }
  0x1f   : > { %3022 = vmatprep.subr.bf16.mxu0 %v481_v10  ;;  %3041 = vmatpush3.bf16.msra.mxu1 %v3156_v15  ;;  %v439_v21 = vpack.c.bf16 %v428_v19, %v427_v18  ;;  %v431_v24 = vld [vmem:[%s3313_s15 + $0x60] sm:$0xff]  ;;  %v432_v25 = vld [vmem:[%s3313_s15 + $0x68] sm:$0xff]  ;;  %v440_v26 = vpack.c.bf16 %v430_v23, %v429_v22  ;;  %v433_v28 = vld [vmem:[%s3313_s15 + $0x70] sm:$0xff] }
  0x20   : > { %3023 = vmatpush3.bf16.msra.mxu0 %v481_v10  ;;  %v441_v27 = vpack.c.bf16 %v432_v25, %v431_v24  ;;  %v434_v29 = vld [vmem:[%s3313_s15 + $0x78] sm:$0xff]  ;;  %v3157_v31 = vld [vmem:[%s4242_s3 + $0x8] sm:$0xff]   ;;  %v3158_v32 = vld [vmem:[%s4242_s3 + $0x10] sm:$0xff]  }
  0x21   : > { %v442_v30 = vpack.c.bf16 %v434_v29, %v433_v28  ;;  %3042 = vmatprep.subr.bf16.mxu1 %v3157_v31  ;;  %v3159_v33 = vld [vmem:[%s4242_s3 + $0x18] sm:$0xff]   ;;  %v3160_v34 = vld [vmem:[%s4244_s5] sm:$0xff]   ;;  %v3161_v35 = vld [vmem:[%s4244_s5 + $0x8] sm:$0xff]  }
  0x22   : > { %3064 = vmatprep.subr.bf16.mxu0 %v3160_v34  ;;  %v3162_v36 = vld [vmem:[%s4244_s5 + $0x10] sm:$0xff]   ;;  %v3367_v37 = vld [vmem:[%s4241_s2] ss:$0 sm:$0xff] }
  0x23   : > { %3025 = vmatmul.mubr.msk.bf16.vlgmr.msra.gmra.mrb[0].mxu0 %vm451_vm2, %v436_v13  ;;  %3043 = vmatpush3.bf16.msra.mxu1 %v3157_v31 }
  0x24   : > { %3028 = vmatprep.mubr.msk.bf16.mxu0 %vm451_vm2, %v437_v14  ;;  %3044 = vmatprep.subr.bf16.mxu1 %v3158_v32 }
  0x25   : > { %3065 = vmatpush3.bf16.msra.mxu0 %v3160_v34 }
  0x26   : > { %3066 = vmatprep.subr.bf16.mxu0 %v3161_v35 }
  0x27   : > { %3045 = vmatpush3.bf16.msra.mxu1 %v3158_v32 }
  0x28   : > { %3046 = vmatprep.subr.bf16.mxu1 %v3159_v33 }
  0x29   : > { %3067 = vmatpush3.bf16.msra.mxu0 %v3161_v35 }
  0x2a   : > { %3068 = vmatprep.subr.bf16.mxu0 %v3162_v36 }
  0x2b   : > { %3029 = vmatmul.mubr.msk.bf16.gmra.mrb[4].mxu0 %vm451_vm2, %v438_v20  ;;  %3047 = vmatpush3.bf16.msra.mxu1 %v3159_v33 }
  0x2c   : > { %3032 = vmatprep.mubr.msk.bf16.mxu0 %vm451_vm2, %v439_v21 }
  0x2d   : > { %3069 = vmatpush3.bf16.msra.mxu0 %v3162_v36 }
  0x33   : > { %3033 = vmatmul.mubr.msk.bf16.gmra.mrb[8].mxu0 %vm451_vm2, %v440_v26 }
  0x34   : > { %3036 = vmatprep.mubr.msk.bf16.mxu0 %vm451_vm2, %v441_v27 }
  0x3b   : > { %3037 = vmatmul.mubr.msk.bf16.gmra.mrb[12].mxu0 %vm451_vm2, %v442_v30 }
  0xf6   : > { %v3026_v38 = vpop.f32.mrb[0].mxu0 }
  0xf7   : > { %v526_v39 = vadd.f32 %v3026_v38, %v3367_v37  ;;  %v517_v40 = vpop.f32.mrb[1].mxu0 }
  0xf8   : > { %v518_v41 = vadd.f32 %v3367_v37, %v517_v40  ;;  %v3027_v42 = vpop.f32.mrb[2].mxu0 }
  0xf9   : > { %v598_v43 = vmul.f32 0.2, %v526_v39  ;;  %v529_v44 = vadd.f32 %v3027_v42, %v3367_v37  ;;  %v520_v45 = vpop.f32.mrb[3].mxu0  ;;  %vm582_vm3 = vcmp.ge.f32.partialorder %v526_v39, 0.0 }
  0xfa   : > { %v596_v46 = vmul.f32 0.2, %v518_v41  ;;  %v521_v47 = vadd.f32 %v3367_v37, %v520_v45  ;;  %vm580_vm5 = vcmp.ge.f32.partialorder %v518_v41, 0.0 }
  0xfb   : > { %vm583_vm4 = vcmp.ge.f32.partialorder %v529_v44, 0.0  ;;  %v599_v48 = vmul.f32 0.2, %v529_v44  ;;  %v614_v50 = vsel %vm582_vm3, %v526_v39, %v598_v43 }
  0xfc   : > { %v597_v49 = vmul.f32 0.2, %v521_v47  ;;  %vm581_vm6 = vcmp.ge.f32.partialorder %v521_v47, 0.0  ;;  %v612_v54 = vsel %vm580_vm5, %v518_v41, %v596_v46 }
  0xfd   : > { %v615_v51 = vsel %vm583_vm4, %v529_v44, %v599_v48  ;;  %v3165_v48 = vld [vmem:[%s4246_s7 + $0x8] sm:$0xff]  }
  0xfe   : > { %v629_v52 = vpack.c.bf16 %v615_v51, %v614_v50  ;;  %v3030_v53 = vpop.f32.mrb[4].mxu0  ;;  %v613_v55 = vsel %vm581_vm6, %v521_v47, %v597_v49  ;;  %v3164_v47 = vld [vmem:[%s4246_s7] sm:$0xff]   ;;  %v3166_v49 = vld [vmem:[%s4246_s7 + $0x10] sm:$0xff]  }
  0xff   : > { %v542_v56 = vadd.f32 %v3030_v53, %v3367_v37  ;;  %v533_v57 = vpop.f32.mrb[5].mxu0  ;;  %v628_v58 = vpack.c.bf16 %v613_v55, %v612_v54  ;;  %3088 = vmatprep.subr.bf16.mxu1 %v3164_v47  ;;  %v3408_v50 = vld [vmem:[%s4243_s4] ss:$0 sm:$0xff] }
 0x100   : > { %v534_v59 = vadd.f32 %v3367_v37, %v533_v57  ;;  %v3031_v60 = vpop.f32.mrb[6].mxu0 }
 0x101   : > { %vm586_vm8 = vcmp.ge.f32.partialorder %v542_v56, 0.0  ;;  %v602_v61 = vmul.f32 0.2, %v542_v56  ;;  %v545_v62 = vadd.f32 %v3031_v60, %v3367_v37  ;;  %v536_v63 = vpop.f32.mrb[7].mxu0  ;;  %3048 = vmatprep.mubr.msk.bf16.mxu1 %vm675_vm7, %v628_v58 }
 0x102   : > { %vm584_vm9 = vcmp.ge.f32.partialorder %v534_v59, 0.0  ;;  %v600_v0 = vmul.f32 0.2, %v534_v59  ;;  %v537_v1 = vadd.f32 %v3367_v37, %v536_v63  ;;  %3049 = vmatmul.mubr.msk.bf16.vlgmr.msra.gmra.mrb[0].mxu1 %vm675_vm7, %v629_v52 }
 0x103   : > { %v618_v2 = vsel %vm586_vm8, %v542_v56, %v602_v61  ;;  %vm587_vm10 = vcmp.ge.f32.partialorder %v545_v62, 0.0  ;;  %v603_v3 = vmul.f32 0.2, %v545_v62  ;;  %3089 = vmatpush3.bf16.msra.mxu1 %v3164_v47 }
 0x104   : > { %v616_v4 = vsel %vm584_vm9, %v534_v59, %v600_v0  ;;  %vm585_vm11 = vcmp.ge.f32.partialorder %v537_v1, 0.0  ;;  %v601_v5 = vmul.f32 0.2, %v537_v1  ;;  %3090 = vmatprep.subr.bf16.mxu1 %v3165_v48 }
 0x105   : > { %v619_v6 = vsel %vm587_vm10, %v545_v62, %v603_v3 }
 0x106   : > { %v631_v7 = vpack.c.bf16 %v619_v6, %v618_v2  ;;  %v617_v8 = vsel %vm585_vm11, %v537_v1, %v601_v5  ;;  %v3034_v9 = vpop.f32.mrb[8].mxu0 }
 0x107   : > { %v630_v10 = vpack.c.bf16 %v617_v8, %v616_v4  ;;  %v558_v11 = vadd.f32 %v3034_v9, %v3367_v37  ;;  %v549_v12 = vpop.f32.mrb[9].mxu0  ;;  %3091 = vmatpush3.bf16.msra.mxu1 %v3165_v48 }
 0x108   : > { %v550_v13 = vadd.f32 %v3367_v37, %v549_v12  ;;  %v3035_v14 = vpop.f32.mrb[10].mxu0  ;;  %3092 = vmatprep.subr.bf16.mxu1 %v3166_v49 }
 0x109   : > { %vm590_vm12 = vcmp.ge.f32.partialorder %v558_v11, 0.0  ;;  %v606_v15 = vmul.f32 0.2, %v558_v11  ;;  %v561_v16 = vadd.f32 %v3035_v14, %v3367_v37  ;;  %v552_v17 = vpop.f32.mrb[11].mxu0  ;;  %3052 = vmatprep.mubr.msk.bf16.mxu1 %vm675_vm7, %v630_v10 }
 0x10a   : > { %vm588_vm13 = vcmp.ge.f32.partialorder %v550_v13, 0.0  ;;  %v604_v18 = vmul.f32 0.2, %v550_v13  ;;  %v553_v19 = vadd.f32 %v3367_v37, %v552_v17  ;;  %3053 = vmatmul.mubr.msk.bf16.gmra.mrb[4].mxu1 %vm675_vm7, %v631_v7 }
 0x10b   : > { %v622_v20 = vsel %vm590_vm12, %v558_v11, %v606_v15  ;;  %vm591_vm14 = vcmp.ge.f32.partialorder %v561_v16, 0.0  ;;  %v607_v21 = vmul.f32 0.2, %v561_v16  ;;  %3093 = vmatpush3.bf16.msra.mxu1 %v3166_v49 }
 0x10c   : > { %v620_v22 = vsel %vm588_vm13, %v550_v13, %v604_v18  ;;  %vm589_vm15 = vcmp.ge.f32.partialorder %v553_v19, 0.0  ;;  %v605_v23 = vmul.f32 0.2, %v553_v19 }
 0x10d   : > { %v623_v24 = vsel %vm591_vm14, %v561_v16, %v607_v21 }
 0x10e   : > { %v633_v25 = vpack.c.bf16 %v623_v24, %v622_v20  ;;  %v621_v26 = vsel %vm589_vm15, %v553_v19, %v605_v23  ;;  %v3038_v27 = vpop.f32.mrb[12].mxu0 }
 0x10f   : > { %v632_v28 = vpack.c.bf16 %v621_v26, %v620_v22  ;;  %v574_v29 = vadd.f32 %v3038_v27, %v3367_v37  ;;  %v565_v30 = vpop.f32.mrb[13].mxu0 }
 0x110   : > { %v566_v31 = vadd.f32 %v3367_v37, %v565_v30  ;;  %v3039_v32 = vpop.f32.mrb[14].mxu0 }
 0x111   : > { %vm594_vm0 = vcmp.ge.f32.partialorder %v574_v29, 0.0  ;;  %v610_v33 = vmul.f32 0.2, %v574_v29  ;;  %v577_v34 = vadd.f32 %v3039_v32, %v3367_v37  ;;  %3056 = vmatprep.mubr.msk.bf16.mxu1 %vm675_vm7, %v632_v28  ;;  %v568_v35 = vpop.f32.mrb[15].mxu0 }
 0x112   : > { %vm592_vm1 = vcmp.ge.f32.partialorder %v566_v31, 0.0  ;;  %v608_v36 = vmul.f32 0.2, %v566_v31  ;;  %v569_v38 = vadd.f32 %v3367_v37, %v568_v35  ;;  %3057 = vmatmul.mubr.msk.bf16.gmra.mrb[8].mxu1 %vm675_vm7, %v633_v25  ;;  %v3163_v37 = vld [vmem:[%s4244_s5 + $0x18] sm:$0xff]  }
 0x113   : > { %v626_v39 = vsel %vm594_vm0, %v574_v29, %v610_v33  ;;  %vm595_vm2 = vcmp.ge.f32.partialorder %v577_v34, 0.0  ;;  %v611_v40 = vmul.f32 0.2, %v577_v34  ;;  %3070 = vmatprep.subr.bf16.mxu0 %v3163_v37 }
 0x114   : > { %v624_v41 = vsel %vm592_vm1, %v566_v31, %v608_v36  ;;  %vm593_vm3 = vcmp.ge.f32.partialorder %v569_v38, 0.0  ;;  %v609_v42 = vmul.f32 0.2, %v569_v38  ;;  %3071 = vmatpush3.bf16.msra.mxu0 %v3163_v37 }
 0x115   : > { %v627_v43 = vsel %vm595_vm2, %v577_v34, %v611_v40 }
 0x116   : > { %v635_v44 = vpack.c.bf16 %v627_v43, %v626_v39  ;;  %v625_v45 = vsel %vm593_vm3, %v569_v38, %v609_v42 }
 0x117   : > { %v634_v46 = vpack.c.bf16 %v625_v45, %v624_v41 }
 0x119   : > { %3060 = vmatprep.mubr.msk.bf16.mxu1 %vm675_vm7, %v634_v46 }
 0x11a   : > { %3061 = vmatmul.mubr.msk.bf16.gmra.mrb[12].mxu1 %vm675_vm7, %v635_v44 }
 0x1d5   : > { %v3050_v51 = vpop.f32.mrb[0].mxu1 }
 0x1d6   : > { %v743_v52 = vadd.f32 %v3050_v51, %v3408_v50  ;;  %v734_v53 = vpop.f32.mrb[1].mxu1 }
 0x1d7   : > { %v735_v54 = vadd.f32 %v3408_v50, %v734_v53  ;;  %v3051_v55 = vpop.f32.mrb[2].mxu1 }
 0x1d8   : > { %v815_v56 = vmul.f32 0.2, %v743_v52  ;;  %v746_v57 = vadd.f32 %v3051_v55, %v3408_v50  ;;  %v737_v58 = vpop.f32.mrb[3].mxu1  ;;  %vm799_vm4 = vcmp.ge.f32.partialorder %v743_v52, 0.0 }
 0x1d9   : > { %v813_v59 = vmul.f32 0.2, %v735_v54  ;;  %v738_v60 = vadd.f32 %v3408_v50, %v737_v58  ;;  %vm797_vm5 = vcmp.ge.f32.partialorder %v735_v54, 0.0 }
 0x1da   : > { %vm800_vm6 = vcmp.ge.f32.partialorder %v746_v57, 0.0  ;;  %v816_v61 = vmul.f32 0.2, %v746_v57  ;;  %v831_v63 = vsel %vm799_vm4, %v743_v52, %v815_v56 }
 0x1db   : > { %vm798_vm8 = vcmp.ge.f32.partialorder %v738_v60, 0.0  ;;  %v814_v62 = vmul.f32 0.2, %v738_v60  ;;  %v829_v1 = vsel %vm797_vm5, %v735_v54, %v813_v59 }
 0x1dc   : > { %v832_v0 = vsel %vm800_vm6, %v746_v57, %v816_v61  ;;  %v1289_v61 = vld [vmem:[%s4248_s9 + $0x20] sm:$0xff] }
 0x1dd   : > { %v846_v2 = vpack.c.bf16 %v832_v0, %v831_v63  ;;  %v830_v3 = vsel %vm798_vm8, %v738_v60, %v814_v62  ;;  %v3054_v4 = vpop.f32.mrb[4].mxu1  ;;  %v1285_v60 = vld [vmem:[%s4248_s9] sm:$0xff]  ;;  %v3446_v62 = vld [vmem:[%s4248_s9 + $0x8] sm:$0xff] }
 0x1de   : > { %v845_v5 = vpack.c.bf16 %v830_v3, %v829_v1  ;;  %v759_v6 = vadd.f32 %v3054_v4, %v3408_v50  ;;  %v750_v7 = vpop.f32.mrb[5].mxu1  ;;  %v2910_v63 = vcombine.low %v1285_v60, %v1289_v61  ;;  %v2911_v0 = vcombine.high %v1285_v60, %v1289_v61  ;;  %v3451_v1 = vld [vmem:[%s4248_s9 + $0x28] sm:$0xff]  ;;  %v1297_v3 = vld [vmem:[%s4248_s9 + $0x60] sm:$0xff] }
 0x1df   : > { %v751_v8 = vadd.f32 %v3408_v50, %v750_v7  ;;  %v3055_v9 = vpop.f32.mrb[6].mxu1  ;;  %v2912_v4 = vcombine.low %v3446_v62, %v3451_v1  ;;  %v1301_v7 = vld [vmem:[%s4248_s9 + $0x80] sm:$0xff] }
 0x1e0   : > { %v819_v10 = vmul.f32 0.2, %v759_v6  ;;  %v762_v11 = vadd.f32 %v3055_v9, %v3408_v50  ;;  %v753_v12 = vpop.f32.mrb[7].mxu1  ;;  %3072 = vmatprep.mubr.msk.bf16.mxu0 %vm675_vm7, %v845_v5  ;;  %vm803_vm9 = vcmp.ge.f32.partialorder %v759_v6, 0.0  ;;  %v2913_v5 = vcombine.high %v3446_v62, %v3451_v1  ;;  %1711 = vmatprep.subr.bf16.mxu0 %v2911_v0 }
 0x1e1   : > { %v817_v13 = vmul.f32 0.2, %v751_v8  ;;  %v754_v14 = vadd.f32 %v3408_v50, %v753_v12  ;;  %3073 = vmatmul.mubr.msk.bf16.vlgmr.msra.gmra.mrb[16].mxu0 %vm675_vm7, %v846_v2  ;;  %vm801_vm10 = vcmp.ge.f32.partialorder %v751_v8, 0.0  ;;  %v1293_v2 = vld [vmem:[%s4248_s9 + $0x40] sm:$0xff] }
 0x1e2   : > { %vm804_vm11 = vcmp.ge.f32.partialorder %v762_v11, 0.0  ;;  %v820_v15 = vmul.f32 0.2, %v762_v11  ;;  %v835_v17 = vsel %vm803_vm9, %v759_v6, %v819_v10  ;;  %v2919_v6 = vcombine.high %v1293_v2, %v1297_v3  ;;  %1712 = vmatpush1.bf16.msra.mxu0 %v2910_v63  ;;  %v1313_v12 = vld [vmem:[%s4248_s9 + $0xe0] sm:$0xff] }
 0x1e3   : > { %vm802_vm12 = vcmp.ge.f32.partialorder %v754_v14, 0.0  ;;  %v818_v16 = vmul.f32 0.2, %v754_v14  ;;  %v833_v19 = vsel %vm801_vm10, %v751_v8, %v817_v13  ;;  %v1305_v8 = vld [vmem:[%s4248_s9 + $0xa0] sm:$0xff]  ;;  %v2918_v9 = vcombine.low %v1293_v2, %v1297_v3  ;;  %v1310_v2 = vld [vmem:[%s4248_s9 + $0xc8] sm:$0xff] }
 0x1e4   : > { %v836_v18 = vsel %vm804_vm11, %v762_v11, %v820_v15  ;;  %1713 = vmatprep.subr.bf16.mxu0 %v2919_v6  ;;  %v2927_v10 = vcombine.high %v1301_v7, %v1305_v8  ;;  %v1309_v11 = vld [vmem:[%s4248_s9 + $0xc0] sm:$0xff]  ;;  %v2926_v13 = vcombine.low %v1301_v7, %v1305_v8  ;;  %v1314_v3 = vld [vmem:[%s4248_s9 + $0xe8] sm:$0xff] }
 0x1e5   : > { %v848_v20 = vpack.c.bf16 %v836_v18, %v835_v17  ;;  %v834_v21 = vsel %vm802_vm12, %v754_v14, %v818_v16  ;;  %v3058_v22 = vpop.f32.mrb[8].mxu1  ;;  %v2935_v14 = vcombine.high %v1309_v11, %v1313_v12  ;;  %v1317_v15 = vld [vmem:[%s4248_s9 + $0x100] sm:$0xff]  ;;  %v2934_v17 = vcombine.low %v1309_v11, %v1313_v12 }
 0x1e6   : > { %v847_v23 = vpack.c.bf16 %v834_v21, %v833_v19  ;;  %v775_v24 = vadd.f32 %v3058_v22, %v3408_v50  ;;  %v766_v25 = vpop.f32.mrb[9].mxu1  ;;  %1714 = vmatpush1.bf16.msra.mxu0 %v2918_v9  ;;  %v1321_v16 = vld [vmem:[%s4248_s9 + $0x120] sm:$0xff]  ;;  %v2937_v12 = vcombine.high %v1310_v2, %v1314_v3 }
 0x1e7   : > { %v767_v26 = vadd.f32 %v3408_v50, %v766_v25  ;;  %v3059_v27 = vpop.f32.mrb[10].mxu1  ;;  %1715 = vmatprep.subr.bf16.mxu0 %v2927_v10  ;;  %v2943_v18 = vcombine.high %v1317_v15, %v1321_v16  ;;  %v1325_v19 = vld [vmem:[%s4248_s9 + $0x140] sm:$0xff]  ;;  %v2942_v21 = vcombine.low %v1317_v15, %v1321_v16  ;;  %v1318_v16 = vld [vmem:[%s4248_s9 + $0x108] sm:$0xff] }
 0x1e8   : > { %vm807_vm13 = vcmp.ge.f32.partialorder %v775_v24, 0.0  ;;  %v823_v28 = vmul.f32 0.2, %v775_v24  ;;  %v778_v29 = vadd.f32 %v3059_v27, %v3408_v50  ;;  %v769_v30 = vpop.f32.mrb[11].mxu1  ;;  %3076 = vmatprep.mubr.msk.bf16.mxu0 %vm675_vm7, %v847_v23 }
 0x1e9   : > { %vm805_vm14 = vcmp.ge.f32.partialorder %v767_v26, 0.0  ;;  %v821_v31 = vmul.f32 0.2, %v767_v26  ;;  %v770_v32 = vadd.f32 %v3408_v50, %v769_v30  ;;  %3077 = vmatmul.mubr.msk.bf16.gmra.mrb[20].mxu0 %vm675_vm7, %v848_v20  ;;  %v1329_v20 = vld [vmem:[%s4248_s9 + $0x160] sm:$0xff] }
 0x1ea   : > { %v839_v33 = vsel %vm807_vm13, %v775_v24, %v823_v28  ;;  %vm808_vm15 = vcmp.ge.f32.partialorder %v778_v29, 0.0  ;;  %v824_v34 = vmul.f32 0.2, %v778_v29  ;;  %1716 = vmatpush1.bf16.msra.mxu0 %v2926_v13  ;;  %v2951_v22 = vcombine.high %v1325_v19, %v1329_v20  ;;  %v3490_v24 = vld [vmem:[%s4245_s6] ss:$0 sm:$0xff] }
 0x1eb   : > { %v837_v35 = vsel %vm805_vm14, %v767_v26, %v821_v31  ;;  %vm806_vm0 = vcmp.ge.f32.partialorder %v770_v32, 0.0  ;;  %v822_v36 = vmul.f32 0.2, %v770_v32  ;;  %1717 = vmatprep.subr.bf16.mxu0 %v2935_v14  ;;  %v2950_v23 = vcombine.low %v1325_v19, %v1329_v20 }
 0x1ec   : > { %v840_v38 = vsel %vm808_vm15, %v778_v29, %v824_v34 }
 0x1ed   : > { %v850_v39 = vpack.c.bf16 %v840_v38, %v839_v33  ;;  %v838_v40 = vsel %vm806_vm0, %v770_v32, %v822_v36  ;;  %v3062_v41 = vpop.f32.mrb[12].mxu1 }
 0x1ee   : > { %v849_v42 = vpack.c.bf16 %v838_v40, %v837_v35  ;;  %v791_v43 = vadd.f32 %v3062_v41, %v3408_v50  ;;  %v782_v44 = vpop.f32.mrb[13].mxu1  ;;  %1718 = vmatpush1.bf16.msra.mxu0 %v2934_v17  ;;  %v1294_v40 = vld [vmem:[%s4248_s9 + $0x48] sm:$0xff] }
 0x1ef   : > { %v783_v45 = vadd.f32 %v3408_v50, %v782_v44  ;;  %v3063_v46 = vpop.f32.mrb[14].mxu1  ;;  %1719 = vmatprep.subr.bf16.mxu0 %v2943_v18  ;;  %v1298_v41 = vld [vmem:[%s4248_s9 + $0x68] sm:$0xff] }
 0x1f0   : > { %vm811_vm1 = vcmp.ge.f32.partialorder %v791_v43, 0.0  ;;  %v827_v37 = vmul.f32 0.2, %v791_v43  ;;  %v794_v47 = vadd.f32 %v3063_v46, %v3408_v50  ;;  %3080 = vmatprep.mubr.msk.bf16.mxu0 %vm675_vm7, %v849_v42  ;;  %v785_v48 = vpop.f32.mrb[15].mxu1  ;;  %v1322_v17 = vld [vmem:[%s4248_s9 + $0x128] sm:$0xff] }
 0x1f1   : > { %vm809_vm2 = vcmp.ge.f32.partialorder %v783_v45, 0.0  ;;  %v825_v49 = vmul.f32 0.2, %v783_v45  ;;  %v786_v51 = vadd.f32 %v3408_v50, %v785_v48  ;;  %3081 = vmatmul.mubr.msk.bf16.gmra.mrb[24].mxu0 %vm675_vm7, %v850_v39  ;;  %v3167_v50 = vld [vmem:[%s4246_s7 + $0x18] sm:$0xff]  }
 0x1f2   : > { %v843_v52 = vsel %vm811_vm1, %v791_v43, %v827_v37  ;;  %vm812_vm3 = vcmp.ge.f32.partialorder %v794_v47, 0.0  ;;  %v828_v53 = vmul.f32 0.2, %v794_v47  ;;  %3094 = vmatprep.subr.bf16.mxu1 %v3167_v50  ;;  %1720 = vmatpush1.bf16.msra.mxu0 %v2942_v21 }
 0x1f3   : > { %v841_v54 = vsel %vm809_vm2, %v783_v45, %v825_v49  ;;  %vm810_vm4 = vcmp.ge.f32.partialorder %v786_v51, 0.0  ;;  %v826_v55 = vmul.f32 0.2, %v786_v51  ;;  %3095 = vmatpush3.bf16.msra.mxu1 %v3167_v50  ;;  %1721 = vmatprep.subr.bf16.mxu0 %v2951_v22  ;;  %v2920_v50 = vcombine.low %v1294_v40, %v1298_v41 }
 0x1f4   : > { %v844_v56 = vsel %vm812_vm3, %v794_v47, %v828_v53  ;;  %1824 = vmatprep.subr.bf16.mxu1 %v2913_v5  ;;  %v2936_v22 = vcombine.low %v1310_v2, %v1314_v3  ;;  %v1346_v3 = vld [vmem:[%s4248_s9 + $0x1e8] sm:$0xff] }
 0x1f5   : > { %v852_v57 = vpack.c.bf16 %v844_v56, %v843_v52  ;;  %v842_v58 = vsel %vm810_vm4, %v786_v51, %v826_v55  ;;  %v2921_v51 = vcombine.high %v1294_v40, %v1298_v41  ;;  %v1302_v55 = vld [vmem:[%s4248_s9 + $0x88] sm:$0xff] }
 0x1f6   : > { %v851_v59 = vpack.c.bf16 %v842_v58, %v841_v54  ;;  %1722 = vmatpush1.bf16.msra.mxu0 %v2950_v23  ;;  %v1306_v56 = vld [vmem:[%s4248_s9 + $0xa8] sm:$0xff] }
 0x1f7   : > { %v2929_v61 = vcombine.high %v1302_v55, %v1306_v56  ;;  %v2928_v9 = vcombine.low %v1302_v55, %v1306_v56  ;;  %v1337_v55 = vld [vmem:[%s4248_s9 + $0x1a0] sm:$0xff] }
 0x1f8   : > { %3084 = vmatprep.mubr.msk.bf16.mxu0 %vm675_vm7, %v851_v59 }
 0x1f9   : > { %3085 = vmatmul.mubr.msk.bf16.gmra.mrb[28].mxu0 %vm675_vm7, %v852_v57 }
 0x2b4   : > { %v3074_v25 = vpop.f32.mrb[16].mxu0 }
 0x2b5   : > { %v959_v26 = vadd.f32 %v3074_v25, %v3490_v24  ;;  %v950_v27 = vpop.f32.mrb[17].mxu0 }
 0x2b6   : > { %v951_v28 = vadd.f32 %v3490_v24, %v950_v27  ;;  %v3075_v29 = vpop.f32.mrb[18].mxu0 }
 0x2b7   : > { %v1031_v30 = vmul.f32 0.2, %v959_v26  ;;  %v962_v31 = vadd.f32 %v3075_v29, %v3490_v24  ;;  %v953_v32 = vpop.f32.mrb[19].mxu0  ;;  %vm1015_vm5 = vcmp.ge.f32.partialorder %v959_v26, 0.0  ;;  %v1330_v29 = vld [vmem:[%s4248_s9 + $0x168] sm:$0xff] }
 0x2b8   : > { %v1029_v33 = vmul.f32 0.2, %v951_v28  ;;  %v954_v34 = vadd.f32 %v3490_v24, %v953_v32  ;;  %vm1013_vm6 = vcmp.ge.f32.partialorder %v951_v28, 0.0 }
 0x2b9   : > { %vm1016_vm8 = vcmp.ge.f32.partialorder %v962_v31, 0.0  ;;  %v1032_v35 = vmul.f32 0.2, %v962_v31  ;;  %v1047_v38 = vsel %vm1015_vm5, %v959_v26, %v1031_v30  ;;  %v2945_v26 = vcombine.high %v1318_v16, %v1322_v17 }
 0x2ba   : > { %vm1014_vm9 = vcmp.ge.f32.partialorder %v954_v34, 0.0  ;;  %v1030_v36 = vmul.f32 0.2, %v954_v34  ;;  %v1045_v42 = vsel %vm1013_vm6, %v951_v28, %v1029_v33  ;;  %v1326_v28 = vld [vmem:[%s4248_s9 + $0x148] sm:$0xff] }
 0x2bb   : > { %v1048_v39 = vsel %vm1016_vm8, %v962_v31, %v1032_v35  ;;  %v2953_v40 = vcombine.high %v1326_v28, %v1330_v29 }
 0x2bc   : > { %v1062_v43 = vpack.c.bf16 %v1048_v39, %v1047_v38  ;;  %v1046_v44 = vsel %vm1014_vm9, %v954_v34, %v1030_v36  ;;  %v3078_v45 = vpop.f32.mrb[20].mxu0  ;;  %v2944_v36 = vcombine.low %v1318_v16, %v1322_v17 }
 0x2bd   : > { %v1061_v46 = vpack.c.bf16 %v1046_v44, %v1045_v42  ;;  %v975_v37 = vadd.f32 %v3078_v45, %v3490_v24  ;;  %v966_v47 = vpop.f32.mrb[21].mxu0 }
 0x2be   : > { %v967_v48 = vadd.f32 %v3490_v24, %v966_v47  ;;  %v3079_v49 = vpop.f32.mrb[22].mxu0  ;;  %v2952_v47 = vcombine.low %v1326_v28, %v1330_v29  ;;  %v1295_v28 = vld [vmem:[%s4248_s9 + $0x50] sm:$0xff] }
 0x2bf   : > { %v1035_v52 = vmul.f32 0.2, %v975_v37  ;;  %v978_v53 = vadd.f32 %v3079_v49, %v3490_v24  ;;  %v969_v54 = vpop.f32.mrb[23].mxu0  ;;  %3096 = vmatprep.mubr.msk.bf16.mxu1 %vm675_vm7, %v1061_v46  ;;  %vm1019_vm10 = vcmp.ge.f32.partialorder %v975_v37, 0.0 }
 0x2c0   : > { %v1033_v57 = vmul.f32 0.2, %v967_v48  ;;  %v970_v58 = vadd.f32 %v3490_v24, %v969_v54  ;;  %3097 = vmatmul.mubr.msk.bf16.vlgmr.msra.gmra.mrb[16].mxu1 %vm675_vm7, %v1062_v43  ;;  %vm1017_vm11 = vcmp.ge.f32.partialorder %v967_v48, 0.0 }
 0x2c1   : > { %vm1020_vm12 = vcmp.ge.f32.partialorder %v978_v53, 0.0  ;;  %v1036_v59 = vmul.f32 0.2, %v978_v53  ;;  %1825 = vmatpush1.bf16.msra.mxu1 %v2912_v4  ;;  %v1051_v63 = vsel %vm1019_vm10, %v975_v37, %v1035_v52 }
 0x2c2   : > { %vm1018_vm13 = vcmp.ge.f32.partialorder %v970_v58, 0.0  ;;  %v1034_v60 = vmul.f32 0.2, %v970_v58  ;;  %1826 = vmatprep.subr.bf16.mxu1 %v2921_v51  ;;  %v1049_v5 = vsel %vm1017_vm11, %v967_v48, %v1033_v57  ;;  %v1334_v57 = vld [vmem:[%s4248_s9 + $0x188] sm:$0xff] }
 0x2c3   : > { %v1052_v0 = vsel %vm1020_vm12, %v978_v53, %v1036_v59 }
 0x2c4   : > { %v1064_v6 = vpack.c.bf16 %v1052_v0, %v1051_v63  ;;  %v1050_v7 = vsel %vm1018_vm13, %v970_v58, %v1034_v60  ;;  %v3082_v62 = vpop.f32.mrb[24].mxu0  ;;  %v1338_v58 = vld [vmem:[%s4248_s9 + $0x1a8] sm:$0xff]  ;;  %v1345_v63 = vld [vmem:[%s4248_s9 + $0x1e0] sm:$0xff] }
 0x2c5   : > { %v1063_v1 = vpack.c.bf16 %v1050_v7, %v1049_v5  ;;  %v991_v4 = vadd.f32 %v3082_v62, %v3490_v24  ;;  %v982_v8 = vpop.f32.mrb[25].mxu0  ;;  %1827 = vmatpush1.bf16.msra.mxu1 %v2920_v50  ;;  %v2960_v50 = vcombine.low %v1334_v57, %v1338_v58  ;;  %v2961_v60 = vcombine.high %v1334_v57, %v1338_v58  ;;  %v1342_v0 = vld [vmem:[%s4248_s9 + $0x1c8] sm:$0xff] }
 0x2c6   : > { %v983_v10 = vadd.f32 %v3490_v24, %v982_v8  ;;  %v3083_v11 = vpop.f32.mrb[26].mxu0  ;;  %1828 = vmatprep.subr.bf16.mxu1 %v2929_v61  ;;  %v1341_v61 = vld [vmem:[%s4248_s9 + $0x1c0] sm:$0xff]  ;;  %v2969_v7 = vcombine.high %v1342_v0, %v1346_v3  ;;  %v3210_v62 = vmov 0   ;;  %v1288_v8 = vld [vmem:[%s4248_s9 + $0x18] sm:$0xff] }
 0x2c7   : > { %vm1023_vm14 = vcmp.ge.f32.partialorder %v991_v4, 0.0  ;;  %v1039_v13 = vmul.f32 0.2, %v991_v4  ;;  %v994_v14 = vadd.f32 %v3083_v11, %v3490_v24  ;;  %v985_v15 = vpop.f32.mrb[27].mxu0  ;;  %3100 = vmatprep.mubr.msk.bf16.mxu1 %vm675_vm7, %v1063_v1  ;;  %v2967_v2 = vcombine.high %v1341_v61, %v1345_v63  ;;  %1743 = vmatprep.mubr.bf16.mxu0 %v3210_v62  ;;  %v1287_v1 = vld [vmem:[%s4248_s9 + $0x10] sm:$0xff]  ;;  %v1292_v11 = vld [vmem:[%s4248_s9 + $0x38] sm:$0xff] }
 0x2c8   : > { %vm1021_vm15 = vcmp.ge.f32.partialorder %v983_v10, 0.0  ;;  %v1037_v18 = vmul.f32 0.2, %v983_v10  ;;  %v986_v19 = vadd.f32 %v3490_v24, %v985_v15  ;;  %3101 = vmatmul.mubr.msk.bf16.gmra.mrb[20].mxu1 %vm675_vm7, %v1064_v6  ;;  %v2966_v5 = vcombine.low %v1341_v61, %v1345_v63 }
 0x2c9   : > { %v1055_v20 = vsel %vm1023_vm14, %v991_v4, %v1039_v13  ;;  %vm1024_vm0 = vcmp.ge.f32.partialorder %v994_v14, 0.0  ;;  %v1040_v21 = vmul.f32 0.2, %v994_v14  ;;  %1829 = vmatpush1.bf16.msra.mxu1 %v2928_v9  ;;  %v2968_v6 = vcombine.low %v1342_v0, %v1346_v3  ;;  %v1291_v4 = vld [vmem:[%s4248_s9 + $0x30] sm:$0xff]  ;;  %v1316_v3 = vld [vmem:[%s4248_s9 + $0xf8] sm:$0xff] }
 0x2ca   : > { %v1053_v23 = vsel %vm1021_vm15, %v983_v10, %v1037_v18  ;;  %vm1022_vm1 = vcmp.ge.f32.partialorder %v986_v19, 0.0  ;;  %v1038_v25 = vmul.f32 0.2, %v986_v19  ;;  %1830 = vmatprep.subr.bf16.mxu1 %v2937_v12  ;;  %v2914_v9 = vcombine.low %v1287_v1, %v1291_v4  ;;  %v1315_v0 = vld [vmem:[%s4248_s9 + $0xf0] sm:$0xff] }
 0x2cb   : > { %v1056_v27 = vsel %vm1024_vm0, %v994_v14, %v1040_v21  ;;  %v2915_v10 = vcombine.high %v1287_v1, %v1291_v4  ;;  %v2916_v12 = vcombine.low %v1288_v8, %v1292_v11  ;;  %v2917_v13 = vcombine.high %v1288_v8, %v1292_v11  ;;  %v3590_v14 = vld [vmem:[%s4247_s8] ss:$0 sm:$0xff] }
 0x2cc   : > { %v1066_v30 = vpack.c.bf16 %v1056_v27, %v1055_v20  ;;  %v1054_v31 = vsel %vm1022_vm1, %v986_v19, %v1038_v25  ;;  %v3086_v32 = vpop.f32.mrb[28].mxu0 }
 0x2cd   : > { %v1065_v33 = vpack.c.bf16 %v1054_v31, %v1053_v23  ;;  %v1007_v34 = vadd.f32 %v3086_v32, %v3490_v24  ;;  %v998_v35 = vpop.f32.mrb[29].mxu0  ;;  %1831 = vmatpush1.bf16.msra.mxu1 %v2936_v22  ;;  %v1299_v31 = vld [vmem:[%s4248_s9 + $0x70] sm:$0xff]  ;;  %v1296_v32 = vld [vmem:[%s4248_s9 + $0x58] sm:$0xff] }
 0x2ce   : > { %v999_v38 = vadd.f32 %v3490_v24, %v998_v35  ;;  %v3087_v39 = vpop.f32.mrb[30].mxu0  ;;  %1832 = vmatprep.subr.bf16.mxu1 %v2945_v26 }
 0x2cf   : > { %vm1027_vm2 = vcmp.ge.f32.partialorder %v1007_v34, 0.0  ;;  %v1043_v41 = vmul.f32 0.2, %v1007_v34  ;;  %v1010_v42 = vadd.f32 %v3087_v39, %v3490_v24  ;;  %3104 = vmatprep.mubr.msk.bf16.mxu1 %vm675_vm7, %v1065_v33  ;;  %v1001_v43 = vpop.f32.mrb[31].mxu0  ;;  %v1300_v33 = vld [vmem:[%s4248_s9 + $0x78] sm:$0xff] }
 0x2d0   : > { %vm1025_vm3 = vcmp.ge.f32.partialorder %v999_v38, 0.0  ;;  %v1041_v44 = vmul.f32 0.2, %v999_v38  ;;  %v1002_v45 = vadd.f32 %v3490_v24, %v1001_v43  ;;  %3105 = vmatmul.mubr.msk.bf16.gmra.mrb[24].mxu1 %vm675_vm7, %v1066_v30  ;;  %v1333_v24 = vld [vmem:[%s4248_s9 + $0x180] sm:$0xff]  ;;  %v3621_v43 = vld [vmem:[%s4248_s9 + $0xb0] sm:$0xff] }
 0x2d1   : > { %v1059_v46 = vsel %vm1027_vm2, %v1007_v34, %v1043_v41  ;;  %vm1028_vm4 = vcmp.ge.f32.partialorder %v1010_v42, 0.0  ;;  %v1044_v37 = vmul.f32 0.2, %v1010_v42  ;;  %1833 = vmatpush1.bf16.msra.mxu1 %v2944_v36  ;;  %v2959_v56 = vcombine.high %v1333_v24, %v1337_v55 }
 0x2d2   : > { %v1057_v48 = vsel %vm1025_vm3, %v999_v38, %v1041_v44  ;;  %vm1026_vm5 = vcmp.ge.f32.partialorder %v1002_v45, 0.0  ;;  %v1042_v49 = vmul.f32 0.2, %v1002_v45  ;;  %1834 = vmatprep.subr.bf16.mxu1 %v2953_v40  ;;  %v2958_v59 = vcombine.low %v1333_v24, %v1337_v55 }
 0x2d3   : > { %v1060_v51 = vsel %vm1028_vm4, %v1010_v42, %v1044_v37  ;;  %1723 = vmatprep.subr.bf16.mxu0 %v2959_v56  ;;  %v3616_v42 = vld [vmem:[%s4248_s9 + $0x90] sm:$0xff]  ;;  %v2925_v37 = vcombine.high %v1296_v32, %v1300_v33 }
 0x2d4   : > { %v1068_v52 = vpack.c.bf16 %v1060_v51, %v1059_v46  ;;  %v1058_v53 = vsel %vm1026_vm5, %v1002_v45, %v1042_v49  ;;  %1724 = vmatpush1.bf16.msra.mxu0 %v2958_v59  ;;  %v2923_v46 = vcombine.high %v1295_v28, %v1299_v31  ;;  %v2931_v56 = vcombine.high %v3616_v42, %v3621_v43 }
 0x2d5   : > { %v1067_v54 = vpack.c.bf16 %v1058_v53, %v1057_v48  ;;  %1835 = vmatpush1.bf16.msra.mxu1 %v2952_v47  ;;  %1725 = vmatprep.subr.bf16.mxu0 %v2967_v2  ;;  %v3627_v47 = vld [vmem:[%s4248_s9 + $0x98] sm:$0xff]  ;;  %v2922_v53 = vcombine.low %v1295_v28, %v1299_v31  ;;  %v2930_v63 = vcombine.low %v3616_v42, %v3621_v43 }
 0x2d6   : > { %1836 = vmatprep.subr.bf16.mxu1 %v2961_v60  ;;  %v3632_v48 = vld [vmem:[%s4248_s9 + $0xb8] sm:$0xff] }
 0x2d7   : > { %3108 = vmatprep.mubr.msk.bf16.mxu1 %vm675_vm7, %v1067_v54  ;;  %v2924_v54 = vcombine.low %v1296_v32, %v1300_v33  ;;  %v2933_v58 = vcombine.high %v3627_v47, %v3632_v48  ;;  %v1312_v2 = vld [vmem:[%s4248_s9 + $0xd8] sm:$0xff]  ;;  %v1327_v32 = vld [vmem:[%s4248_s9 + $0x150] sm:$0xff] }
 0x2d8   : > { %3109 = vmatmul.mubr.msk.bf16.gmra.mrb[28].mxu1 %vm675_vm7, %v1068_v52  ;;  %1726 = vmatpush1.bf16.msra.mxu0 %v2966_v5  ;;  %v2940_v28 = vcombine.low %v1312_v2, %v1316_v3 }
 0x2d9   : > { %1837 = vmatpush1.bf16.msra.mxu1 %v2960_v50  ;;  %1856 = vmatprep.mubr.bf16.mxu1 %v3210_v62  ;;  %v3647_v50 = vld [vmem:[%s4248_s9 + $0xd0] sm:$0xff] }
 0x2da   : > { %1838 = vmatprep.subr.bf16.mxu1 %v2969_v7  ;;  %1937 = vmatprep.subr.bf16.mxu0 %v2915_v10  ;;  %v2932_v10 = vcombine.low %v3627_v47, %v3632_v48 }
 0x2dd   : > { %1839 = vmatpush1.bf16.msra.mxu1 %v2968_v6 }
 0x2de   : > { %2050 = vmatprep.subr.bf16.mxu1 %v2917_v13  ;;  %v2939_v13 = vcombine.high %v3647_v50, %v1315_v0 }
 0x393   : > { %v3098_v15 = vpop.f32.mrb[16].mxu1 }
 0x394   : > { %v1175_v16 = vadd.f32 %v3098_v15, %v3590_v14  ;;  %v1166_v17 = vpop.f32.mrb[17].mxu1  ;;  %v2941_v15 = vcombine.high %v1312_v2, %v1316_v3 }
 0x395   : > { %v1167_v18 = vadd.f32 %v3590_v14, %v1166_v17  ;;  %v3099_v19 = vpop.f32.mrb[18].mxu1 }
 0x396   : > { %v1247_v20 = vmul.f32 0.2, %v1175_v16  ;;  %v1178_v21 = vadd.f32 %v3099_v19, %v3590_v14  ;;  %v1169_v22 = vpop.f32.mrb[19].mxu1  ;;  %vm1231_vm7 = vcmp.ge.f32.partialorder %v1175_v16, 0.0 }
 0x397   : > { %v1245_v23 = vmul.f32 0.2, %v1167_v18  ;;  %v1170_v25 = vadd.f32 %v3590_v14, %v1169_v22  ;;  %vm1229_vm6 = vcmp.ge.f32.partialorder %v1167_v18, 0.0  ;;  %v3692_v22 = vld [vmem:[%s4248_s9 + $0x138] sm:$0xff] }
 0x398   : > { %vm1232_vm8 = vcmp.ge.f32.partialorder %v1178_v21, 0.0  ;;  %v1248_v26 = vmul.f32 0.2, %v1178_v21  ;;  %v1263_v29 = vsel %vm1231_vm7, %v1175_v16, %v1247_v20  ;;  %v3674_v16 = vld [vmem:[%s4248_s9 + $0x110] sm:$0xff] }
 0x399   : > { %vm1230_vm9 = vcmp.ge.f32.partialorder %v1170_v25, 0.0  ;;  %v1246_v27 = vmul.f32 0.2, %v1170_v25  ;;  %v1261_v34 = vsel %vm1229_vm6, %v1167_v18, %v1245_v23  ;;  %v3682_v20 = vld [vmem:[%s4248_s9 + $0x130] sm:$0xff] }
 0x39a   : > { %v1264_v30 = vsel %vm1232_vm8, %v1178_v21, %v1248_v26  ;;  %v3687_v21 = vld [vmem:[%s4248_s9 + $0x118] sm:$0xff]  ;;  %v2938_v26 = vcombine.low %v3647_v50, %v1315_v0 }
 0x39b   : > { %v3608_v35 = vpack.c.bf16 %v1264_v30, %v1263_v29  ;;  %v1262_v36 = vsel %vm1230_vm9, %v1170_v25, %v1246_v27  ;;  %v3102_v38 = vpop.f32.mrb[20].mxu1  ;;  %v2947_v30 = vcombine.high %v3674_v16, %v3682_v20  ;;  %v2949_v31 = vcombine.high %v3687_v21, %v3692_v22  ;;  %v1340_v50 = vld [vmem:[%s4248_s9 + $0x1b8] sm:$0xff] }
 0x39c   : > { %v3610_v39 = vpack.c.bf16 %v1262_v36, %v1261_v34  ;;  %v1191_v40 = vadd.f32 %v3102_v38, %v3590_v14  ;;  %v1182_v41 = vpop.f32.mrb[21].mxu1  ;;  %v1331_v36 = vld [vmem:[%s4248_s9 + $0x170] sm:$0xff]  ;;  %v1328_v38 = vld [vmem:[%s4248_s9 + $0x158] sm:$0xff]  ;;  %v2948_v48 = vcombine.low %v3687_v21, %v3692_v22  ;;  %v1349_v22 = vld [vmem:[%s4249_s10] sm:$0xff] }
 0x39d   : > { %v1183_v44 = vadd.f32 %v3590_v14, %v1182_v41  ;;  %v3103_v45 = vpop.f32.mrb[22].mxu1 }
 0x39e   : > { %v1251_v49 = vmul.f32 0.2, %v1191_v40  ;;  %v1194_v51 = vadd.f32 %v3103_v45, %v3590_v14  ;;  %v1185_v52 = vpop.f32.mrb[23].mxu1  ;;  %1744 = vmatmul.mubr.bf16.vlgmr.msra.gmra.mrb[32].mxu0 %v3610_v39  ;;  %1857 = vmatmul.mubr.bf16.vlgmr.msra.gmra.mrb[32].mxu1 %v3610_v39  ;;  %vm1235_vm10 = vcmp.ge.f32.partialorder %v1191_v40, 0.0  ;;  %v2946_v45 = vcombine.low %v3674_v16, %v3682_v20 }
 0x39f   : > { %v1249_v24 = vmul.f32 0.2, %v1183_v44  ;;  %v1186_v55 = vadd.f32 %v3590_v14, %v1185_v52  ;;  %1938 = vmatpush1.bf16.msra.mxu0 %v2914_v9  ;;  %2051 = vmatpush1.bf16.msra.mxu1 %v2916_v12  ;;  %vm1233_vm11 = vcmp.ge.f32.partialorder %v1183_v44, 0.0  ;;  %v2955_v52 = vcombine.high %v1327_v32, %v1331_v36 }
 0x3a0   : > { %vm1236_vm12 = vcmp.ge.f32.partialorder %v1194_v51, 0.0  ;;  %v1252_v57 = vmul.f32 0.2, %v1194_v51  ;;  %1753 = vmatprep.mubr.bf16.mxu0 %v3210_v62  ;;  %1866 = vmatprep.mubr.bf16.mxu1 %v3210_v62  ;;  %v1267_v60 = vsel %vm1235_vm10, %v1191_v40, %v1251_v49  ;;  %v1332_v40 = vld [vmem:[%s4248_s9 + $0x178] sm:$0xff] }
 0x3a1   : > { %vm1234_vm13 = vcmp.ge.f32.partialorder %v1186_v55, 0.0  ;;  %v1250_v59 = vmul.f32 0.2, %v1186_v55  ;;  %1939 = vmatprep.subr.bf16.mxu0 %v2923_v46  ;;  %2052 = vmatprep.subr.bf16.mxu1 %v2925_v37  ;;  %v1265_v5 = vsel %vm1233_vm11, %v1183_v44, %v1249_v24  ;;  %v1339_v24 = vld [vmem:[%s4248_s9 + $0x1b0] sm:$0xff] }
 0x3a2   : > { %v1268_v61 = vsel %vm1236_vm12, %v1194_v51, %v1252_v57 }
 0x3a3   : > { %v3662_v6 = vpack.c.bf16 %v1268_v61, %v1267_v60  ;;  %v1266_v7 = vsel %vm1234_vm13, %v1186_v55, %v1250_v59  ;;  %v3106_v1 = vpop.f32.mrb[24].mxu1  ;;  %1940 = vmatpush1.bf16.msra.mxu0 %v2922_v53  ;;  %2053 = vmatpush1.bf16.msra.mxu1 %v2924_v54  ;;  %v2957_v53 = vcombine.high %v1328_v38, %v1332_v40  ;;  %v1335_v54 = vld [vmem:[%s4248_s9 + $0x190] sm:$0xff]  ;;  %v1336_v59 = vld [vmem:[%s4248_s9 + $0x198] sm:$0xff] }
 0x3a4   : > { %v3664_v4 = vpack.c.bf16 %v1266_v7, %v1265_v5  ;;  %v1207_v8 = vadd.f32 %v3106_v1, %v3590_v14  ;;  %v1198_v9 = vpop.f32.mrb[25].mxu1  ;;  %1941 = vmatprep.subr.bf16.mxu0 %v2931_v56  ;;  %2054 = vmatprep.subr.bf16.mxu1 %v2933_v58  ;;  %v2954_v58 = vcombine.low %v1327_v32, %v1331_v36 }
 0x3a5   : > { %v1199_v11 = vadd.f32 %v3590_v14, %v1198_v9  ;;  %v3107_v12 = vpop.f32.mrb[26].mxu1  ;;  %v2963_v3 = vcombine.high %v1335_v54, %v1339_v24  ;;  %v2965_v1 = vcombine.high %v1336_v59, %v1340_v50  ;;  %v1347_v9 = vld [vmem:[%s4248_s9 + $0x1f0] sm:$0xff]  ;;  %v2962_v16 = vcombine.low %v1335_v54, %v1339_v24 }
 0x3a6   : > { %v1255_v17 = vmul.f32 0.2, %v1207_v8  ;;  %v1210_v18 = vadd.f32 %v3107_v12, %v3590_v14  ;;  %v1201_v19 = vpop.f32.mrb[27].mxu1  ;;  %1754 = vmatmul.mubr.bf16.gmra.mrb[36].mxu0 %v3608_v35  ;;  %1867 = vmatmul.mubr.bf16.gmra.mrb[36].mxu1 %v3608_v35  ;;  %vm1239_vm14 = vcmp.ge.f32.partialorder %v1207_v8, 0.0 }
 0x3a7   : > { %v1253_v23 = vmul.f32 0.2, %v1199_v11  ;;  %v1202_v25 = vadd.f32 %v3590_v14, %v1201_v19  ;;  %1763 = vmatprep.mubr.bf16.mxu0 %v3210_v62  ;;  %1876 = vmatprep.mubr.bf16.mxu1 %v3210_v62  ;;  %vm1237_vm15 = vcmp.ge.f32.partialorder %v1199_v11, 0.0 }
 0x3a8   : > { %vm1240_vm0 = vcmp.ge.f32.partialorder %v1210_v18, 0.0  ;;  %v1256_v27 = vmul.f32 0.2, %v1210_v18  ;;  %1942 = vmatpush1.bf16.msra.mxu0 %v2930_v63  ;;  %2055 = vmatpush1.bf16.msra.mxu1 %v2932_v10  ;;  %v1271_v33 = vsel %vm1239_vm14, %v1207_v8, %v1255_v17  ;;  %v2956_v63 = vcombine.low %v1328_v38, %v1332_v40  ;;  %v1344_v10 = vld [vmem:[%s4248_s9 + $0x1d8] sm:$0xff] }
 0x3a9   : > { %vm1238_vm1 = vcmp.ge.f32.partialorder %v1202_v25, 0.0  ;;  %v1254_v29 = vmul.f32 0.2, %v1202_v25  ;;  %1943 = vmatprep.subr.bf16.mxu0 %v2939_v13  ;;  %2056 = vmatprep.subr.bf16.mxu1 %v2941_v15  ;;  %v1269_v41 = vsel %vm1237_vm15, %v1199_v11, %v1253_v23  ;;  %v1348_v11 = vld [vmem:[%s4248_s9 + $0x1f8] sm:$0xff]  ;;  %v2964_v17 = vcombine.low %v1336_v59, %v1340_v50 }
 0x3aa   : > { %v1272_v34 = vsel %vm1240_vm0, %v1210_v18, %v1256_v27  ;;  %v2973_v19 = vcombine.high %v1344_v10, %v1348_v11  ;;  %v2972_v21 = vcombine.low %v1344_v10, %v1348_v11 }
 0x3ab   : > { %v3716_v42 = vpack.c.bf16 %v1272_v34, %v1271_v33  ;;  %v1270_v43 = vsel %vm1238_vm1, %v1202_v25, %v1254_v29  ;;  %v3110_v44 = vpop.f32.mrb[28].mxu1 }
 0x3ac   : > { %v3720_v46 = vpack.c.bf16 %v1270_v43, %v1269_v41  ;;  %v1223_v37 = vadd.f32 %v3110_v44, %v3590_v14  ;;  %v1214_v47 = vpop.f32.mrb[29].mxu1  ;;  %1944 = vmatpush1.bf16.msra.mxu0 %v2938_v26  ;;  %2057 = vmatpush1.bf16.msra.mxu1 %v2940_v28  ;;  %v3211_v26 = vmov 1966171168  }
 0x3ad   : > { %v1215_v49 = vadd.f32 %v3590_v14, %v1214_v47  ;;  %v3111_v51 = vpop.f32.mrb[30].mxu1  ;;  %1945 = vmatprep.subr.bf16.mxu0 %v2947_v30  ;;  %2058 = vmatprep.subr.bf16.mxu1 %v2949_v31  ;;  %v2729_v27 = vunpack.c.l.s4 %v3211_v26 }
 0x3ae   : > { %vm1243_vm2 = vcmp.ge.f32.partialorder %v1223_v37, 0.0  ;;  %v1259_v55 = vmul.f32 0.2, %v1223_v37  ;;  %v1226_v56 = vadd.f32 %v3111_v51, %v3590_v14  ;;  %1764 = vmatmul.mubr.bf16.gmra.mrb[40].mxu0 %v3664_v4  ;;  %1877 = vmatmul.mubr.bf16.gmra.mrb[40].mxu1 %v3664_v4  ;;  %v1217_v57 = vpop.f32.mrb[31].mxu1 }
 0x3af   : > { %vm1241_vm3 = vcmp.ge.f32.partialorder %v1215_v49, 0.0  ;;  %v1257_v60 = vmul.f32 0.2, %v1215_v49  ;;  %v1218_v61 = vadd.f32 %v3590_v14, %v1217_v57  ;;  %1773 = vmatprep.mubr.bf16.mxu0 %v3210_v62  ;;  %1886 = vmatprep.mubr.bf16.mxu1 %v3210_v62  ;;  %v1343_v14 = vld [vmem:[%s4248_s9 + $0x1d0] sm:$0xff]  ;;  %v2730_v38 = vunpack.c.0.s8 %v2729_v27 }
 0x3b0   : > { %v1275_v0 = vsel %vm1243_vm2, %v1223_v37, %v1259_v55  ;;  %vm1244_vm4 = vcmp.ge.f32.partialorder %v1226_v56, 0.0  ;;  %v1260_v2 = vmul.f32 0.2, %v1226_v56  ;;  %1946 = vmatpush1.bf16.msra.mxu0 %v2946_v45  ;;  %2059 = vmatpush1.bf16.msra.mxu1 %v2948_v48  ;;  %v2971_v18 = vcombine.high %v1343_v14, %v1347_v9 }
 0x3b1   : > { %v1273_v5 = vsel %vm1241_vm3, %v1215_v49, %v1257_v60  ;;  %vm1242_vm5 = vcmp.ge.f32.partialorder %v1218_v61, 0.0  ;;  %v1258_v7 = vmul.f32 0.2, %v1218_v61  ;;  %1947 = vmatprep.subr.bf16.mxu0 %v2955_v52  ;;  %2060 = vmatprep.subr.bf16.mxu1 %v2957_v53  ;;  %v2970_v20 = vcombine.low %v1343_v14, %v1347_v9 }
 0x3b2   : > { %v1276_v8 = vsel %vm1244_vm4, %v1226_v56, %v1260_v2 }
 0x3b3   : > { %v3756_v12 = vpack.c.bf16 %v1276_v8, %v1275_v0  ;;  %v1274_v13 = vsel %vm1242_vm5, %v1218_v61, %v1258_v7 }
 0x3b4   : > { %v1283_v15 = vpack.c.bf16 %v1274_v13, %v1273_v5  ;;  %1948 = vmatpush1.bf16.msra.mxu0 %v2954_v58  ;;  %2061 = vmatpush1.bf16.msra.mxu1 %v2956_v63 }
 0x3b5   : > { %1949 = vmatprep.subr.bf16.mxu0 %v2963_v3  ;;  %2062 = vmatprep.subr.bf16.mxu1 %v2965_v1 }
 0x3b6   : > { %1774 = vmatmul.mubr.bf16.gmra.mrb[44].mxu0 %v3662_v6  ;;  %1887 = vmatmul.mubr.bf16.gmra.mrb[44].mxu1 %v3662_v6 }
 0x3b7   : > { %1783 = vmatprep.mubr.bf16.mxu0 %v3210_v62  ;;  %1896 = vmatprep.mubr.bf16.mxu1 %v3210_v62 }
 0x3b8   : > { %1950 = vmatpush1.bf16.msra.mxu0 %v2962_v16  ;;  %2063 = vmatpush1.bf16.msra.mxu1 %v2964_v17 }
 0x3b9   : > { %1951 = vmatprep.subr.bf16.mxu0 %v2971_v18  ;;  %2064 = vmatprep.subr.bf16.mxu1 %v2973_v19 }
 0x3bc   : > { %1952 = vmatpush1.bf16.msra.mxu0 %v2970_v20  ;;  %2065 = vmatpush1.bf16.msra.mxu1 %v2972_v21 }
 0x3be   : > { %1784 = vmatmul.mubr.bf16.gmra.mrb[48].mxu0 %v3720_v46  ;;  %1897 = vmatmul.mubr.bf16.gmra.mrb[48].mxu1 %v3720_v46 }
 0x3bf   : > { %1793 = vmatprep.mubr.bf16.mxu0 %v3210_v62  ;;  %1906 = vmatprep.mubr.bf16.mxu1 %v3210_v62 }
 0x3c6   : > { %1794 = vmatmul.mubr.bf16.gmra.mrb[52].mxu0 %v3716_v42  ;;  %1907 = vmatmul.mubr.bf16.gmra.mrb[52].mxu1 %v3716_v42 }
 0x3c7   : > { %1803 = vmatprep.mubr.bf16.mxu0 %v3210_v62  ;;  %1916 = vmatprep.mubr.bf16.mxu1 %v3210_v62 }
 0x3ce   : > { %1804 = vmatmul.mubr.bf16.gmra.mrb[56].mxu0 %v1283_v15  ;;  %1917 = vmatmul.mubr.bf16.gmra.mrb[56].mxu1 %v1283_v15 }
 0x3cf   : > { %1813 = vmatprep.mubr.bf16.mxu0 %v3210_v62  ;;  %1926 = vmatprep.mubr.bf16.mxu1 %v3210_v62 }
 0x3d6   : > { %1814 = vmatmul.mubr.bf16.gmra.mrb[60].mxu0 %v3756_v12  ;;  %1927 = vmatmul.mubr.bf16.gmra.mrb[60].mxu1 %v3756_v12 }
 0x3d7   : > { %1969 = vmatprep.mubr.bf16.mxu0 %v3210_v62  ;;  %2082 = vmatprep.mubr.bf16.mxu1 %v3210_v62 }
 0x3de   : > { %1970 = vmatmul.mubr.bf16.vlgmr.msra.gmra.mrb[64].mxu0 %v3610_v39  ;;  %2083 = vmatmul.mubr.bf16.vlgmr.msra.gmra.mrb[64].mxu1 %v3610_v39 }
 0x3df   : > { %1979 = vmatprep.mubr.bf16.mxu0 %v3210_v62  ;;  %2092 = vmatprep.mubr.bf16.mxu1 %v3210_v62 }
 0x3e6   : > { %1980 = vmatmul.mubr.bf16.gmra.mrb[68].mxu0 %v3608_v35  ;;  %2093 = vmatmul.mubr.bf16.gmra.mrb[68].mxu1 %v3608_v35  ;;  %v1351_v35 = vlaneseq }
 0x3e7   : > { %1989 = vmatprep.mubr.bf16.mxu0 %v3210_v62  ;;  %2102 = vmatprep.mubr.bf16.mxu1 %v3210_v62 }
 0x3e8   : > { %v1352_v39 = vshrl.u32 %v1351_v35, 7 }
 0x3ea   : > { %v1357_v23 = vsub.s32 1, %v1352_v39  ;;  %v1365_v25 = vsub.s32 3, %v1352_v39  ;;  %v1377_v32 = vsub.s32 6, %v1352_v39  ;;  %v1373_v33 = vsub.s32 5, %v1352_v39 }
 0x3eb   : > { %v1381_v40 = vsub.s32 7, %v1352_v39  ;;  %v3825_v24 = vsub.s32 %v2730_v38, %v1352_v39 }
 0x3ec   : > { %v3811_v30 = vrot.slane %v1349_v22, %v1357_v23  ;;  %v3813_v31 = vrot.slane %v1349_v22, %v1365_v25  ;;  %v3821_v49 = vrot.slane %v1349_v22, %v1377_v32  ;;  %v3823_v51 = vrot.slane %v1349_v22, %v1373_v33 }
 0x3ed   : > { %v3827_v55 = vrot.slane %v1349_v22, %v1381_v40 }
 0x3ee   : > { %1990 = vmatmul.mubr.bf16.gmra.mrb[72].mxu0 %v3664_v4  ;;  %2103 = vmatmul.mubr.bf16.gmra.mrb[72].mxu1 %v3664_v4  ;;  %v1361_v4 = vsub.s32 2, %v1352_v39 }
 0x3ef   : > { %1999 = vmatprep.mubr.bf16.mxu0 %v3210_v62  ;;  %2112 = vmatprep.mubr.bf16.mxu1 %v3210_v62 }
 0x3f0   : > { %v3809_v29 = vrot.slane %v1349_v22, %v1361_v4 }
 0x3f6   : > { %2000 = vmatmul.mubr.bf16.gmra.mrb[76].mxu0 %v3662_v6  ;;  %2113 = vmatmul.mubr.bf16.gmra.mrb[76].mxu1 %v3662_v6  ;;  %v1353_v6 = vsub.s32 0, %v1352_v39 }
 0x3f7   : > { %2009 = vmatprep.mubr.bf16.mxu0 %v3210_v62  ;;  %2122 = vmatprep.mubr.bf16.mxu1 %v3210_v62 }
 0x3f8   : > { %v3807_v28 = vrot.slane %v1349_v22, %v1353_v6 }
 0x3fe   : > { %2010 = vmatmul.mubr.bf16.gmra.mrb[80].mxu0 %v3720_v46  ;;  %2123 = vmatmul.mubr.bf16.gmra.mrb[80].mxu1 %v3720_v46 }
 0x3ff   : > { %2019 = vmatprep.mubr.bf16.mxu0 %v3210_v62  ;;  %2132 = vmatprep.mubr.bf16.mxu1 %v3210_v62 }
 0x406   : > { %2020 = vmatmul.mubr.bf16.gmra.mrb[84].mxu0 %v3716_v42  ;;  %2133 = vmatmul.mubr.bf16.gmra.mrb[84].mxu1 %v3716_v42 }
 0x407   : > { %2029 = vmatprep.mubr.bf16.mxu0 %v3210_v62  ;;  %2142 = vmatprep.mubr.bf16.mxu1 %v3210_v62 }
 0x40e   : > { %2030 = vmatmul.mubr.bf16.gmra.mrb[88].mxu0 %v1283_v15  ;;  %2143 = vmatmul.mubr.bf16.gmra.mrb[88].mxu1 %v1283_v15 }
 0x40f   : > { %2039 = vmatprep.mubr.bf16.mxu0 %v3210_v62  ;;  %2152 = vmatprep.mubr.bf16.mxu1 %v3210_v62  ;;  %v1369_v62 = vsub.s32 4, %v1352_v39 }
 0x411   : > { %v3817_v45 = vrot.slane %v1349_v22, %v1369_v62 }
 0x416   : > { %2040 = vmatmul.mubr.bf16.gmra.mrb[92].mxu0 %v3756_v12  ;;  %2153 = vmatmul.mubr.bf16.gmra.mrb[92].mxu1 %v3756_v12 }
 0x471   : > { %v1745_v34 = vpop.f32.mrb[32].mxu0  ;;  %v1858_v36 = vpop.f32.mrb[32].mxu1 }
 0x472   : > { %v1746_v41 = vadd.f32 %v1745_v34, %v3807_v28  ;;  %v1859_v42 = vadd.f32 %v1858_v36, %v3809_v29  ;;  %v1747_v43 = vpop.f32.mrb[33].mxu0  ;;  %v1860_v44 = vpop.f32.mrb[33].mxu1 }
 0x473   : > { %v1748_v46 = vadd.f32 %v1747_v43, %v3811_v30  ;;  %v1861_v37 = vadd.f32 %v1860_v44, %v3813_v31  ;;  %v1749_v47 = vpop.f32.mrb[34].mxu0  ;;  %v1862_v48 = vpop.f32.mrb[34].mxu1 }
 0x474   : > { %vm2163_vm7 = vcmp.ge.f32.partialorder %v1746_v41, 0.0  ;;  %v2291_v52 = vmul.f32 0.2, %v1746_v41  ;;  %vm2165_vm6 = vcmp.ge.f32.partialorder %v1859_v42, 0.0  ;;  %v2293_v53 = vmul.f32 0.2, %v1859_v42 }
 0x475   : > { %vm2164_vm8 = vcmp.ge.f32.partialorder %v1748_v46, 0.0  ;;  %v2292_v54 = vmul.f32 0.2, %v1748_v46  ;;  %vm2166_vm9 = vcmp.ge.f32.partialorder %v1861_v37, 0.0  ;;  %v2294_v56 = vmul.f32 0.2, %v1861_v37 }
 0x476   : > { %v1750_v57 = vadd.f32 %v1749_v47, %v3807_v28  ;;  %v1863_v58 = vadd.f32 %v1862_v48, %v3809_v29  ;;  %v1751_v59 = vpop.f32.mrb[35].mxu0  ;;  %v1864_v50 = vpop.f32.mrb[35].mxu1  ;;  %v2419_v60 = vsel %vm2163_vm7, %v1746_v41, %v2291_v52  ;;  %v2421_v61 = vsel %vm2165_vm6, %v1859_v42, %v2293_v53 }
 0x477   : > { %v1752_v63 = vadd.f32 %v1751_v59, %v3811_v30  ;;  %v1865_v0 = vadd.f32 %v1864_v50, %v3813_v31  ;;  %v2420_v1 = vsel %vm2164_vm8, %v1748_v46, %v2292_v54  ;;  %v2422_v14 = vsel %vm2166_vm9, %v1861_v37, %v2294_v56 }
 0x478   : > { %vm2171_vm10 = vcmp.ge.f32.partialorder %v1750_v57, 0.0  ;;  %v2299_v2 = vmul.f32 0.2, %v1750_v57  ;;  %vm2173_vm11 = vcmp.ge.f32.partialorder %v1863_v58, 0.0  ;;  %v2301_v3 = vmul.f32 0.2, %v1863_v58 }
 0x479   : > { %vm2172_vm12 = vcmp.ge.f32.partialorder %v1752_v63, 0.0  ;;  %v2300_v5 = vmul.f32 0.2, %v1752_v63  ;;  %vm2174_vm13 = vcmp.ge.f32.partialorder %v1865_v0, 0.0  ;;  %v2302_v7 = vmul.f32 0.2, %v1865_v0 }
 0x47a   : > { %v2427_v8 = vsel %vm2171_vm10, %v1750_v57, %v2299_v2  ;;  %v2429_v9 = vsel %vm2173_vm11, %v1863_v58, %v2301_v3  ;;  %v1755_v10 = vpop.f32.mrb[36].mxu0  ;;  %v1868_v11 = vpop.f32.mrb[36].mxu1 }
 0x47b   : > { %v2548_v12 = vmax.f32 %v2419_v60, %v2427_v8  ;;  %v2590_v13 = vmax.f32 %v2421_v61, %v2429_v9  ;;  %v2428_v15 = vsel %vm2172_vm12, %v1752_v63, %v2300_v5  ;;  %v2430_v16 = vsel %vm2174_vm13, %v1865_v0, %v2302_v7  ;;  %v1757_v17 = vpop.f32.mrb[37].mxu0  ;;  %v1870_v18 = vpop.f32.mrb[37].mxu1 }
 0x47c   : > { %v2569_v19 = vmax.f32 %v2420_v1, %v2428_v15  ;;  %v2611_v20 = vmax.f32 %v2422_v14, %v2430_v16  ;;  %v1756_v21 = vadd.f32 %v1755_v10, %v3807_v28  ;;  %v1869_v35 = vadd.f32 %v1868_v11, %v3809_v29  ;;  %v1759_v39 = vpop.f32.mrb[38].mxu0  ;;  %v1872_v6 = vpop.f32.mrb[38].mxu1 }
 0x47d   : > { %v1758_v4 = vadd.f32 %v1757_v17, %v3811_v30  ;;  %v1871_v22 = vadd.f32 %v1870_v18, %v3813_v31  ;;  %v1760_v23 = vadd.f32 %v1759_v39, %v3807_v28  ;;  %v1873_v25 = vadd.f32 %v1872_v6, %v3809_v29  ;;  %v1761_v26 = vpop.f32.mrb[39].mxu0  ;;  %v1874_v27 = vpop.f32.mrb[39].mxu1 }
 0x47e   : > { %vm2179_vm14 = vcmp.ge.f32.partialorder %v1756_v21, 0.0  ;;  %v2307_v62 = vmul.f32 0.2, %v1756_v21  ;;  %vm2181_vm15 = vcmp.ge.f32.partialorder %v1869_v35, 0.0  ;;  %v2309_v32 = vmul.f32 0.2, %v1869_v35 }
 0x47f   : > { %vm2180_vm0 = vcmp.ge.f32.partialorder %v1758_v4, 0.0  ;;  %v2308_v33 = vmul.f32 0.2, %v1758_v4  ;;  %vm2182_vm1 = vcmp.ge.f32.partialorder %v1871_v22, 0.0  ;;  %v2310_v34 = vmul.f32 0.2, %v1871_v22 }
 0x480   : > { %v2435_v36 = vsel %vm2179_vm14, %v1756_v21, %v2307_v62  ;;  %v2437_v38 = vsel %vm2181_vm15, %v1869_v35, %v2309_v32  ;;  %vm2187_vm2 = vcmp.ge.f32.partialorder %v1760_v23, 0.0  ;;  %v2315_v40 = vmul.f32 0.2, %v1760_v23 }
 0x481   : > { %v2549_v41 = vmax.f32 %v2548_v12, %v2435_v36  ;;  %v2591_v42 = vmax.f32 %v2590_v13, %v2437_v38  ;;  %v2436_v43 = vsel %vm2180_vm0, %v1758_v4, %v2308_v33  ;;  %v2438_v44 = vsel %vm2182_vm1, %v1871_v22, %v2310_v34  ;;  %v1765_v46 = vpop.f32.mrb[40].mxu0  ;;  %v1878_v37 = vpop.f32.mrb[40].mxu1 }
 0x482   : > { %v2570_v47 = vmax.f32 %v2569_v19, %v2436_v43  ;;  %v2612_v48 = vmax.f32 %v2611_v20, %v2438_v44  ;;  %v2443_v52 = vsel %vm2187_vm2, %v1760_v23, %v2315_v40  ;;  %vm2189_vm3 = vcmp.ge.f32.partialorder %v1873_v25, 0.0  ;;  %v1767_v53 = vpop.f32.mrb[41].mxu0  ;;  %v1880_v54 = vpop.f32.mrb[41].mxu1 }
 0x483   : > { %v2550_v56 = vmax.f32 %v2549_v41, %v2443_v52  ;;  %v2317_v57 = vmul.f32 0.2, %v1873_v25  ;;  %v1762_v58 = vadd.f32 %v1761_v26, %v3811_v30  ;;  %v1875_v59 = vadd.f32 %v1874_v27, %v3813_v31  ;;  %v1769_v50 = vpop.f32.mrb[42].mxu0  ;;  %v1882_v60 = vpop.f32.mrb[42].mxu1 }
 0x484   : > { %v1766_v61 = vadd.f32 %v1765_v46, %v3807_v28  ;;  %v1879_v63 = vadd.f32 %v1878_v37, %v3809_v29  ;;  %v1768_v0 = vadd.f32 %v1767_v53, %v3811_v30  ;;  %v1881_v2 = vadd.f32 %v1880_v54, %v3813_v31  ;;  %v1771_v3 = vpop.f32.mrb[43].mxu0  ;;  %v1884_v5 = vpop.f32.mrb[43].mxu1 }
 0x485   : > { %v2445_v7 = vsel %vm2189_vm3, %v1873_v25, %v2317_v57  ;;  %vm2188_vm4 = vcmp.ge.f32.partialorder %v1762_v58, 0.0  ;;  %v2316_v1 = vmul.f32 0.2, %v1762_v58  ;;  %vm2190_vm5 = vcmp.ge.f32.partialorder %v1875_v59, 0.0 }
 0x486   : > { %v2592_v14 = vmax.f32 %v2591_v42, %v2445_v7  ;;  %v2318_v8 = vmul.f32 0.2, %v1875_v59  ;;  %vm2195_vm7 = vcmp.ge.f32.partialorder %v1766_v61, 0.0  ;;  %v2323_v9 = vmul.f32 0.2, %v1766_v61 }
 0x487   : > { %v2444_v10 = vsel %vm2188_vm4, %v1762_v58, %v2316_v1  ;;  %vm2197_vm6 = vcmp.ge.f32.partialorder %v1879_v63, 0.0  ;;  %v2325_v11 = vmul.f32 0.2, %v1879_v63  ;;  %vm2196_vm8 = vcmp.ge.f32.partialorder %v1768_v0, 0.0 }
 0x488   : > { %v2571_v12 = vmax.f32 %v2570_v47, %v2444_v10  ;;  %v2446_v13 = vsel %vm2190_vm5, %v1875_v59, %v2318_v8  ;;  %v2451_v15 = vsel %vm2195_vm7, %v1766_v61, %v2323_v9  ;;  %v2324_v16 = vmul.f32 0.2, %v1768_v0 }
 0x489   : > { %v2613_v17 = vmax.f32 %v2612_v48, %v2446_v13  ;;  %v2551_v18 = vmax.f32 %v2550_v56, %v2451_v15  ;;  %v2453_v19 = vsel %vm2197_vm6, %v1879_v63, %v2325_v11  ;;  %vm2198_vm9 = vcmp.ge.f32.partialorder %v1881_v2, 0.0  ;;  %v1775_v20 = vpop.f32.mrb[44].mxu0  ;;  %v1888_v21 = vpop.f32.mrb[44].mxu1 }
 0x48a   : > { %v2593_v35 = vmax.f32 %v2592_v14, %v2453_v19  ;;  %v2452_v39 = vsel %vm2196_vm8, %v1768_v0, %v2324_v16  ;;  %v2326_v6 = vmul.f32 0.2, %v1881_v2  ;;  %v1770_v4 = vadd.f32 %v1769_v50, %v3807_v28  ;;  %v1777_v22 = vpop.f32.mrb[45].mxu0  ;;  %v1890_v23 = vpop.f32.mrb[45].mxu1 }
 0x48b   : > { %v2572_v25 = vmax.f32 %v2571_v12, %v2452_v39  ;;  %v1883_v26 = vadd.f32 %v1882_v60, %v3809_v29  ;;  %v1772_v27 = vadd.f32 %v1771_v3, %v3811_v30  ;;  %v1885_v62 = vadd.f32 %v1884_v5, %v3813_v31  ;;  %v1779_v32 = vpop.f32.mrb[46].mxu0  ;;  %v1892_v33 = vpop.f32.mrb[46].mxu1 }
 0x48c   : > { %v2454_v34 = vsel %vm2198_vm9, %v1881_v2, %v2326_v6  ;;  %vm2203_vm10 = vcmp.ge.f32.partialorder %v1770_v4, 0.0  ;;  %v2331_v36 = vmul.f32 0.2, %v1770_v4  ;;  %v1776_v38 = vadd.f32 %v1775_v20, %v3807_v28  ;;  %v1781_v40 = vpop.f32.mrb[47].mxu0  ;;  %v1894_v41 = vpop.f32.mrb[47].mxu1 }
 0x48d   : > { %v2614_v42 = vmax.f32 %v2613_v17, %v2454_v34  ;;  %vm2205_vm11 = vcmp.ge.f32.partialorder %v1883_v26, 0.0  ;;  %v2333_v43 = vmul.f32 0.2, %v1883_v26  ;;  %vm2204_vm12 = vcmp.ge.f32.partialorder %v1772_v27, 0.0 }
 0x48e   : > { %v2459_v44 = vsel %vm2203_vm10, %v1770_v4, %v2331_v36  ;;  %v2332_v46 = vmul.f32 0.2, %v1772_v27  ;;  %vm2206_vm13 = vcmp.ge.f32.partialorder %v1885_v62, 0.0  ;;  %v2334_v37 = vmul.f32 0.2, %v1885_v62 }
 0x48f   : > { %v2552_v47 = vmax.f32 %v2551_v18, %v2459_v44  ;;  %v2461_v48 = vsel %vm2205_vm11, %v1883_v26, %v2333_v43  ;;  %vm2211_vm14 = vcmp.ge.f32.partialorder %v1776_v38, 0.0  ;;  %v2339_v52 = vmul.f32 0.2, %v1776_v38 }
 0x490   : > { %v2594_v53 = vmax.f32 %v2593_v35, %v2461_v48  ;;  %v2460_v54 = vsel %vm2204_vm12, %v1772_v27, %v2332_v46  ;;  %v2462_v56 = vsel %vm2206_vm13, %v1885_v62, %v2334_v37  ;;  %v1889_v57 = vadd.f32 %v1888_v21, %v3809_v29 }
 0x491   : > { %v2573_v58 = vmax.f32 %v2572_v25, %v2460_v54  ;;  %v2615_v59 = vmax.f32 %v2614_v42, %v2462_v56  ;;  %v2467_v50 = vsel %vm2211_vm14, %v1776_v38, %v2339_v52  ;;  %v1778_v60 = vadd.f32 %v1777_v22, %v3811_v30  ;;  %v1785_v61 = vpop.f32.mrb[48].mxu0  ;;  %v1898_v63 = vpop.f32.mrb[48].mxu1 }
 0x492   : > { %v3854_v0 = vmax.f32 %v2552_v47, %v2467_v50  ;;  %vm2213_vm15 = vcmp.ge.f32.partialorder %v1889_v57, 0.0  ;;  %v2341_v2 = vmul.f32 0.2, %v1889_v57  ;;  %v1891_v3 = vadd.f32 %v1890_v23, %v3813_v31  ;;  %v1787_v5 = vpop.f32.mrb[49].mxu0  ;;  %v1900_v7 = vpop.f32.mrb[49].mxu1 }
 0x493   : > { %vm2212_vm0 = vcmp.ge.f32.partialorder %v1778_v60, 0.0  ;;  %v2340_v1 = vmul.f32 0.2, %v1778_v60  ;;  %v1780_v14 = vadd.f32 %v1779_v32, %v3807_v28  ;;  %v1893_v8 = vadd.f32 %v1892_v33, %v3809_v29  ;;  %v1789_v9 = vpop.f32.mrb[50].mxu0  ;;  %v1902_v10 = vpop.f32.mrb[50].mxu1 }
 0x494   : > { %v2469_v11 = vsel %vm2213_vm15, %v1889_v57, %v2341_v2  ;;  %vm2214_vm1 = vcmp.ge.f32.partialorder %v1891_v3, 0.0  ;;  %v2342_v12 = vmul.f32 0.2, %v1891_v3  ;;  %v1782_v13 = vadd.f32 %v1781_v40, %v3811_v30  ;;  %v1791_v15 = vpop.f32.mrb[51].mxu0  ;;  %v1904_v16 = vpop.f32.mrb[51].mxu1 }
 0x495   : > { %v2595_v17 = vmax.f32 %v2594_v53, %v2469_v11  ;;  %v2468_v18 = vsel %vm2212_vm0, %v1778_v60, %v2340_v1  ;;  %vm2219_vm2 = vcmp.ge.f32.partialorder %v1780_v14, 0.0  ;;  %v2347_v19 = vmul.f32 0.2, %v1780_v14 }
 0x496   : > { %v2574_v20 = vmax.f32 %v2573_v58, %v2468_v18  ;;  %v2470_v21 = vsel %vm2214_vm1, %v1891_v3, %v2342_v12  ;;  %vm2221_vm3 = vcmp.ge.f32.partialorder %v1893_v8, 0.0  ;;  %v2349_v35 = vmul.f32 0.2, %v1893_v8 }
 0x497   : > { %v2616_v39 = vmax.f32 %v2615_v59, %v2470_v21  ;;  %v2475_v6 = vsel %vm2219_vm2, %v1780_v14, %v2347_v19  ;;  %vm2220_vm4 = vcmp.ge.f32.partialorder %v1782_v13, 0.0  ;;  %v2348_v4 = vmul.f32 0.2, %v1782_v13 }
 0x498   : > { %v2554_v22 = vmax.f32 %v3854_v0, %v2475_v6  ;;  %v2477_v23 = vsel %vm2221_vm3, %v1893_v8, %v2349_v35  ;;  %v1895_v25 = vadd.f32 %v1894_v41, %v3813_v31  ;;  %v1786_v26 = vadd.f32 %v1785_v61, %v3807_v28 }
 0x499   : > { %v2596_v27 = vmax.f32 %v2595_v17, %v2477_v23  ;;  %v2476_v62 = vsel %vm2220_vm4, %v1782_v13, %v2348_v4  ;;  %v1899_v32 = vadd.f32 %v1898_v63, %v3809_v29  ;;  %v1788_v33 = vadd.f32 %v1787_v5, %v3811_v30  ;;  %v1795_v34 = vpop.f32.mrb[52].mxu0  ;;  %v1908_v36 = vpop.f32.mrb[52].mxu1 }
 0x49a   : > { %v2575_v38 = vmax.f32 %v2574_v20, %v2476_v62  ;;  %vm2222_vm5 = vcmp.ge.f32.partialorder %v1895_v25, 0.0  ;;  %v2350_v40 = vmul.f32 0.2, %v1895_v25  ;;  %vm2227_vm7 = vcmp.ge.f32.partialorder %v1786_v26, 0.0  ;;  %v1797_v42 = vpop.f32.mrb[53].mxu0  ;;  %v1910_v43 = vpop.f32.mrb[53].mxu1 }
 0x49b   : > { %v2355_v44 = vmul.f32 0.2, %v1786_v26  ;;  %vm2229_vm6 = vcmp.ge.f32.partialorder %v1899_v32, 0.0  ;;  %v2357_v46 = vmul.f32 0.2, %v1899_v32  ;;  %vm2228_vm8 = vcmp.ge.f32.partialorder %v1788_v33, 0.0 }
 0x49c   : > { %v2478_v41 = vsel %vm2222_vm5, %v1895_v25, %v2350_v40  ;;  %v2356_v37 = vmul.f32 0.2, %v1788_v33  ;;  %v1901_v47 = vadd.f32 %v1900_v7, %v3813_v31  ;;  %v1790_v48 = vadd.f32 %v1789_v9, %v3807_v28  ;;  %v1799_v52 = vpop.f32.mrb[54].mxu0  ;;  %v1912_v53 = vpop.f32.mrb[54].mxu1 }
 0x49d   : > { %v2617_v54 = vmax.f32 %v2616_v39, %v2478_v41  ;;  %v2483_v56 = vsel %vm2227_vm7, %v1786_v26, %v2355_v44  ;;  %v2485_v57 = vsel %vm2229_vm6, %v1899_v32, %v2357_v46  ;;  %v1903_v58 = vadd.f32 %v1902_v10, %v3809_v29  ;;  %v1801_v59 = vpop.f32.mrb[55].mxu0  ;;  %v1914_v50 = vpop.f32.mrb[55].mxu1 }
 0x49e   : > { %v2555_v60 = vmax.f32 %v2554_v22, %v2483_v56  ;;  %v2597_v61 = vmax.f32 %v2596_v27, %v2485_v57  ;;  %v2484_v63 = vsel %vm2228_vm8, %v1788_v33, %v2356_v37  ;;  %vm2230_vm9 = vcmp.ge.f32.partialorder %v1901_v47, 0.0 }
 0x49f   : > { %v2576_v0 = vmax.f32 %v2575_v38, %v2484_v63  ;;  %v2358_v2 = vmul.f32 0.2, %v1901_v47  ;;  %vm2235_vm10 = vcmp.ge.f32.partialorder %v1790_v48, 0.0  ;;  %v2363_v3 = vmul.f32 0.2, %v1790_v48 }
 0x4a0   : > { %vm2237_vm11 = vcmp.ge.f32.partialorder %v1903_v58, 0.0  ;;  %v2365_v5 = vmul.f32 0.2, %v1903_v58  ;;  %v1792_v7 = vadd.f32 %v1791_v15, %v3811_v30  ;;  %v1905_v1 = vadd.f32 %v1904_v16, %v3813_v31 }
 0x4a1   : > { %v2486_v14 = vsel %vm2230_vm9, %v1901_v47, %v2358_v2  ;;  %v2491_v8 = vsel %vm2235_vm10, %v1790_v48, %v2363_v3  ;;  %v1796_v9 = vadd.f32 %v1795_v34, %v3807_v28  ;;  %v1909_v10 = vadd.f32 %v1908_v36, %v3809_v29  ;;  %v1805_v11 = vpop.f32.mrb[56].mxu0  ;;  %v3872_v12 = vpop.f32.mrb[56].mxu1 }
 0x4a2   : > { %v2618_v13 = vmax.f32 %v2617_v54, %v2486_v14  ;;  %v2556_v17 = vmax.f32 %v2555_v60, %v2491_v8  ;;  %v2493_v18 = vsel %vm2237_vm11, %v1903_v58, %v2365_v5  ;;  %vm2236_vm12 = vcmp.ge.f32.partialorder %v1792_v7, 0.0  ;;  %v3874_v19 = vpop.f32.mrb[57].mxu0  ;;  %v3876_v20 = vpop.f32.mrb[57].mxu1 }
 0x4a3   : > { %v2598_v15 = vmax.f32 %v2597_v61, %v2493_v18  ;;  %v2364_v21 = vmul.f32 0.2, %v1792_v7  ;;  %vm2238_vm13 = vcmp.ge.f32.partialorder %v1905_v1, 0.0  ;;  %v2366_v16 = vmul.f32 0.2, %v1905_v1  ;;  %v3878_v35 = vpop.f32.mrb[58].mxu0 }
 0x4a4   : > { %vm2243_vm14 = vcmp.ge.f32.partialorder %v1796_v9, 0.0  ;;  %v2371_v39 = vmul.f32 0.2, %v1796_v9  ;;  %vm2245_vm15 = vcmp.ge.f32.partialorder %v1909_v10, 0.0  ;;  %v2373_v6 = vmul.f32 0.2, %v1909_v10 }
 0x4a5   : > { %v2492_v4 = vsel %vm2236_vm12, %v1792_v7, %v2364_v21  ;;  %v2494_v22 = vsel %vm2238_vm13, %v1905_v1, %v2366_v16  ;;  %v1798_v23 = vadd.f32 %v1797_v42, %v3811_v30  ;;  %v1911_v25 = vadd.f32 %v1910_v43, %v3813_v31  ;;  %v1922_v26 = vpop.f32.mrb[58].mxu1  ;;  %v3882_v27 = vpop.f32.mrb[59].mxu0 }
 0x4a6   : > { %v2577_v62 = vmax.f32 %v2576_v0, %v2492_v4  ;;  %v2619_v32 = vmax.f32 %v2618_v13, %v2494_v22  ;;  %v2499_v33 = vsel %vm2243_vm14, %v1796_v9, %v2371_v39  ;;  %v2501_v34 = vsel %vm2245_vm15, %v1909_v10, %v2373_v6  ;;  %v3884_v36 = vpop.f32.mrb[59].mxu1 }
 0x4a7   : > { %v2557_v38 = vmax.f32 %v2556_v17, %v2499_v33  ;;  %v2599_v40 = vmax.f32 %v2598_v15, %v2501_v34  ;;  %vm2244_vm0 = vcmp.ge.f32.partialorder %v1798_v23, 0.0  ;;  %v2372_v44 = vmul.f32 0.2, %v1798_v23 }
 0x4a8   : > { %vm2246_vm1 = vcmp.ge.f32.partialorder %v1911_v25, 0.0  ;;  %v2374_v46 = vmul.f32 0.2, %v1911_v25  ;;  %v1800_v41 = vadd.f32 %v1799_v52, %v3807_v28  ;;  %v1913_v42 = vadd.f32 %v1912_v53, %v3809_v29 }
 0x4a9   : > { %v2500_v43 = vsel %vm2244_vm0, %v1798_v23, %v2372_v44  ;;  %v1802_v37 = vadd.f32 %v1801_v59, %v3811_v30  ;;  %v1915_v47 = vadd.f32 %v1914_v50, %v3813_v31  ;;  %v1806_v48 = vadd.f32 %v1805_v11, %v3807_v28  ;;  %v3891_v54 = vpop.f32.mrb[60].mxu0  ;;  %v3893_v56 = vpop.f32.mrb[60].mxu1 }
 0x4aa   : > { %v2578_v57 = vmax.f32 %v2577_v62, %v2500_v43  ;;  %v2502_v58 = vsel %vm2246_vm1, %v1911_v25, %v2374_v46  ;;  %vm2251_vm2 = vcmp.ge.f32.partialorder %v1800_v41, 0.0  ;;  %v2379_v60 = vmul.f32 0.2, %v1800_v41  ;;  %v3895_v61 = vpop.f32.mrb[61].mxu0  ;;  %v3897_v52 = vpop.f32.mrb[61].mxu1 }
 0x4ab   : > { %v2620_v53 = vmax.f32 %v2619_v32, %v2502_v58  ;;  %vm2253_vm3 = vcmp.ge.f32.partialorder %v1913_v42, 0.0  ;;  %v2381_v63 = vmul.f32 0.2, %v1913_v42  ;;  %vm2252_vm4 = vcmp.ge.f32.partialorder %v1802_v37, 0.0  ;;  %v3899_v59 = vpop.f32.mrb[62].mxu0  ;;  %v3901_v50 = vpop.f32.mrb[62].mxu1 }
 0x4ac   : > { %v2507_v0 = vsel %vm2251_vm2, %v1800_v41, %v2379_v60  ;;  %v2380_v2 = vmul.f32 0.2, %v1802_v37  ;;  %vm2254_vm5 = vcmp.ge.f32.partialorder %v1915_v47, 0.0  ;;  %v2382_v3 = vmul.f32 0.2, %v1915_v47  ;;  %v3903_v5 = vpop.f32.mrb[63].mxu0 }
 0x4ad   : > { %v2558_v7 = vmax.f32 %v2557_v38, %v2507_v0  ;;  %v2509_v1 = vsel %vm2253_vm3, %v1913_v42, %v2381_v63  ;;  %vm2259_vm7 = vcmp.ge.f32.partialorder %v1806_v48, 0.0  ;;  %v2387_v14 = vmul.f32 0.2, %v1806_v48  ;;  %v3905_v8 = vpop.f32.mrb[63].mxu1 }
 0x4ae   : > { %v2600_v9 = vmax.f32 %v2599_v40, %v2509_v1  ;;  %v2508_v10 = vsel %vm2252_vm4, %v1802_v37, %v2380_v2  ;;  %v2510_v11 = vsel %vm2254_vm5, %v1915_v47, %v2382_v3  ;;  %v1919_v13 = vadd.f32 %v3872_v12, %v3809_v29 }
 0x4af   : > { %v2579_v17 = vmax.f32 %v2578_v57, %v2508_v10  ;;  %v2621_v18 = vmax.f32 %v2620_v53, %v2510_v11  ;;  %v2515_v15 = vsel %vm2259_vm7, %v1806_v48, %v2387_v14  ;;  %v1808_v21 = vadd.f32 %v3874_v19, %v3811_v30 }
 0x4b0   : > { %v2559_v16 = vmax.f32 %v2558_v7, %v2515_v15  ;;  %vm2261_vm6 = vcmp.ge.f32.partialorder %v1919_v13, 0.0  ;;  %v2389_v39 = vmul.f32 0.2, %v1919_v13  ;;  %v1921_v6 = vadd.f32 %v3876_v20, %v3813_v31 }
 0x4b1   : > { %vm2260_vm8 = vcmp.ge.f32.partialorder %v1808_v21, 0.0  ;;  %v2388_v4 = vmul.f32 0.2, %v1808_v21  ;;  %v1810_v22 = vadd.f32 %v3878_v35, %v3807_v28  ;;  %v1923_v23 = vadd.f32 %v1922_v26, %v3809_v29  ;;  %v3916_v12 = vpop.f32.mrb[64].mxu0  ;;  %v3918_v25 = vpop.f32.mrb[64].mxu1 }
 0x4b2   : > { %v2517_v62 = vsel %vm2261_vm6, %v1919_v13, %v2389_v39  ;;  %vm2262_vm9 = vcmp.ge.f32.partialorder %v1921_v6, 0.0  ;;  %v2390_v19 = vmul.f32 0.2, %v1921_v6  ;;  %v1812_v32 = vadd.f32 %v3882_v27, %v3811_v30  ;;  %v3922_v33 = vpop.f32.mrb[65].mxu0  ;;  %v3924_v20 = vpop.f32.mrb[65].mxu1 }
 0x4b3   : > { %v2601_v34 = vmax.f32 %v2600_v9, %v2517_v62  ;;  %v2516_v38 = vsel %vm2260_vm8, %v1808_v21, %v2388_v4  ;;  %vm2267_vm10 = vcmp.ge.f32.partialorder %v1810_v22, 0.0  ;;  %v2395_v35 = vmul.f32 0.2, %v1810_v22  ;;  %v3926_v40 = vpop.f32.mrb[66].mxu0  ;;  %v3928_v26 = vpop.f32.mrb[66].mxu1 }
 0x4b4   : > { %v2580_v44 = vmax.f32 %v2579_v17, %v2516_v38  ;;  %v2518_v46 = vsel %vm2262_vm9, %v1921_v6, %v2390_v19  ;;  %vm2269_vm11 = vcmp.ge.f32.partialorder %v1923_v23, 0.0  ;;  %v2397_v41 = vmul.f32 0.2, %v1923_v23  ;;  %v3930_v42 = vpop.f32.mrb[67].mxu0  ;;  %v3932_v43 = vpop.f32.mrb[67].mxu1 }
 0x4b5   : > { %v2622_v27 = vmax.f32 %v2621_v18, %v2518_v46  ;;  %v2523_v37 = vsel %vm2267_vm10, %v1810_v22, %v2395_v35  ;;  %vm2268_vm12 = vcmp.ge.f32.partialorder %v1812_v32, 0.0  ;;  %v2396_v47 = vmul.f32 0.2, %v1812_v32 }
 0x4b6   : > { %v2560_v48 = vmax.f32 %v2559_v16, %v2523_v37  ;;  %v2525_v57 = vsel %vm2269_vm11, %v1923_v23, %v2397_v41  ;;  %v1925_v58 = vadd.f32 %v3884_v36, %v3813_v31  ;;  %v1816_v60 = vadd.f32 %v3891_v54, %v3807_v28 }
 0x4b7   : > { %v2602_v53 = vmax.f32 %v2601_v34, %v2525_v57  ;;  %v2524_v63 = vsel %vm2268_vm12, %v1812_v32, %v2396_v47  ;;  %v1929_v0 = vadd.f32 %v3893_v56, %v3809_v29  ;;  %v1818_v2 = vadd.f32 %v3895_v61, %v3811_v30 }
 0x4b8   : > { %v2581_v3 = vmax.f32 %v2580_v44, %v2524_v63  ;;  %vm2270_vm13 = vcmp.ge.f32.partialorder %v1925_v58, 0.0  ;;  %v2398_v7 = vmul.f32 0.2, %v1925_v58  ;;  %vm2275_vm14 = vcmp.ge.f32.partialorder %v1816_v60, 0.0 }
 0x4b9   : > { %v2403_v1 = vmul.f32 0.2, %v1816_v60  ;;  %vm2277_vm15 = vcmp.ge.f32.partialorder %v1929_v0, 0.0  ;;  %v2405_v14 = vmul.f32 0.2, %v1929_v0  ;;  %vm2276_vm0 = vcmp.ge.f32.partialorder %v1818_v2, 0.0 }
 0x4ba   : > { %v2526_v36 = vsel %vm2270_vm13, %v1925_v58, %v2398_v7  ;;  %v2404_v9 = vmul.f32 0.2, %v1818_v2  ;;  %v1931_v54 = vadd.f32 %v3897_v52, %v3813_v31  ;;  %v1820_v10 = vadd.f32 %v3899_v59, %v3807_v28  ;;  %v3946_v56 = vpop.f32.mrb[68].mxu0  ;;  %v3948_v11 = vpop.f32.mrb[68].mxu1 }
 0x4bb   : > { %v2623_v61 = vmax.f32 %v2622_v27, %v2526_v36  ;;  %v2531_v13 = vsel %vm2275_vm14, %v1816_v60, %v2403_v1  ;;  %v2533_v17 = vsel %vm2277_vm15, %v1929_v0, %v2405_v14  ;;  %v1933_v18 = vadd.f32 %v3901_v50, %v3809_v29  ;;  %v3952_v15 = vpop.f32.mrb[69].mxu0  ;;  %v3954_v21 = vpop.f32.mrb[69].mxu1 }
 0x4bc   : > { %v2561_v16 = vmax.f32 %v2560_v48, %v2531_v13  ;;  %v2603_v39 = vmax.f32 %v2602_v53, %v2533_v17  ;;  %v2532_v52 = vsel %vm2276_vm0, %v1818_v2, %v2404_v9  ;;  %vm2278_vm1 = vcmp.ge.f32.partialorder %v1931_v54, 0.0  ;;  %v3956_v6 = vpop.f32.mrb[70].mxu0  ;;  %v3958_v28 = vpop.f32.mrb[70].mxu1 }
 0x4bd   : > { %v2582_v59 = vmax.f32 %v2581_v3, %v2532_v52  ;;  %v2406_v4 = vmul.f32 0.2, %v1931_v54  ;;  %vm2283_vm2 = vcmp.ge.f32.partialorder %v1820_v10, 0.0  ;;  %v2411_v22 = vmul.f32 0.2, %v1820_v10  ;;  %v3960_v23 = vpop.f32.mrb[71].mxu0 }
 0x4be   : > { %vm2285_vm3 = vcmp.ge.f32.partialorder %v1933_v18, 0.0  ;;  %v2413_v29 = vmul.f32 0.2, %v1933_v18  ;;  %v1822_v50 = vadd.f32 %v3903_v5, %v3811_v30  ;;  %v1935_v62 = vadd.f32 %v3905_v8, %v3813_v31  ;;  %v3966_v19 = vpop.f32.mrb[71].mxu1 }
 0x4bf   : > { %v2534_v32 = vsel %vm2278_vm1, %v1931_v54, %v2406_v4  ;;  %v2539_v34 = vsel %vm2283_vm2, %v1820_v10, %v2411_v22  ;;  %v1972_v38 = vadd.f32 %v3916_v12, %v3817_v45  ;;  %v2085_v35 = vadd.f32 %v3918_v25, %v3821_v49 }
 0x4c0   : > { %v2624_v44 = vmax.f32 %v2623_v61, %v2534_v32  ;;  %v2562_v46 = vmax.f32 %v2561_v16, %v2539_v34  ;;  %v2541_v41 = vsel %vm2285_vm3, %v1933_v18, %v2413_v29  ;;  %vm2284_vm4 = vcmp.ge.f32.partialorder %v1822_v50, 0.0 }
 0x4c1   : > { %v2604_v27 = vmax.f32 %v2603_v39, %v2541_v41  ;;  %v2412_v37 = vmul.f32 0.2, %v1822_v50  ;;  %vm2286_vm5 = vcmp.ge.f32.partialorder %v1935_v62, 0.0  ;;  %v2414_v30 = vmul.f32 0.2, %v1935_v62  ;;  %v3972_v5 = vpop.f32.mrb[72].mxu0 }
 0x4c2   : > { %v2563_v31 = vrot.slane %v2562_v46, 4  ;;  %vm2167_vm7 = vcmp.ge.f32.partialorder %v1972_v38, 0.0  ;;  %v2295_v8 = vmul.f32 0.2, %v1972_v38  ;;  %vm2169_vm6 = vcmp.ge.f32.partialorder %v2085_v35, 0.0  ;;  %v3974_v47 = vpop.f32.mrb[72].mxu1 }
 0x4c3   : > { %v2605_v12 = vrot.slane %v2604_v27, 4  ;;  %v2540_v48 = vsel %vm2284_vm4, %v1822_v50, %v2412_v37  ;;  %v2542_v57 = vsel %vm2286_vm5, %v1935_v62, %v2414_v30  ;;  %v2297_v25 = vmul.f32 0.2, %v2085_v35  ;;  %v3976_v58 = vpop.f32.mrb[73].mxu0  ;;  %v3978_v60 = vpop.f32.mrb[73].mxu1 }
 0x4c4   : > { %v2564_v53 = vmax.f32 %v2562_v46, %v2563_v31  ;;  %v2583_v63 = vmax.f32 %v2582_v59, %v2540_v48  ;;  %v2625_v0 = vmax.f32 %v2624_v44, %v2542_v57  ;;  %v3980_v2 = vsel %vm2167_vm7, %v1972_v38, %v2295_v8  ;;  %v3982_v3 = vpop.f32.mrb[74].mxu0  ;;  %v3984_v7 = vpop.f32.mrb[74].mxu1 }
 0x4c5   : > { %v2606_v1 = vmax.f32 %v2604_v27, %v2605_v12  ;;  %v3986_v14 = vsel %vm2169_vm6, %v2085_v35, %v2297_v25  ;;  %v1974_v36 = vadd.f32 %v3922_v33, %v3823_v51  ;;  %v2087_v9 = vadd.f32 %v3924_v20, %v3827_v55  ;;  %v3992_v54 = vpop.f32.mrb[75].mxu0  ;;  %v3994_v10 = vpop.f32.mrb[75].mxu1 }
 0x4c6   : > { %v2565_v61 = vrot.slane %v2564_v53, 2  ;;  %v2584_v13 = vrot.slane %v2583_v63, 4  ;;  %v2626_v17 = vrot.slane %v2625_v0, 4  ;;  %v1976_v18 = vadd.f32 %v3926_v40, %v3817_v45 }
 0x4c7   : > { %v2607_v16 = vrot.slane %v2606_v1, 2  ;;  %vm2168_vm8 = vcmp.ge.f32.partialorder %v1974_v36, 0.0  ;;  %v2296_v39 = vmul.f32 0.2, %v1974_v36  ;;  %vm2170_vm9 = vcmp.ge.f32.partialorder %v2087_v9, 0.0 }
 0x4c8   : > { %v2566_v52 = vmax.f32 %v2564_v53, %v2565_v61  ;;  %v2585_v59 = vmax.f32 %v2583_v63, %v2584_v13  ;;  %v2627_v33 = vmax.f32 %v2625_v0, %v2626_v17  ;;  %v2298_v4 = vmul.f32 0.2, %v2087_v9 }
 0x4c9   : > { %v2608_v22 = vmax.f32 %v2606_v1, %v2607_v16  ;;  %v3998_v20 = vsel %vm2168_vm8, %v1974_v36, %v2296_v39  ;;  %vm2175_vm10 = vcmp.ge.f32.partialorder %v1976_v18, 0.0  ;;  %v2303_v29 = vmul.f32 0.2, %v1976_v18  ;;  %v4000_v50 = vpop.f32.mrb[76].mxu0  ;;  %v4002_v62 = vpop.f32.mrb[76].mxu1 }
 0x4ca   : > { %v2567_v32 = vrot.slane %v2566_v52, 1  ;;  %v2586_v34 = vrot.slane %v2585_v59, 2  ;;  %v2628_v40 = vrot.slane %v2627_v33, 2  ;;  %v4004_v38 = vsel %vm2170_vm9, %v2087_v9, %v2298_v4  ;;  %v4006_v35 = vpop.f32.mrb[77].mxu0  ;;  %v4008_v44 = vpop.f32.mrb[77].mxu1 }
 0x4cb   : > { %v2609_v46 = vrot.slane %v2608_v22, 1  ;;  %v2431_v41 = vsel %vm2175_vm10, %v1976_v18, %v2303_v29  ;;  %v2089_v27 = vadd.f32 %v3928_v26, %v3821_v49  ;;  %v1978_v37 = vadd.f32 %v3930_v42, %v3823_v51  ;;  %v4014_v30 = vpop.f32.mrb[78].mxu0  ;;  %v4016_v31 = vpop.f32.mrb[78].mxu1 }
 0x4cc   : > { %v2568_v8 = vmax.f32 %v2566_v52, %v2567_v32  ;;  %v2587_v12 = vmax.f32 %v2585_v59, %v2586_v34  ;;  %v2629_v48 = vmax.f32 %v2627_v33, %v2628_v40  ;;  %v2632_v57 = vmax.f32 %v3980_v2, %v2431_v41  ;;  %v4019_v25 = vpop.f32.mrb[79].mxu0  ;;  %v4021_v53 = vpop.f32.mrb[79].mxu1 }
 0x4cd   : > { %v2610_v63 = vmax.f32 %v2608_v22, %v2609_v46  ;;  %vm2177_vm11 = vcmp.ge.f32.partialorder %v2089_v27, 0.0  ;;  %v2305_v0 = vmul.f32 0.2, %v2089_v27  ;;  %vm2176_vm12 = vcmp.ge.f32.partialorder %v1978_v37, 0.0 }
 0x4ce   : > { %v2588_v26 = vrot.slane %v2587_v12, 1  ;;  %v2630_v1 = vrot.slane %v2629_v48, 1  ;;  %v2304_v42 = vmul.f32 0.2, %v1978_v37  ;;  %v2091_v36 = vadd.f32 %v3932_v43, %v3827_v55 }
 0x4cf   : > { %v2433_v9 = vsel %vm2177_vm11, %v2089_v27, %v2305_v0  ;;  %v1982_v61 = vadd.f32 %v3946_v56, %v3817_v45  ;;  %v2095_v2 = vadd.f32 %v3948_v11, %v3821_v49  ;;  %v1984_v13 = vadd.f32 %v3952_v15, %v3823_v51 }
 0x4d0   : > { %v2589_v17 = vmax.f32 %v2587_v12, %v2588_v26  ;;  %v2631_v18 = vmax.f32 %v2629_v48, %v2630_v1  ;;  %v2674_v16 = vmax.f32 %v3986_v14, %v2433_v9  ;;  %v2432_v39 = vsel %vm2176_vm12, %v1978_v37, %v2304_v42 }
 0x4d1   : > { %v2653_v52 = vmax.f32 %v3998_v20, %v2432_v39  ;;  %vm2178_vm13 = vcmp.ge.f32.partialorder %v2091_v36, 0.0  ;;  %v2306_v59 = vmul.f32 0.2, %v2091_v36  ;;  %vm2183_vm14 = vcmp.ge.f32.partialorder %v1982_v61, 0.0  ;;  %v4033_v43 = vpop.f32.mrb[80].mxu0  ;;  %v4035_v33 = vpop.f32.mrb[80].mxu1 }
 0x4d2   : > { %v2724_v56 = vcombine.low %v2568_v8, %v2589_v17  ;;  %v2725_v4 = vcombine.low %v2610_v63, %v2631_v18  ;;  %v2311_v11 = vmul.f32 0.2, %v1982_v61  ;;  %vm2185_vm15 = vcmp.ge.f32.partialorder %v2095_v2, 0.0  ;;  %v4037_v22 = vpop.f32.mrb[81].mxu0  ;;  %v4039_v15 = vpop.f32.mrb[81].mxu1 }
 0x4d3   : > { %v2434_v29 = vsel %vm2178_vm13, %v2091_v36, %v2306_v59  ;;  %v2313_v14 = vmul.f32 0.2, %v2095_v2  ;;  %vm2184_vm0 = vcmp.ge.f32.partialorder %v1984_v13, 0.0  ;;  %v2312_v32 = vmul.f32 0.2, %v1984_v13  ;;  %v4041_v20 = vpop.f32.mrb[82].mxu0 }
 0x4d4   : > { %v4044_v34 = vrot.slane %v2724_v56, %v3825_v24  ;;  %v4047_v40 = vrot.slane %v2725_v4, %v3825_v24  ;;  %v2695_v46 = vmax.f32 %v4004_v38, %v2434_v29  ;;  %v2439_v41 = vsel %vm2183_vm14, %v1982_v61, %v2311_v11  ;;  %v4051_v27 = vpop.f32.mrb[82].mxu1  ;;  %v4053_v37 = vpop.f32.mrb[83].mxu0 }
 0x4d5   : > { %v2633_v8 = vmax.f32 %v2632_v57, %v2439_v41  ;;  %v2441_v12 = vsel %vm2185_vm15, %v2095_v2, %v2313_v14  ;;  %v2440_v48 = vsel %vm2184_vm0, %v1984_v13, %v2312_v32  ;;  %v2097_v63 = vadd.f32 %v3954_v21, %v3827_v55  ;;  %v4057_v0 = vpop.f32.mrb[83].mxu1 }
 0x4d6   : > { %v2756_v26 = vcombine.low %v4044_v34, %v4047_v40  ;;  %v2675_v1 = vmax.f32 %v2674_v16, %v2441_v12  ;;  %v2654_v42 = vmax.f32 %v2653_v52, %v2440_v48  ;;  %v1986_v38 = vadd.f32 %v3956_v6, %v3817_v45 }
 0x4d7   : > { %vm2186_vm1 = vcmp.ge.f32.partialorder %v2097_v63, 0.0  ;;  %v2314_v36 = vmul.f32 0.2, %v2097_v63  ;;  %v2099_v57 = vadd.f32 %v3958_v28, %v3821_v49  ;;  %v1988_v9 = vadd.f32 %v3960_v23, %v3823_v51 }
 0x4d8   : > { %vm2191_vm2 = vcmp.ge.f32.partialorder %v1986_v38, 0.0  ;;  %v2319_v21 = vmul.f32 0.2, %v1986_v38  ;;  %v2101_v61 = vadd.f32 %v3966_v19, %v3827_v55  ;;  %v1992_v19 = vadd.f32 %v3972_v5, %v3817_v45 }
 0x4d9   : > { %v2442_v2 = vsel %vm2186_vm1, %v2097_v63, %v2314_v36  ;;  %vm2193_vm3 = vcmp.ge.f32.partialorder %v2099_v57, 0.0  ;;  %v2321_v13 = vmul.f32 0.2, %v2099_v57  ;;  %vm2192_vm4 = vcmp.ge.f32.partialorder %v1988_v9, 0.0  ;;  %v4069_v17 = vpop.f32.mrb[84].mxu0  ;;  %v4071_v6 = vpop.f32.mrb[84].mxu1 }
 0x4da   : > { %v2696_v18 = vmax.f32 %v2695_v46, %v2442_v2  ;;  %v2447_v16 = vsel %vm2191_vm2, %v1986_v38, %v2319_v21  ;;  %v2320_v39 = vmul.f32 0.2, %v1988_v9  ;;  %vm2194_vm5 = vcmp.ge.f32.partialorder %v2101_v61, 0.0  ;;  %v4073_v28 = vpop.f32.mrb[85].mxu0  ;;  %v4075_v23 = vpop.f32.mrb[85].mxu1 }
 0x4db   : > { %v2634_v52 = vmax.f32 %v2633_v8, %v2447_v16  ;;  %v2449_v59 = vsel %vm2193_vm3, %v2099_v57, %v2321_v13  ;;  %v2322_v56 = vmul.f32 0.2, %v2101_v61  ;;  %v4079_v4 = vpop.f32.mrb[86].mxu0  ;;  %v4081_v11 = vpop.f32.mrb[86].mxu1  ;;  %v2105_v32 = vadd.f32 %v3974_v47, %v3821_v49 }
 0x4dc   : > { %v2676_v29 = vmax.f32 %v2675_v1, %v2449_v59  ;;  %v2448_v14 = vsel %vm2192_vm4, %v1988_v9, %v2320_v39  ;;  %v1994_v46 = vadd.f32 %v3976_v58, %v3823_v51  ;;  %v4088_v41 = vpop.f32.mrb[87].mxu0  ;;  %v4090_v8 = vpop.f32.mrb[87].mxu1  ;;  %vm2199_vm7 = vcmp.ge.f32.partialorder %v1992_v19, 0.0 }
 0x4dd   : > { %v2655_v12 = vmax.f32 %v2654_v42, %v2448_v14  ;;  %v2450_v5 = vsel %vm2194_vm5, %v2101_v61, %v2322_v56  ;;  %v2327_v48 = vmul.f32 0.2, %v1992_v19  ;;  %vm2201_vm6 = vcmp.ge.f32.partialorder %v2105_v32, 0.0 }
 0x4de   : > { %v2697_v63 = vmax.f32 %v2696_v18, %v2450_v5  ;;  %v2329_v1 = vmul.f32 0.2, %v2105_v32  ;;  %vm2200_vm8 = vcmp.ge.f32.partialorder %v1994_v46, 0.0  ;;  %v2328_v36 = vmul.f32 0.2, %v1994_v46 }
 0x4df   : > { %v2455_v38 = vsel %vm2199_vm7, %v1992_v19, %v2327_v48  ;;  %v2107_v47 = vadd.f32 %v3978_v60, %v3827_v55  ;;  %v1996_v58 = vadd.f32 %v3982_v3, %v3817_v45  ;;  %v2109_v42 = vadd.f32 %v3984_v7, %v3821_v49 }
 0x4e0   : > { %v2635_v57 = vmax.f32 %v2634_v52, %v2455_v38  ;;  %v2457_v9 = vsel %vm2201_vm6, %v2105_v32, %v2329_v1  ;;  %v1998_v21 = vadd.f32 %v3992_v54, %v3823_v51  ;;  %v2456_v2 = vsel %vm2200_vm8, %v1994_v46, %v2328_v36 }
 0x4e1   : > { %v2677_v61 = vmax.f32 %v2676_v29, %v2457_v9  ;;  %vm2202_vm9 = vcmp.ge.f32.partialorder %v2107_v47, 0.0  ;;  %v2330_v13 = vmul.f32 0.2, %v2107_v47  ;;  %v4101_v18 = vpop.f32.mrb[88].mxu0  ;;  %v4103_v16 = vpop.f32.mrb[88].mxu1  ;;  %v2656_v60 = vmax.f32 %v2655_v12, %v2456_v2 }
 0x4e2   : > { %vm2207_vm10 = vcmp.ge.f32.partialorder %v1996_v58, 0.0  ;;  %v2335_v39 = vmul.f32 0.2, %v1996_v58  ;;  %vm2209_vm11 = vcmp.ge.f32.partialorder %v2109_v42, 0.0  ;;  %v4105_v3 = vpop.f32.mrb[89].mxu0  ;;  %v4107_v52 = vpop.f32.mrb[89].mxu1  ;;  %v2111_v14 = vadd.f32 %v3994_v10, %v3827_v55 }
 0x4e3   : > { %v2458_v7 = vsel %vm2202_vm9, %v2107_v47, %v2330_v13  ;;  %v2337_v59 = vmul.f32 0.2, %v2109_v42  ;;  %vm2208_vm12 = vcmp.ge.f32.partialorder %v1998_v21, 0.0  ;;  %v2336_v54 = vmul.f32 0.2, %v1998_v21  ;;  %v4109_v56 = vpop.f32.mrb[90].mxu0 }
 0x4e4   : > { %v2698_v19 = vmax.f32 %v2697_v63, %v2458_v7  ;;  %v2463_v29 = vsel %vm2207_vm10, %v1996_v58, %v2335_v39  ;;  %v2002_v32 = vadd.f32 %v4000_v50, %v3817_v45  ;;  %v4115_v46 = vpop.f32.mrb[90].mxu1  ;;  %v4117_v12 = vpop.f32.mrb[91].mxu0  ;;  %v2115_v38 = vadd.f32 %v4002_v62, %v3821_v49 }
 0x4e5   : > { %v2636_v5 = vmax.f32 %v2635_v57, %v2463_v29  ;;  %v2465_v48 = vsel %vm2209_vm11, %v2109_v42, %v2337_v59  ;;  %v2464_v1 = vsel %vm2208_vm12, %v1998_v21, %v2336_v54  ;;  %v4121_v36 = vpop.f32.mrb[91].mxu1  ;;  %vm2210_vm13 = vcmp.ge.f32.partialorder %v2111_v14, 0.0 }
 0x4e6   : > { %v2678_v63 = vmax.f32 %v2677_v61, %v2465_v48  ;;  %v2657_v47 = vmax.f32 %v2656_v60, %v2464_v1  ;;  %v2338_v58 = vmul.f32 0.2, %v2111_v14  ;;  %vm2215_vm14 = vcmp.ge.f32.partialorder %v2002_v32, 0.0 }
 0x4e7   : > { %v2343_v10 = vmul.f32 0.2, %v2002_v32  ;;  %vm2217_vm15 = vcmp.ge.f32.partialorder %v2115_v38, 0.0  ;;  %v2345_v50 = vmul.f32 0.2, %v2115_v38  ;;  %v2004_v2 = vadd.f32 %v4006_v35, %v3823_v51 }
 0x4e8   : > { %v2466_v9 = vsel %vm2210_vm13, %v2111_v14, %v2338_v58  ;;  %v2117_v57 = vadd.f32 %v4008_v44, %v3827_v55  ;;  %v2006_v62 = vadd.f32 %v4014_v30, %v3817_v45  ;;  %v2119_v13 = vadd.f32 %v4016_v31, %v3821_v49 }
 0x4e9   : > { %v2699_v42 = vmax.f32 %v2698_v19, %v2466_v9  ;;  %v2471_v21 = vsel %vm2215_vm14, %v2002_v32, %v2343_v10  ;;  %v2473_v61 = vsel %vm2217_vm15, %v2115_v38, %v2345_v50  ;;  %v4131_v60 = vpop.f32.mrb[92].mxu0  ;;  %v4133_v39 = vpop.f32.mrb[92].mxu1  ;;  %vm2216_vm0 = vcmp.ge.f32.partialorder %v2004_v2, 0.0 }
 0x4ea   : > { %v2637_v7 = vmax.f32 %v2636_v5, %v2471_v21  ;;  %v2679_v59 = vmax.f32 %v2678_v63, %v2473_v61  ;;  %v2344_v35 = vmul.f32 0.2, %v2004_v2  ;;  %v4135_v54 = vpop.f32.mrb[93].mxu0  ;;  %v4137_v44 = vpop.f32.mrb[93].mxu1  ;;  %vm2218_vm1 = vcmp.ge.f32.partialorder %v2117_v57, 0.0 }
 0x4eb   : > { %v2346_v30 = vmul.f32 0.2, %v2117_v57  ;;  %vm2223_vm2 = vcmp.ge.f32.partialorder %v2006_v62, 0.0  ;;  %v2351_v19 = vmul.f32 0.2, %v2006_v62  ;;  %vm2225_vm3 = vcmp.ge.f32.partialorder %v2119_v13, 0.0 }
 0x4ec   : > { %v2472_v29 = vsel %vm2216_vm0, %v2004_v2, %v2344_v35  ;;  %v2353_v14 = vmul.f32 0.2, %v2119_v13  ;;  %v2008_v31 = vadd.f32 %v4019_v25, %v3823_v51  ;;  %v4141_v32 = vpop.f32.mrb[94].mxu0  ;;  %v4143_v5 = vpop.f32.mrb[94].mxu1  ;;  %v2121_v63 = vadd.f32 %v4021_v53, %v3827_v55 }
 0x4ed   : > { %v2658_v48 = vmax.f32 %v2657_v47, %v2472_v29  ;;  %v2474_v1 = vsel %vm2218_vm1, %v2117_v57, %v2346_v30  ;;  %v2479_v38 = vsel %vm2223_vm2, %v2006_v62, %v2351_v19  ;;  %v4147_v58 = vpop.f32.mrb[95].mxu0  ;;  %v4149_v10 = vpop.f32.mrb[95].mxu1  ;;  %v2012_v47 = vadd.f32 %v4033_v43, %v3817_v45 }
 0x4ee   : > { %v2700_v50 = vmax.f32 %v2699_v42, %v2474_v1  ;;  %v2638_v9 = vmax.f32 %v2637_v7, %v2479_v38  ;;  %v2481_v2 = vsel %vm2225_vm3, %v2119_v13, %v2353_v14  ;;  %vm2224_vm4 = vcmp.ge.f32.partialorder %v2008_v31, 0.0 }
 0x4ef   : > { %v2680_v21 = vmax.f32 %v2679_v59, %v2481_v2  ;;  %v2352_v25 = vmul.f32 0.2, %v2008_v31  ;;  %vm2226_vm5 = vcmp.ge.f32.partialorder %v2121_v63, 0.0  ;;  %v2354_v61 = vmul.f32 0.2, %v2121_v63 }
 0x4f0   : > { %v2125_v57 = vadd.f32 %v4035_v33, %v3821_v49  ;;  %v2014_v53 = vadd.f32 %v4037_v22, %v3823_v51  ;;  %v2127_v62 = vadd.f32 %v4039_v15, %v3827_v55  ;;  %v2016_v13 = vadd.f32 %v4041_v20, %v3817_v45 }
 0x4f1   : > { %v2480_v42 = vsel %vm2224_vm4, %v2008_v31, %v2352_v25  ;;  %v2482_v7 = vsel %vm2226_vm5, %v2121_v63, %v2354_v61  ;;  %v2129_v59 = vadd.f32 %v4051_v27, %v3821_v49  ;;  %vm2231_vm7 = vcmp.ge.f32.partialorder %v2012_v47, 0.0 }
 0x4f2   : > { %v2659_v35 = vmax.f32 %v2658_v48, %v2480_v42  ;;  %v2701_v30 = vmax.f32 %v2700_v50, %v2482_v7  ;;  %v2359_v43 = vmul.f32 0.2, %v2012_v47  ;;  %vm2233_vm6 = vcmp.ge.f32.partialorder %v2125_v57, 0.0 }
 0x4f3   : > { %v2361_v33 = vmul.f32 0.2, %v2125_v57  ;;  %vm2232_vm8 = vcmp.ge.f32.partialorder %v2014_v53, 0.0  ;;  %v2360_v19 = vmul.f32 0.2, %v2014_v53  ;;  %vm2234_vm9 = vcmp.ge.f32.partialorder %v2127_v62, 0.0 }
 0x4f4   : > { %v2487_v22 = vsel %vm2231_vm7, %v2012_v47, %v2359_v43  ;;  %v2362_v29 = vmul.f32 0.2, %v2127_v62  ;;  %vm2239_vm10 = vcmp.ge.f32.partialorder %v2016_v13, 0.0  ;;  %v2367_v1 = vmul.f32 0.2, %v2016_v13 }
 0x4f5   : > { %v2639_v15 = vmax.f32 %v2638_v9, %v2487_v22  ;;  %v2489_v14 = vsel %vm2233_vm6, %v2125_v57, %v2361_v33  ;;  %v2488_v31 = vsel %vm2232_vm8, %v2014_v53, %v2360_v19  ;;  %vm2241_vm11 = vcmp.ge.f32.partialorder %v2129_v59, 0.0 }
 0x4f6   : > { %v2681_v20 = vmax.f32 %v2680_v21, %v2489_v14  ;;  %v2660_v38 = vmax.f32 %v2659_v35, %v2488_v31  ;;  %v2490_v63 = vsel %vm2234_vm9, %v2127_v62, %v2362_v29  ;;  %v2495_v48 = vsel %vm2239_vm10, %v2016_v13, %v2367_v1 }
 0x4f7   : > { %v2702_v27 = vmax.f32 %v2701_v30, %v2490_v63  ;;  %v2369_v50 = vmul.f32 0.2, %v2129_v59  ;;  %v2018_v2 = vadd.f32 %v4053_v37, %v3823_v51  ;;  %v2640_v25 = vmax.f32 %v2639_v15, %v2495_v48 }
 0x4f8   : > { %v2131_v61 = vadd.f32 %v4057_v0, %v3827_v55  ;;  %v2022_v9 = vadd.f32 %v4069_v17, %v3817_v45  ;;  %v2135_v47 = vadd.f32 %v4071_v6, %v3821_v49  ;;  %v2024_v53 = vadd.f32 %v4073_v28, %v3823_v51 }
 0x4f9   : > { %v2497_v21 = vsel %vm2241_vm11, %v2129_v59, %v2369_v50  ;;  %vm2240_vm12 = vcmp.ge.f32.partialorder %v2018_v2, 0.0  ;;  %v2368_v57 = vmul.f32 0.2, %v2018_v2  ;;  %v2137_v43 = vadd.f32 %v4075_v23, %v3827_v55 }
 0x4fa   : > { %v2682_v62 = vmax.f32 %v2681_v20, %v2497_v21  ;;  %vm2242_vm13 = vcmp.ge.f32.partialorder %v2131_v61, 0.0  ;;  %v2370_v42 = vmul.f32 0.2, %v2131_v61  ;;  %vm2247_vm14 = vcmp.ge.f32.partialorder %v2022_v9, 0.0 }
 0x4fb   : > { %v2496_v37 = vsel %vm2240_vm12, %v2018_v2, %v2368_v57  ;;  %v2375_v7 = vmul.f32 0.2, %v2022_v9  ;;  %vm2249_vm15 = vcmp.ge.f32.partialorder %v2135_v47, 0.0  ;;  %v2377_v0 = vmul.f32 0.2, %v2135_v47 }
 0x4fc   : > { %v2661_v13 = vmax.f32 %v2660_v38, %v2496_v37  ;;  %v2498_v35 = vsel %vm2242_vm13, %v2131_v61, %v2370_v42  ;;  %vm2248_vm0 = vcmp.ge.f32.partialorder %v2024_v53, 0.0  ;;  %v2376_v17 = vmul.f32 0.2, %v2024_v53 }
 0x4fd   : > { %v2703_v30 = vmax.f32 %v2702_v27, %v2498_v35  ;;  %v2503_v6 = vsel %vm2247_vm14, %v2022_v9, %v2375_v7  ;;  %v2505_v59 = vsel %vm2249_vm15, %v2135_v47, %v2377_v0  ;;  %v2026_v22 = vadd.f32 %v4079_v4, %v3817_v45 }
 0x4fe   : > { %v2641_v33 = vmax.f32 %v2640_v25, %v2503_v6  ;;  %v2683_v28 = vmax.f32 %v2682_v62, %v2505_v59  ;;  %v2504_v19 = vsel %vm2248_vm0, %v2024_v53, %v2376_v17  ;;  %vm2250_vm1 = vcmp.ge.f32.partialorder %v2137_v43, 0.0 }
 0x4ff   : > { %v2662_v29 = vmax.f32 %v2661_v13, %v2504_v19  ;;  %v2378_v15 = vmul.f32 0.2, %v2137_v43  ;;  %v2139_v14 = vadd.f32 %v4081_v11, %v3821_v49  ;;  %vm2255_vm2 = vcmp.ge.f32.partialorder %v2026_v22, 0.0 }
 0x500   : > { %v2383_v31 = vmul.f32 0.2, %v2026_v22  ;;  %v2028_v1 = vadd.f32 %v4088_v41, %v3823_v51  ;;  %v2141_v23 = vadd.f32 %v4090_v8, %v3827_v55  ;;  %v2032_v4 = vadd.f32 %v4101_v18, %v3817_v45 }
 0x501   : > { %v2506_v20 = vsel %vm2250_vm1, %v2137_v43, %v2378_v15  ;;  %vm2257_vm3 = vcmp.ge.f32.partialorder %v2139_v14, 0.0  ;;  %v2385_v38 = vmul.f32 0.2, %v2139_v14  ;;  %v2145_v47 = vadd.f32 %v4103_v16, %v3821_v49 }
 0x502   : > { %v2704_v63 = vmax.f32 %v2703_v30, %v2506_v20  ;;  %v2511_v27 = vsel %vm2255_vm2, %v2026_v22, %v2383_v31  ;;  %vm2256_vm4 = vcmp.ge.f32.partialorder %v2028_v1, 0.0  ;;  %v2384_v48 = vmul.f32 0.2, %v2028_v1 }
 0x503   : > { %v2642_v50 = vmax.f32 %v2641_v33, %v2511_v27  ;;  %v2513_v11 = vsel %vm2257_vm3, %v2139_v14, %v2385_v38  ;;  %vm2258_vm5 = vcmp.ge.f32.partialorder %v2141_v23, 0.0  ;;  %v2386_v2 = vmul.f32 0.2, %v2141_v23 }
 0x504   : > { %v2684_v25 = vmax.f32 %v2683_v28, %v2513_v11  ;;  %v2512_v61 = vsel %vm2256_vm4, %v2028_v1, %v2384_v48  ;;  %vm2263_vm7 = vcmp.ge.f32.partialorder %v2032_v4, 0.0  ;;  %v2391_v41 = vmul.f32 0.2, %v2032_v4 }
 0x505   : > { %v2663_v9 = vmax.f32 %v2662_v29, %v2512_v61  ;;  %v2514_v8 = vsel %vm2258_vm5, %v2141_v23, %v2386_v2  ;;  %v2034_v18 = vadd.f32 %v4105_v3, %v3823_v51  ;;  %v2147_v53 = vadd.f32 %v4107_v52, %v3827_v55 }
 0x506   : > { %v2705_v21 = vmax.f32 %v2704_v63, %v2514_v8  ;;  %v2519_v57 = vsel %vm2263_vm7, %v2032_v4, %v2391_v41  ;;  %v2036_v62 = vadd.f32 %v4109_v56, %v3817_v45  ;;  %vm2265_vm6 = vcmp.ge.f32.partialorder %v2145_v47, 0.0 }
 0x507   : > { %v2643_v42 = vmax.f32 %v2642_v50, %v2519_v57  ;;  %v2393_v37 = vmul.f32 0.2, %v2145_v47  ;;  %vm2264_vm8 = vcmp.ge.f32.partialorder %v2034_v18, 0.0  ;;  %v2392_v7 = vmul.f32 0.2, %v2034_v18 }
 0x508   : > { %vm2266_vm9 = vcmp.ge.f32.partialorder %v2147_v53, 0.0  ;;  %v2394_v0 = vmul.f32 0.2, %v2147_v53  ;;  %vm2271_vm10 = vcmp.ge.f32.partialorder %v2036_v62, 0.0  ;;  %v2399_v13 = vmul.f32 0.2, %v2036_v62 }
 0x509   : > { %v2521_v16 = vsel %vm2265_vm6, %v2145_v47, %v2393_v37  ;;  %v2149_v3 = vadd.f32 %v4115_v46, %v3821_v49  ;;  %v2038_v35 = vadd.f32 %v4117_v12, %v3823_v51  ;;  %v2520_v17 = vsel %vm2264_vm8, %v2034_v18, %v2392_v7 }
 0x50a   : > { %v2685_v52 = vmax.f32 %v2684_v25, %v2521_v16  ;;  %v2522_v30 = vsel %vm2266_vm9, %v2147_v53, %v2394_v0  ;;  %v2151_v56 = vadd.f32 %v4121_v36, %v3827_v55  ;;  %v2664_v6 = vmax.f32 %v2663_v9, %v2520_v17 }
 0x50b   : > { %v2706_v59 = vmax.f32 %v2705_v21, %v2522_v30  ;;  %v2527_v43 = vsel %vm2271_vm10, %v2036_v62, %v2399_v13  ;;  %vm2273_vm11 = vcmp.ge.f32.partialorder %v2149_v3, 0.0  ;;  %v2401_v28 = vmul.f32 0.2, %v2149_v3 }
 0x50c   : > { %v2644_v33 = vmax.f32 %v2643_v42, %v2527_v43  ;;  %vm2272_vm12 = vcmp.ge.f32.partialorder %v2038_v35, 0.0  ;;  %v2400_v19 = vmul.f32 0.2, %v2038_v35  ;;  %vm2274_vm13 = vcmp.ge.f32.partialorder %v2151_v56, 0.0 }
 0x50d   : > { %v2402_v22 = vmul.f32 0.2, %v2151_v56  ;;  %v2042_v46 = vadd.f32 %v4131_v60, %v3817_v45  ;;  %v2155_v12 = vadd.f32 %v4133_v39, %v3821_v49  ;;  %v2529_v29 = vsel %vm2273_vm11, %v2149_v3, %v2401_v28 }
 0x50e   : > { %v2528_v15 = vsel %vm2272_vm12, %v2038_v35, %v2400_v19  ;;  %v2044_v36 = vadd.f32 %v4135_v54, %v3823_v51  ;;  %v2157_v14 = vadd.f32 %v4137_v44, %v3827_v55  ;;  %v2686_v31 = vmax.f32 %v2685_v52, %v2529_v29 }
 0x50f   : > { %v2665_v1 = vmax.f32 %v2664_v6, %v2528_v15  ;;  %v2530_v23 = vsel %vm2274_vm13, %v2151_v56, %v2402_v22  ;;  %vm2279_vm14 = vcmp.ge.f32.partialorder %v2042_v46, 0.0  ;;  %v2407_v38 = vmul.f32 0.2, %v2042_v46 }
 0x510   : > { %v2707_v20 = vmax.f32 %v2706_v59, %v2530_v23  ;;  %vm2281_vm15 = vcmp.ge.f32.partialorder %v2155_v12, 0.0  ;;  %v2409_v4 = vmul.f32 0.2, %v2155_v12  ;;  %vm2280_vm0 = vcmp.ge.f32.partialorder %v2044_v36, 0.0 }
 0x511   : > { %v2408_v60 = vmul.f32 0.2, %v2044_v36  ;;  %vm2282_vm1 = vcmp.ge.f32.partialorder %v2157_v14, 0.0  ;;  %v2410_v39 = vmul.f32 0.2, %v2157_v14  ;;  %v2535_v63 = vsel %vm2279_vm14, %v2042_v46, %v2407_v38 }
 0x512   : > { %v2537_v27 = vsel %vm2281_vm15, %v2155_v12, %v2409_v4  ;;  %v2046_v54 = vadd.f32 %v4141_v32, %v3817_v45  ;;  %v2159_v44 = vadd.f32 %v4143_v5, %v3821_v49  ;;  %v2645_v48 = vmax.f32 %v2644_v33, %v2535_v63 }
 0x513   : > { %v2687_v50 = vmax.f32 %v2686_v31, %v2537_v27  ;;  %v2536_v11 = vsel %vm2280_vm0, %v2044_v36, %v2408_v60  ;;  %v2538_v2 = vsel %vm2282_vm1, %v2157_v14, %v2410_v39  ;;  %v2048_v8 = vadd.f32 %v4147_v58, %v3823_v51 }
 0x514   : > { %v2666_v25 = vmax.f32 %v2665_v1, %v2536_v11  ;;  %v2708_v61 = vmax.f32 %v2707_v20, %v2538_v2  ;;  %vm2287_vm2 = vcmp.ge.f32.partialorder %v2046_v54, 0.0  ;;  %v2415_v41 = vmul.f32 0.2, %v2046_v54  ;;  %v2547_v20 = vld [vmem:[#allocation2] sm:$0xff] }
 0x515   : > { %vm2289_vm3 = vcmp.ge.f32.partialorder %v2159_v44, 0.0  ;;  %v2417_v9 = vmul.f32 0.2, %v2159_v44  ;;  %v2161_v47 = vadd.f32 %v4149_v10, %v3827_v55  ;;  %vm2288_vm4 = vcmp.ge.f32.partialorder %v2048_v8, 0.0 }
 0x516   : > { %v2543_v45 = vsel %vm2287_vm2, %v2046_v54, %v2415_v41  ;;  %v2416_v49 = vmul.f32 0.2, %v2048_v8  ;;  %v2764_v1 = vrot.slane %v2756_v26, %v3825_v24 }
 0x517   : > { %v2646_v32 = vmax.f32 %v2645_v48, %v2543_v45  ;;  %v2545_v18 = vsel %vm2289_vm3, %v2159_v44, %v2417_v9  ;;  %vm2290_vm5 = vcmp.ge.f32.partialorder %v2161_v47, 0.0  ;;  %v2418_v21 = vmul.f32 0.2, %v2161_v47 }
 0x518   : > { %v2688_v5 = vmax.f32 %v2687_v50, %v2545_v18  ;;  %v2544_v53 = vsel %vm2288_vm4, %v2048_v8, %v2416_v49 }
 0x519   : > { %v2647_v57 = vrot.slane %v2646_v32, 4  ;;  %v2667_v42 = vmax.f32 %v2666_v25, %v2544_v53  ;;  %v2546_v37 = vsel %vm2290_vm5, %v2161_v47, %v2418_v21 }
 0x51a   : > { %v2689_v62 = vrot.slane %v2688_v5, 4  ;;  %v2709_v0 = vmax.f32 %v2708_v61, %v2546_v37 }
 0x51b   : > { %v2648_v7 = vmax.f32 %v2646_v32, %v2647_v57  ;;  %v2668_v51 = vrot.slane %v2667_v42, 4 }
 0x51c   : > { %v2690_v16 = vmax.f32 %v2688_v5, %v2689_v62  ;;  %v2710_v13 = vrot.slane %v2709_v0, 4 }
 0x51d   : > { %v2649_v58 = vrot.slane %v2648_v7, 2  ;;  %v2669_v10 = vmax.f32 %v2667_v42, %v2668_v51 }
 0x51e   : > { %v2691_v55 = vrot.slane %v2690_v16, 2  ;;  %v2711_v35 = vmax.f32 %v2709_v0, %v2710_v13 }
 0x51f   : > { %v2650_v3 = vmax.f32 %v2648_v7, %v2649_v58  ;;  %v2670_v17 = vrot.slane %v2669_v10, 2 }
 0x520   : > { %v2692_v52 = vmax.f32 %v2690_v16, %v2691_v55  ;;  %v2712_v56 = vrot.slane %v2711_v35, 2 }
 0x521   : > { %v2651_v30 = vrot.slane %v2650_v3, 1  ;;  %v2671_v59 = vmax.f32 %v2669_v10, %v2670_v17 }
 0x522   : > { %v2693_v6 = vrot.slane %v2692_v52, 1  ;;  %v2713_v43 = vmax.f32 %v2711_v35, %v2712_v56 }
 0x523   : > { %v2652_v33 = vmax.f32 %v2650_v3, %v2651_v30  ;;  %v2672_v28 = vrot.slane %v2671_v59, 1 }
 0x524   : > { %v2694_v19 = vmax.f32 %v2692_v52, %v2693_v6  ;;  %v2714_v22 = vrot.slane %v2713_v43, 1 }
 0x525   : > { %v2673_v46 = vmax.f32 %v2671_v59, %v2672_v28 }
 0x526   : > { %v2715_v12 = vmax.f32 %v2713_v43, %v2714_v22 }
 0x527   : > { %v2726_v29 = vcombine.low %v2652_v33, %v2673_v46 }
 0x528   : > { %v2727_v15 = vcombine.low %v2694_v19, %v2715_v12 }
 0x529   : > { %v2748_v36 = vrot.slane %v2726_v29, %v3825_v24 }
 0x52a   : > { %v2755_v14 = vrot.slane %v2727_v15, %v3825_v24 }
 0x52c   : > { %v2757_v31 = vcombine.low %v2748_v36, %v2755_v14 }
 0x52e   : > { %v2771_v23 = vrot.slane %v2757_v31, %v3825_v24  ;;  %2779 = sbr.rel (%p2974_p8) target bundleno = 1341 (0x53d), region = 72 }
 0x530   : > { %v2772_v38 = vcombine.low %v2764_v1, %v2771_v23 }
 0x532   : > { %v2774_v4 = vmax.f32 %v2547_v20, %v2772_v38 }
 0x534   : > { %2775 = vst [vmem:[#allocation2] sm:$0xff] %v2774_v4 }
 0x53b   : > { %v2780_v60 = vld [vmem:[#allocation2] sm:$0xff] }
 0x53c   : > { %2781 = vst [vmem:[%s3308_s30] sm:$0xff] %v2780_v60 }
 0x53d PF: > { %s21_s21 = sadd.s32 1, %s3206_s21   ;;  %s4251_s17 = smov %s3198_s19 }
 0x53e   : > { %p18_p9 = scmp.ge.s32.totalorder %s21_s21, 10   ;;  %s4252_s18 = smov %s3202_s20 }
 0x53f   : > { %s4253_s19 = smov %s4256_s22  ;;  %s4254_s20 = smov %s4260_s23 }
 0x540   :  { %20 = sbr.rel (!%p18_p9) target bundleno = 3 (0x3), region = 102 }

// kernel: pointnet_cls_forward.3
= control target key start
LH: loop header
LB: loop body
LE: loop exit
PB: predicated region body
PF: predicated region fallthrough
CT: control target
= control target key end

     0   :  { %v3576_v36 = vmov 1983009808   ;;  %v36_v38 = vlaneseq  ;;  %s4725_s0 = inlined_call_operand.vmem [shape: f32[2,1024], index: 0, kind: input, shape index: {}]   ;;  %s4726_s1 = inlined_call_operand.vmem [shape: bf16[1024,512], index: 1, kind: input, shape index: {}]   ;;  %s4727_s2 = inlined_call_operand.vmem [shape: f32[1,512], index: 2, kind: input, shape index: {}]   ;;  %s4728_s3 = inlined_call_operand.vmem [shape: bf16[512,256], index: 3, kind: input, shape index: {}]   ;;  %s4729_s4 = inlined_call_operand.vmem [shape: f32[1,256], index: 4, kind: input, shape index: {}]   ;;  %s4730_s5 = inlined_call_operand.vmem [shape: bf16[256,8], index: 5, kind: input, shape index: {}]   ;;  %s4731_s6 = inlined_call_operand.vmem [shape: f32[1,8], index: 6, kind: input, shape index: {}]   ;;  %s4732_s7 = inlined_call_operand.hbm [shape: f32[2,8], index: 7, kind: output, shape index: {}]  }
   0x1   :  { %v3054_v0 = vld [vmem:[%s4726_s1 + $0x4] ss:$16 sps:$4 sm:$0xff]   ;;  %v3058_v2 = vld [vmem:[%s4726_s1] ss:$16 sps:$4 sm:$0xff]   ;;  %v34_v37 = vunpack.c.l.s4 %v3576_v36 }
   0x2   :  { %v3056_v1 = vld [vmem:[%s4726_s1 + $0x204] ss:$16 sps:$4 sm:$0xff]   ;;  %1640 = vmatprep.subr.bf16.mxu1 %v3054_v0  ;;  %v3059_v3 = vld [vmem:[%s4726_s1 + $0x200] ss:$16 sps:$4 sm:$0xff]   ;;  %v3735_v43 = vshrl.u32 %v36_v38, 7 }
   0x3   :  { %1681 = vmatprep.subr.bf16.mxu0 %v3056_v1  ;;  %v3060_v4 = vld [vmem:[%s4726_s1 + $0x24] ss:$16 sps:$4 sm:$0xff]   ;;  %1641 = vmatpush1.bf16.msra.mxu1 %v3058_v2  ;;  %v3064_v6 = vld [vmem:[%s4726_s1 + $0x20] ss:$16 sps:$4 sm:$0xff]   ;;  %v35_v42 = vunpack.c.0.s8 %v34_v37  ;;  %v3186_v37 = vld [vmem:[%s4726_s1 + $0xac] ss:$16 sps:$4 sm:$0xff]  }
   0x4   :  { %1682 = vmatpush1.bf16.msra.mxu0 %v3059_v3  ;;  %v3062_v5 = vld [vmem:[%s4726_s1 + $0x224] ss:$16 sps:$4 sm:$0xff]   ;;  %1642 = vmatprep.subr.bf16.mxu1 %v3060_v4  ;;  %v3065_v7 = vld [vmem:[%s4726_s1 + $0x220] ss:$16 sps:$4 sm:$0xff]  }
   0x5   :  { %1683 = vmatprep.subr.bf16.mxu0 %v3062_v5  ;;  %v3066_v8 = vld [vmem:[%s4726_s1 + $0x44] ss:$16 sps:$4 sm:$0xff]   ;;  %v3070_v10 = vld [vmem:[%s4726_s1 + $0x40] ss:$16 sps:$4 sm:$0xff]   ;;  %v3753_v49 = vsub.s32 %v35_v42, %v3735_v43  ;;  %v3910_v42 = vld [vmem:[%s4725_s0 + $0x8] sm:$0xff] }
   0x6   :  { %v3068_v9 = vld [vmem:[%s4726_s1 + $0x244] ss:$16 sps:$4 sm:$0xff]   ;;  %v3071_v11 = vld [vmem:[%s4726_s1 + $0x240] ss:$16 sps:$4 sm:$0xff]  }
   0x7   :  { %1643 = vmatpush1.bf16.msra.mxu1 %v3064_v6  ;;  %v3072_v12 = vld [vmem:[%s4726_s1 + $0x64] ss:$16 sps:$4 sm:$0xff]   ;;  %v3076_v14 = vld [vmem:[%s4726_s1 + $0x60] ss:$16 sps:$4 sm:$0xff]  }
   0x8   :  { %1684 = vmatpush1.bf16.msra.mxu0 %v3065_v7  ;;  %1644 = vmatprep.subr.bf16.mxu1 %v3066_v8  ;;  %v3074_v13 = vld [vmem:[%s4726_s1 + $0x264] ss:$16 sps:$4 sm:$0xff]   ;;  %v3077_v15 = vld [vmem:[%s4726_s1 + $0x260] ss:$16 sps:$4 sm:$0xff]  }
   0x9   :  { %1685 = vmatprep.subr.bf16.mxu0 %v3068_v9  ;;  %v3078_v16 = vld [vmem:[%s4726_s1 + $0x84] ss:$16 sps:$4 sm:$0xff]   ;;  %v3082_v18 = vld [vmem:[%s4726_s1 + $0x80] ss:$16 sps:$4 sm:$0xff]  }
   0xa   :  { %v3080_v17 = vld [vmem:[%s4726_s1 + $0x284] ss:$16 sps:$4 sm:$0xff]   ;;  %v3083_v19 = vld [vmem:[%s4726_s1 + $0x280] ss:$16 sps:$4 sm:$0xff]  }
   0xb   :  { %1645 = vmatpush1.bf16.msra.mxu1 %v3070_v10  ;;  %v3084_v20 = vld [vmem:[%s4726_s1 + $0xa4] ss:$16 sps:$4 sm:$0xff]   ;;  %v3088_v22 = vld [vmem:[%s4726_s1 + $0xa0] ss:$16 sps:$4 sm:$0xff]  }
   0xc   :  { %1686 = vmatpush1.bf16.msra.mxu0 %v3071_v11  ;;  %1646 = vmatprep.subr.bf16.mxu1 %v3072_v12  ;;  %v3086_v21 = vld [vmem:[%s4726_s1 + $0x2a4] ss:$16 sps:$4 sm:$0xff]   ;;  %v3089_v23 = vld [vmem:[%s4726_s1 + $0x2a0] ss:$16 sps:$4 sm:$0xff]  }
   0xd   :  { %1687 = vmatprep.subr.bf16.mxu0 %v3074_v13  ;;  %v3090_v24 = vld [vmem:[%s4726_s1 + $0xc4] ss:$16 sps:$4 sm:$0xff]   ;;  %v3094_v26 = vld [vmem:[%s4726_s1 + $0xc0] ss:$16 sps:$4 sm:$0xff]  }
   0xe   :  { %v3092_v25 = vld [vmem:[%s4726_s1 + $0x2c4] ss:$16 sps:$4 sm:$0xff]   ;;  %v3095_v27 = vld [vmem:[%s4726_s1 + $0x2c0] ss:$16 sps:$4 sm:$0xff]  }
   0xf   :  { %1647 = vmatpush1.bf16.msra.mxu1 %v3076_v14  ;;  %v3096_v28 = vld [vmem:[%s4726_s1 + $0xe4] ss:$16 sps:$4 sm:$0xff]   ;;  %v3100_v30 = vld [vmem:[%s4726_s1 + $0xe0] ss:$16 sps:$4 sm:$0xff]  }
  0x10   :  { %1688 = vmatpush1.bf16.msra.mxu0 %v3077_v15  ;;  %1648 = vmatprep.subr.bf16.mxu1 %v3078_v16  ;;  %v3098_v29 = vld [vmem:[%s4726_s1 + $0x2e4] ss:$16 sps:$4 sm:$0xff]   ;;  %v3101_v31 = vld [vmem:[%s4726_s1 + $0x2e0] ss:$16 sps:$4 sm:$0xff]   ;;  %v3156_v15 = vld [vmem:[%s4726_s1 + $0xc] ss:$16 sps:$4 sm:$0xff]  }
  0x11   :  { %1689 = vmatprep.subr.bf16.mxu0 %v3080_v17  ;;  %v3102_v32 = vld [vmem:[%s4726_s1 + $0x104] ss:$16 sps:$4 sm:$0xff]   ;;  %v3106_v34 = vld [vmem:[%s4726_s1 + $0x100] ss:$16 sps:$4 sm:$0xff]  }
  0x12   :  { %v3104_v33 = vld [vmem:[%s4726_s1 + $0x304] ss:$16 sps:$4 sm:$0xff]   ;;  %v3107_v35 = vld [vmem:[%s4726_s1 + $0x300] ss:$16 sps:$4 sm:$0xff]  }
  0x13   :  { %1649 = vmatpush1.bf16.msra.mxu1 %v3082_v18  ;;  %v3108_v39 = vld [vmem:[%s4726_s1 + $0x124] ss:$16 sps:$4 sm:$0xff]   ;;  %v3112_v41 = vld [vmem:[%s4726_s1 + $0x120] ss:$16 sps:$4 sm:$0xff]  }
  0x14   :  { %1690 = vmatpush1.bf16.msra.mxu0 %v3083_v19  ;;  %1650 = vmatprep.subr.bf16.mxu1 %v3084_v20  ;;  %v3110_v40 = vld [vmem:[%s4726_s1 + $0x324] ss:$16 sps:$4 sm:$0xff]   ;;  %v3113_v44 = vld [vmem:[%s4726_s1 + $0x320] ss:$16 sps:$4 sm:$0xff]   ;;  %v3154_v19 = vld [vmem:[%s4726_s1 + $0x8] ss:$16 sps:$4 sm:$0xff]  }
  0x15   :  { %1691 = vmatprep.subr.bf16.mxu0 %v3086_v21  ;;  %v3114_v45 = vld [vmem:[%s4726_s1 + $0x144] ss:$16 sps:$4 sm:$0xff]   ;;  %v3118_v47 = vld [vmem:[%s4726_s1 + $0x140] ss:$16 sps:$4 sm:$0xff]   ;;  %v3162_v21 = vld [vmem:[%s4726_s1 + $0x2c] ss:$16 sps:$4 sm:$0xff]  }
  0x16   :  { %v3116_v46 = vld [vmem:[%s4726_s1 + $0x344] ss:$16 sps:$4 sm:$0xff]   ;;  %v3119_v48 = vld [vmem:[%s4726_s1 + $0x340] ss:$16 sps:$4 sm:$0xff]  }
  0x17   :  { %1651 = vmatpush1.bf16.msra.mxu1 %v3088_v22  ;;  %v3120_v50 = vld [vmem:[%s4726_s1 + $0x164] ss:$16 sps:$4 sm:$0xff]   ;;  %v3124_v53 = vld [vmem:[%s4726_s1 + $0x160] ss:$16 sps:$4 sm:$0xff]  }
  0x18   :  { %1692 = vmatpush1.bf16.msra.mxu0 %v3089_v23  ;;  %1652 = vmatprep.subr.bf16.mxu1 %v3090_v24  ;;  %v3122_v51 = vld [vmem:[%s4726_s1 + $0x364] ss:$16 sps:$4 sm:$0xff]   ;;  %v3125_v56 = vld [vmem:[%s4726_s1 + $0x360] ss:$16 sps:$4 sm:$0xff]   ;;  %v3160_v23 = vld [vmem:[%s4726_s1 + $0x28] ss:$16 sps:$4 sm:$0xff]  }
  0x19   :  { %1693 = vmatprep.subr.bf16.mxu0 %v3092_v25  ;;  %v28_v52 = vld [vmem:[%s4725_s0] sm:$0xff]  ;;  %v3168_v25 = vld [vmem:[%s4726_s1 + $0x4c] ss:$16 sps:$4 sm:$0xff]  }
  0x1a   :  { %v39_v54 = vrot.slane %v28_v52, %v3753_v49  ;;  %v32_v55 = vcombine.high %v28_v52, %v28_v52  ;;  %v3126_v57 = vld [vmem:[%s4726_s1 + $0x184] ss:$16 sps:$4 sm:$0xff]   ;;  %v3130_v61 = vld [vmem:[%s4726_s1 + $0x180] ss:$16 sps:$4 sm:$0xff]  }
  0x1b   :  { %1653 = vmatpush1.bf16.msra.mxu1 %v3094_v26  ;;  %v3128_v58 = vld [vmem:[%s4726_s1 + $0x384] ss:$16 sps:$4 sm:$0xff]   ;;  %v3131_v0 = vld [vmem:[%s4726_s1 + $0x380] ss:$16 sps:$4 sm:$0xff]  }
  0x1c   :  { %1694 = vmatpush1.bf16.msra.mxu0 %v3095_v27  ;;  %1654 = vmatprep.subr.bf16.mxu1 %v3096_v28  ;;  %v47_v59 = vcombine.high %v39_v54, %v39_v54  ;;  %v46_v60 = vrot.slane %v32_v55, %v3753_v49  ;;  %v3132_v1 = vld [vmem:[%s4726_s1 + $0x1a4] ss:$16 sps:$4 sm:$0xff]   ;;  %v3136_v4 = vld [vmem:[%s4726_s1 + $0x1a0] ss:$16 sps:$4 sm:$0xff]   ;;  %v3829_v16 = vpack.c.bf16 %v39_v54, %v39_v54  ;;  %v3166_v27 = vld [vmem:[%s4726_s1 + $0x48] ss:$16 sps:$4 sm:$0xff]  }
  0x1d   :  { %1695 = vmatprep.subr.bf16.mxu0 %v3098_v29  ;;  %v3134_v2 = vld [vmem:[%s4726_s1 + $0x3a4] ss:$16 sps:$4 sm:$0xff]   ;;  %v3137_v5 = vld [vmem:[%s4726_s1 + $0x3a0] ss:$16 sps:$4 sm:$0xff]   ;;  %v3174_v29 = vld [vmem:[%s4726_s1 + $0x6c] ss:$16 sps:$4 sm:$0xff]  }
  0x1e   :  { %v75_v62 = vpack.c.bf16 %v47_v59, %v47_v59  ;;  %v48_v63 = vcombine.high %v46_v60, %v46_v60  ;;  %v3138_v6 = vld [vmem:[%s4726_s1 + $0x1c4] ss:$16 sps:$4 sm:$0xff]   ;;  %v3142_v8 = vld [vmem:[%s4726_s1 + $0x1c0] ss:$16 sps:$4 sm:$0xff]   ;;  %v3834_v18 = vpack.c.bf16 %v46_v60, %v46_v60  ;;  %v3204_v55 = vld [vmem:[%s4726_s1 + $0x10c] ss:$16 sps:$4 sm:$0xff]  }
  0x1f   :  { %1655 = vmatpush1.bf16.msra.mxu1 %v3100_v30  ;;  %v3140_v7 = vld [vmem:[%s4726_s1 + $0x3c4] ss:$16 sps:$4 sm:$0xff]   ;;  %v3143_v9 = vld [vmem:[%s4726_s1 + $0x3c0] ss:$16 sps:$4 sm:$0xff]   ;;  %v3210_v59 = vld [vmem:[%s4726_s1 + $0x12c] ss:$16 sps:$4 sm:$0xff]  }
  0x20   :  { %1696 = vmatpush1.bf16.msra.mxu0 %v3101_v31  ;;  %1656 = vmatprep.subr.bf16.mxu1 %v3102_v32  ;;  %v3790_v3 = vpack.c.bf16 %v48_v63, %v48_v63  ;;  %v3144_v10 = vld [vmem:[%s4726_s1 + $0x1e4] ss:$16 sps:$4 sm:$0xff]   ;;  %v3148_v12 = vld [vmem:[%s4726_s1 + $0x1e0] ss:$16 sps:$4 sm:$0xff]   ;;  %v3172_v31 = vld [vmem:[%s4726_s1 + $0x68] ss:$16 sps:$4 sm:$0xff]  }
  0x21   :  { %1697 = vmatprep.subr.bf16.mxu0 %v3104_v33  ;;  %1672 = vmatprep.mubr.bf16.mxu1 %v75_v62  ;;  %v3146_v11 = vld [vmem:[%s4726_s1 + $0x3e4] ss:$16 sps:$4 sm:$0xff]   ;;  %v3149_v13 = vld [vmem:[%s4726_s1 + $0x3e0] ss:$16 sps:$4 sm:$0xff]   ;;  %v3180_v33 = vld [vmem:[%s4726_s1 + $0x8c] ss:$16 sps:$4 sm:$0xff]  }
  0x22   :  { %1713 = vmatprep.mubr.bf16.mxu0 %v3790_v3  ;;  %v3153_v14 = vld [vmem:[%s4726_s1 + $0x404] ss:$16 sps:$4 sm:$0xff]   ;;  %v3151_v17 = vld [vmem:[%s4726_s1 + $0x400] ss:$16 sps:$4 sm:$0xff]   ;;  %v3216_v63 = vld [vmem:[%s4726_s1 + $0x14c] ss:$16 sps:$4 sm:$0xff]  }
  0x23   :  { %1657 = vmatpush1.bf16.msra.mxu1 %v3106_v34  ;;  %v3159_v20 = vld [vmem:[%s4726_s1 + $0x424] ss:$16 sps:$4 sm:$0xff]   ;;  %v3157_v22 = vld [vmem:[%s4726_s1 + $0x420] ss:$16 sps:$4 sm:$0xff]  }
  0x24   :  { %1698 = vmatpush1.bf16.msra.mxu0 %v3107_v35  ;;  %1658 = vmatprep.subr.bf16.mxu1 %v3108_v39  ;;  %v3165_v24 = vld [vmem:[%s4726_s1 + $0x444] ss:$16 sps:$4 sm:$0xff]   ;;  %v3163_v26 = vld [vmem:[%s4726_s1 + $0x440] ss:$16 sps:$4 sm:$0xff]   ;;  %v3178_v35 = vld [vmem:[%s4726_s1 + $0x88] ss:$16 sps:$4 sm:$0xff]  }
  0x25   :  { %1699 = vmatprep.subr.bf16.mxu0 %v3110_v40  ;;  %v3171_v28 = vld [vmem:[%s4726_s1 + $0x464] ss:$16 sps:$4 sm:$0xff]   ;;  %v3169_v30 = vld [vmem:[%s4726_s1 + $0x460] ss:$16 sps:$4 sm:$0xff]   ;;  %v3184_v39 = vld [vmem:[%s4726_s1 + $0xa8] ss:$16 sps:$4 sm:$0xff]  }
  0x26   :  { %v3177_v32 = vld [vmem:[%s4726_s1 + $0x484] ss:$16 sps:$4 sm:$0xff]   ;;  %v3175_v34 = vld [vmem:[%s4726_s1 + $0x480] ss:$16 sps:$4 sm:$0xff]  }
  0x27   :  { %1659 = vmatpush1.bf16.msra.mxu1 %v3112_v41  ;;  %v3183_v36 = vld [vmem:[%s4726_s1 + $0x4a4] ss:$16 sps:$4 sm:$0xff]   ;;  %v3181_v38 = vld [vmem:[%s4726_s1 + $0x4a0] ss:$16 sps:$4 sm:$0xff]   ;;  %v3192_v41 = vld [vmem:[%s4726_s1 + $0xcc] ss:$16 sps:$4 sm:$0xff]  }
  0x28   :  { %1700 = vmatpush1.bf16.msra.mxu0 %v3113_v44  ;;  %1660 = vmatprep.subr.bf16.mxu1 %v3114_v45  ;;  %v3189_v40 = vld [vmem:[%s4726_s1 + $0x4c4] ss:$16 sps:$4 sm:$0xff]   ;;  %v3914_v44 = vrot.slane %v3910_v42, %v3753_v49  ;;  %v3187_v45 = vld [vmem:[%s4726_s1 + $0x4c0] ss:$16 sps:$4 sm:$0xff]  }
  0x29   :  { %1701 = vmatprep.subr.bf16.mxu0 %v3116_v46  ;;  %v3190_v46 = vld [vmem:[%s4726_s1 + $0xc8] ss:$16 sps:$4 sm:$0xff]   ;;  %v3193_v52 = vld [vmem:[%s4726_s1 + $0x4e0] ss:$16 sps:$4 sm:$0xff]   ;;  %v3201_v54 = vld [vmem:[%s4726_s1 + $0x504] ss:$16 sps:$4 sm:$0xff]  }
  0x2a   :  { %v3205_v60 = vld [vmem:[%s4726_s1 + $0x520] ss:$16 sps:$4 sm:$0xff]  }
  0x2b   :  { %1661 = vmatpush1.bf16.msra.mxu1 %v3118_v47  ;;  %v64_v47 = vcombine.high %v3914_v44, %v3914_v44 }
  0x2c   :  { %1702 = vmatpush1.bf16.msra.mxu0 %v3119_v48  ;;  %1662 = vmatprep.subr.bf16.mxu1 %v3120_v50  ;;  %v3195_v48 = vld [vmem:[%s4726_s1 + $0x4e4] ss:$16 sps:$4 sm:$0xff]   ;;  %v3198_v50 = vld [vmem:[%s4726_s1 + $0xec] ss:$16 sps:$4 sm:$0xff]  }
  0x2d   :  { %1703 = vmatprep.subr.bf16.mxu0 %v3122_v51  ;;  %v3930_v51 = vpack.c.bf16 %v64_v47, %v64_v47  ;;  %v3274_v47 = vld [vmem:[%s4726_s1 + $0x288] ss:$16 sps:$4 sm:$0xff]  }
  0x2f   :  { %1663 = vmatpush1.bf16.msra.mxu1 %v3124_v53  ;;  %v3196_v53 = vld [vmem:[%s4726_s1 + $0xe8] ss:$16 sps:$4 sm:$0xff]  }
  0x30   :  { %1704 = vmatpush1.bf16.msra.mxu0 %v3125_v56  ;;  %1664 = vmatprep.subr.bf16.mxu1 %v3126_v57  ;;  %v3199_v56 = vld [vmem:[%s4726_s1 + $0x500] ss:$16 sps:$4 sm:$0xff]   ;;  %v3202_v57 = vld [vmem:[%s4726_s1 + $0x108] ss:$16 sps:$4 sm:$0xff]  }
  0x31   :  { %1705 = vmatprep.subr.bf16.mxu0 %v3128_v58  ;;  %v3207_v58 = vld [vmem:[%s4726_s1 + $0x524] ss:$16 sps:$4 sm:$0xff]  }
  0x33   :  { %1665 = vmatpush1.bf16.msra.mxu1 %v3130_v61  ;;  %v3208_v61 = vld [vmem:[%s4726_s1 + $0x128] ss:$16 sps:$4 sm:$0xff]  }
  0x34   :  { %1706 = vmatpush1.bf16.msra.mxu0 %v3131_v0  ;;  %1666 = vmatprep.subr.bf16.mxu1 %v3132_v1  ;;  %v3211_v0 = vld [vmem:[%s4726_s1 + $0x540] ss:$16 sps:$4 sm:$0xff]   ;;  %v3214_v1 = vld [vmem:[%s4726_s1 + $0x148] ss:$16 sps:$4 sm:$0xff]  }
  0x35   :  { %1707 = vmatprep.subr.bf16.mxu0 %v3134_v2  ;;  %v3219_v2 = vld [vmem:[%s4726_s1 + $0x564] ss:$16 sps:$4 sm:$0xff]  }
  0x37   :  { %1667 = vmatpush1.bf16.msra.mxu1 %v3136_v4  ;;  %v3222_v4 = vld [vmem:[%s4726_s1 + $0x16c] ss:$16 sps:$4 sm:$0xff]  }
  0x38   :  { %1708 = vmatpush1.bf16.msra.mxu0 %v3137_v5  ;;  %1668 = vmatprep.subr.bf16.mxu1 %v3138_v6  ;;  %v3217_v5 = vld [vmem:[%s4726_s1 + $0x560] ss:$16 sps:$4 sm:$0xff]   ;;  %v3220_v6 = vld [vmem:[%s4726_s1 + $0x168] ss:$16 sps:$4 sm:$0xff]  }
  0x39   :  { %1709 = vmatprep.subr.bf16.mxu0 %v3140_v7  ;;  %v3225_v7 = vld [vmem:[%s4726_s1 + $0x584] ss:$16 sps:$4 sm:$0xff]  }
  0x3b   :  { %1669 = vmatpush1.bf16.msra.mxu1 %v3142_v8  ;;  %v3228_v8 = vld [vmem:[%s4726_s1 + $0x18c] ss:$16 sps:$4 sm:$0xff]  }
  0x3c   :  { %1710 = vmatpush1.bf16.msra.mxu0 %v3143_v9  ;;  %1670 = vmatprep.subr.bf16.mxu1 %v3144_v10  ;;  %v3223_v9 = vld [vmem:[%s4726_s1 + $0x580] ss:$16 sps:$4 sm:$0xff]   ;;  %v3226_v10 = vld [vmem:[%s4726_s1 + $0x188] ss:$16 sps:$4 sm:$0xff]  }
  0x3d   :  { %1711 = vmatprep.subr.bf16.mxu0 %v3146_v11  ;;  %v3231_v11 = vld [vmem:[%s4726_s1 + $0x5a4] ss:$16 sps:$4 sm:$0xff]  }
  0x3f   :  { %1671 = vmatpush1.bf16.msra.mxu1 %v3148_v12  ;;  %v3234_v12 = vld [vmem:[%s4726_s1 + $0x1ac] ss:$16 sps:$4 sm:$0xff]  }
  0x40   :  { %1712 = vmatpush1.bf16.msra.mxu0 %v3149_v13  ;;  %1804 = vmatprep.subr.bf16.mxu1 %v3156_v15  ;;  %v3229_v13 = vld [vmem:[%s4726_s1 + $0x5a0] ss:$16 sps:$4 sm:$0xff]   ;;  %v3237_v15 = vld [vmem:[%s4726_s1 + $0x5c4] ss:$16 sps:$4 sm:$0xff]  }
  0x41   :  { %1722 = vmatprep.subr.bf16.mxu0 %v3153_v14  ;;  %v3232_v14 = vld [vmem:[%s4726_s1 + $0x1a8] ss:$16 sps:$4 sm:$0xff]  }
  0x42   :  { %1673 = vmatmul.mubr.bf16.vlgmr.msra.gmra.mrb[0].mxu1 %v3829_v16 }
  0x43   :  { %1714 = vmatmul.mubr.bf16.vlgmr.msra.gmra.mrb[0].mxu0 %v3834_v18  ;;  %1805 = vmatpush1.bf16.msra.mxu1 %v3154_v19  ;;  %v49_v19 = vcombine.high %v3910_v42, %v3910_v42  ;;  %v3268_v42 = vld [vmem:[%s4726_s1 + $0x268] ss:$16 sps:$4 sm:$0xff]  }
  0x44   :  { %1723 = vmatpush1.bf16.msra.mxu0 %v3151_v17  ;;  %1806 = vmatprep.subr.bf16.mxu1 %v3162_v21  ;;  %v3240_v17 = vld [vmem:[%s4726_s1 + $0x1cc] ss:$16 sps:$4 sm:$0xff]   ;;  %v3238_v21 = vld [vmem:[%s4726_s1 + $0x1c8] ss:$16 sps:$4 sm:$0xff]  }
  0x45   :  { %1724 = vmatprep.subr.bf16.mxu0 %v3159_v20  ;;  %1836 = vmatprep.mubr.bf16.mxu1 %v75_v62  ;;  %v3213_v62 = vld [vmem:[%s4726_s1 + $0x544] ss:$16 sps:$4 sm:$0xff]   ;;  %v3235_v20 = vld [vmem:[%s4726_s1 + $0x5c0] ss:$16 sps:$4 sm:$0xff]  }
  0x46   :  { %1754 = vmatprep.mubr.bf16.mxu0 %v3930_v51 }
  0x47   :  { %1807 = vmatpush1.bf16.msra.mxu1 %v3160_v23  ;;  %v3246_v23 = vld [vmem:[%s4726_s1 + $0x1ec] ss:$16 sps:$4 sm:$0xff]  }
  0x48   :  { %1725 = vmatpush1.bf16.msra.mxu0 %v3157_v22  ;;  %1808 = vmatprep.subr.bf16.mxu1 %v3168_v25  ;;  %v3243_v22 = vld [vmem:[%s4726_s1 + $0x5e4] ss:$16 sps:$4 sm:$0xff]   ;;  %v3241_v25 = vld [vmem:[%s4726_s1 + $0x5e0] ss:$16 sps:$4 sm:$0xff]  }
  0x49   :  { %1726 = vmatprep.subr.bf16.mxu0 %v3165_v24  ;;  %v4032_v24 = vrot.slane %v49_v19, %v3753_v49  ;;  %v3252_v49 = vld [vmem:[%s4726_s1 + $0x20c] ss:$16 sps:$4 sm:$0xff]   ;;  %v3319_v19 = vld [vmem:[%s4726_s1 + $0x780] ss:$16 sps:$4 sm:$0xff]  }
  0x4b   :  { %1809 = vmatpush1.bf16.msra.mxu1 %v3166_v27  ;;  %v3249_v27 = vld [vmem:[%s4726_s1 + $0x604] ss:$16 sps:$4 sm:$0xff]  }
  0x4c   :  { %1727 = vmatpush1.bf16.msra.mxu0 %v3163_v26  ;;  %1810 = vmatprep.subr.bf16.mxu1 %v3174_v29  ;;  %v3244_v26 = vld [vmem:[%s4726_s1 + $0x1e8] ss:$16 sps:$4 sm:$0xff]   ;;  %v4050_v29 = vpack.c.bf16 %v3914_v44, %v3914_v44  ;;  %v3273_v44 = vld [vmem:[%s4726_s1 + $0x684] ss:$16 sps:$4 sm:$0xff]  }
  0x4d   :  { %1728 = vmatprep.subr.bf16.mxu0 %v3171_v28  ;;  %v65_v28 = vcombine.high %v4032_v24, %v4032_v24 }
  0x4f   :  { %1811 = vmatpush1.bf16.msra.mxu1 %v3172_v31  ;;  %v3250_v31 = vld [vmem:[%s4726_s1 + $0x208] ss:$16 sps:$4 sm:$0xff]  }
  0x50   :  { %1729 = vmatpush1.bf16.msra.mxu0 %v3169_v30  ;;  %1812 = vmatprep.subr.bf16.mxu1 %v3180_v33  ;;  %v3247_v30 = vld [vmem:[%s4726_s1 + $0x600] ss:$16 sps:$4 sm:$0xff]   ;;  %v3258_v33 = vld [vmem:[%s4726_s1 + $0x22c] ss:$16 sps:$4 sm:$0xff]  }
  0x51   :  { %1730 = vmatprep.subr.bf16.mxu0 %v3177_v32  ;;  %v3255_v32 = vld [vmem:[%s4726_s1 + $0x624] ss:$16 sps:$4 sm:$0xff]  }
  0x53   :  { %1813 = vmatpush1.bf16.msra.mxu1 %v3178_v35  ;;  %v3253_v35 = vld [vmem:[%s4726_s1 + $0x620] ss:$16 sps:$4 sm:$0xff]  }
  0x54   :  { %1731 = vmatpush1.bf16.msra.mxu0 %v3175_v34  ;;  %1814 = vmatprep.subr.bf16.mxu1 %v3186_v37  ;;  %v4064_v34 = vpack.c.bf16 %v65_v28, %v65_v28  ;;  %v3261_v37 = vld [vmem:[%s4726_s1 + $0x644] ss:$16 sps:$4 sm:$0xff]   ;;  %v3334_v28 = vld [vmem:[%s4726_s1 + $0x3c8] ss:$16 sps:$4 sm:$0xff]  }
  0x55   :  { %1732 = vmatprep.subr.bf16.mxu0 %v3183_v36  ;;  %v3256_v36 = vld [vmem:[%s4726_s1 + $0x228] ss:$16 sps:$4 sm:$0xff]  }
  0x57   :  { %1815 = vmatpush1.bf16.msra.mxu1 %v3184_v39  ;;  %v3262_v39 = vld [vmem:[%s4726_s1 + $0x248] ss:$16 sps:$4 sm:$0xff]  }
  0x58   :  { %1733 = vmatpush1.bf16.msra.mxu0 %v3181_v38  ;;  %1816 = vmatprep.subr.bf16.mxu1 %v3192_v41  ;;  %v3259_v38 = vld [vmem:[%s4726_s1 + $0x640] ss:$16 sps:$4 sm:$0xff]  }
  0x59   :  { %1734 = vmatprep.subr.bf16.mxu0 %v3189_v40  ;;  %v3267_v40 = vld [vmem:[%s4726_s1 + $0x664] ss:$16 sps:$4 sm:$0xff]   ;;  %v3265_v41 = vld [vmem:[%s4726_s1 + $0x660] ss:$16 sps:$4 sm:$0xff]  }
  0x5b   :  { %1817 = vmatpush1.bf16.msra.mxu1 %v3190_v46  ;;  %v3271_v46 = vld [vmem:[%s4726_s1 + $0x680] ss:$16 sps:$4 sm:$0xff]  }
  0x5c   :  { %1735 = vmatpush1.bf16.msra.mxu0 %v3187_v45  ;;  %1818 = vmatprep.subr.bf16.mxu1 %v3198_v50  ;;  %v3276_v45 = vld [vmem:[%s4726_s1 + $0x28c] ss:$16 sps:$4 sm:$0xff]  }
  0x5d   :  { %1736 = vmatprep.subr.bf16.mxu0 %v3195_v48  ;;  %v3279_v48 = vld [vmem:[%s4726_s1 + $0x6a4] ss:$16 sps:$4 sm:$0xff]   ;;  %v3282_v50 = vld [vmem:[%s4726_s1 + $0x2ac] ss:$16 sps:$4 sm:$0xff]  }
  0x5f   :  { %1819 = vmatpush1.bf16.msra.mxu1 %v3196_v53  ;;  %v3280_v53 = vld [vmem:[%s4726_s1 + $0x2a8] ss:$16 sps:$4 sm:$0xff]  }
  0x60   :  { %1737 = vmatpush1.bf16.msra.mxu0 %v3193_v52  ;;  %1820 = vmatprep.subr.bf16.mxu1 %v3204_v55  ;;  %v3277_v52 = vld [vmem:[%s4726_s1 + $0x6a0] ss:$16 sps:$4 sm:$0xff]   ;;  %v3288_v55 = vld [vmem:[%s4726_s1 + $0x2cc] ss:$16 sps:$4 sm:$0xff]  }
  0x61   :  { %1738 = vmatprep.subr.bf16.mxu0 %v3201_v54  ;;  %v3285_v54 = vld [vmem:[%s4726_s1 + $0x6c4] ss:$16 sps:$4 sm:$0xff]  }
  0x63   :  { %1821 = vmatpush1.bf16.msra.mxu1 %v3202_v57  ;;  %v3286_v57 = vld [vmem:[%s4726_s1 + $0x2c8] ss:$16 sps:$4 sm:$0xff]  }
  0x64   :  { %1739 = vmatpush1.bf16.msra.mxu0 %v3199_v56  ;;  %1822 = vmatprep.subr.bf16.mxu1 %v3210_v59  ;;  %v3283_v56 = vld [vmem:[%s4726_s1 + $0x6c0] ss:$16 sps:$4 sm:$0xff]   ;;  %v3294_v59 = vld [vmem:[%s4726_s1 + $0x2ec] ss:$16 sps:$4 sm:$0xff]  }
  0x65   :  { %1740 = vmatprep.subr.bf16.mxu0 %v3207_v58  ;;  %v3291_v58 = vld [vmem:[%s4726_s1 + $0x6e4] ss:$16 sps:$4 sm:$0xff]  }
  0x67   :  { %1823 = vmatpush1.bf16.msra.mxu1 %v3208_v61  ;;  %v3292_v61 = vld [vmem:[%s4726_s1 + $0x2e8] ss:$16 sps:$4 sm:$0xff]  }
  0x68   :  { %1741 = vmatpush1.bf16.msra.mxu0 %v3205_v60  ;;  %1824 = vmatprep.subr.bf16.mxu1 %v3216_v63  ;;  %v3289_v60 = vld [vmem:[%s4726_s1 + $0x6e0] ss:$16 sps:$4 sm:$0xff]   ;;  %v3300_v63 = vld [vmem:[%s4726_s1 + $0x30c] ss:$16 sps:$4 sm:$0xff]  }
  0x69   :  { %1742 = vmatprep.subr.bf16.mxu0 %v3213_v62  ;;  %v3297_v62 = vld [vmem:[%s4726_s1 + $0x704] ss:$16 sps:$4 sm:$0xff]  }
  0x6b   :  { %1825 = vmatpush1.bf16.msra.mxu1 %v3214_v1  ;;  %v3298_v1 = vld [vmem:[%s4726_s1 + $0x308] ss:$16 sps:$4 sm:$0xff]  }
  0x6c   :  { %1743 = vmatpush1.bf16.msra.mxu0 %v3211_v0  ;;  %1826 = vmatprep.subr.bf16.mxu1 %v3222_v4  ;;  %v3295_v0 = vld [vmem:[%s4726_s1 + $0x700] ss:$16 sps:$4 sm:$0xff]   ;;  %v3306_v4 = vld [vmem:[%s4726_s1 + $0x32c] ss:$16 sps:$4 sm:$0xff]  }
  0x6d   :  { %1744 = vmatprep.subr.bf16.mxu0 %v3219_v2  ;;  %v3303_v2 = vld [vmem:[%s4726_s1 + $0x724] ss:$16 sps:$4 sm:$0xff]  }
  0x6f   :  { %1827 = vmatpush1.bf16.msra.mxu1 %v3220_v6  ;;  %v3304_v6 = vld [vmem:[%s4726_s1 + $0x328] ss:$16 sps:$4 sm:$0xff]  }
  0x70   :  { %1745 = vmatpush1.bf16.msra.mxu0 %v3217_v5  ;;  %1828 = vmatprep.subr.bf16.mxu1 %v3228_v8  ;;  %v3301_v5 = vld [vmem:[%s4726_s1 + $0x720] ss:$16 sps:$4 sm:$0xff]   ;;  %v3312_v8 = vld [vmem:[%s4726_s1 + $0x34c] ss:$16 sps:$4 sm:$0xff]  }
  0x71   :  { %1746 = vmatprep.subr.bf16.mxu0 %v3225_v7  ;;  %v3309_v7 = vld [vmem:[%s4726_s1 + $0x744] ss:$16 sps:$4 sm:$0xff]  }
  0x73   :  { %1829 = vmatpush1.bf16.msra.mxu1 %v3226_v10  ;;  %v3310_v10 = vld [vmem:[%s4726_s1 + $0x348] ss:$16 sps:$4 sm:$0xff]  }
  0x74   :  { %1747 = vmatpush1.bf16.msra.mxu0 %v3223_v9  ;;  %1830 = vmatprep.subr.bf16.mxu1 %v3234_v12  ;;  %v3307_v9 = vld [vmem:[%s4726_s1 + $0x740] ss:$16 sps:$4 sm:$0xff]   ;;  %v3318_v12 = vld [vmem:[%s4726_s1 + $0x36c] ss:$16 sps:$4 sm:$0xff]  }
  0x75   :  { %1748 = vmatprep.subr.bf16.mxu0 %v3231_v11  ;;  %v3315_v11 = vld [vmem:[%s4726_s1 + $0x764] ss:$16 sps:$4 sm:$0xff]  }
  0x77   :  { %1831 = vmatpush1.bf16.msra.mxu1 %v3232_v14  ;;  %v3316_v14 = vld [vmem:[%s4726_s1 + $0x368] ss:$16 sps:$4 sm:$0xff]  }
  0x78   :  { %1749 = vmatpush1.bf16.msra.mxu0 %v3229_v13  ;;  %1832 = vmatprep.subr.bf16.mxu1 %v3240_v17  ;;  %v3313_v13 = vld [vmem:[%s4726_s1 + $0x760] ss:$16 sps:$4 sm:$0xff]   ;;  %v3324_v17 = vld [vmem:[%s4726_s1 + $0x38c] ss:$16 sps:$4 sm:$0xff]  }
  0x79   :  { %1750 = vmatprep.subr.bf16.mxu0 %v3237_v15  ;;  %v3321_v15 = vld [vmem:[%s4726_s1 + $0x784] ss:$16 sps:$4 sm:$0xff]  }
  0x7b   :  { %1833 = vmatpush1.bf16.msra.mxu1 %v3238_v21  ;;  %v3327_v21 = vld [vmem:[%s4726_s1 + $0x7a4] ss:$16 sps:$4 sm:$0xff]  }
  0x7c   :  { %1751 = vmatpush1.bf16.msra.mxu0 %v3235_v20  ;;  %1834 = vmatprep.subr.bf16.mxu1 %v3246_v23  ;;  %v3322_v20 = vld [vmem:[%s4726_s1 + $0x388] ss:$16 sps:$4 sm:$0xff]   ;;  %v3325_v23 = vld [vmem:[%s4726_s1 + $0x7a0] ss:$16 sps:$4 sm:$0xff]  }
  0x7d   :  { %1752 = vmatprep.subr.bf16.mxu0 %v3243_v22  ;;  %v3330_v22 = vld [vmem:[%s4726_s1 + $0x3ac] ss:$16 sps:$4 sm:$0xff]  }
  0x7f   :  { %1835 = vmatpush1.bf16.msra.mxu1 %v3244_v26  ;;  %v3333_v26 = vld [vmem:[%s4726_s1 + $0x7c4] ss:$16 sps:$4 sm:$0xff]  }
  0x80   :  { %1753 = vmatpush1.bf16.msra.mxu0 %v3241_v25  ;;  %1845 = vmatprep.subr.bf16.mxu1 %v3252_v49  ;;  %v3328_v25 = vld [vmem:[%s4726_s1 + $0x3a8] ss:$16 sps:$4 sm:$0xff]   ;;  %v3331_v49 = vld [vmem:[%s4726_s1 + $0x7c0] ss:$16 sps:$4 sm:$0xff]  }
  0x81   :  { %1763 = vmatprep.subr.bf16.mxu0 %v3249_v27  ;;  %v3336_v27 = vld [vmem:[%s4726_s1 + $0x3cc] ss:$16 sps:$4 sm:$0xff]  }
  0x82   :  { %1837 = vmatmul.mubr.bf16.vlgmr.msra.gmra.mrb[4].mxu1 %v3829_v16  ;;  %v3264_v16 = vld [vmem:[%s4726_s1 + $0x24c] ss:$16 sps:$4 sm:$0xff]  }
  0x83   :  { %1755 = vmatmul.mubr.bf16.vlgmr.msra.gmra.mrb[0].mxu0 %v4050_v29  ;;  %1846 = vmatpush1.bf16.msra.mxu1 %v3250_v31  ;;  %v3342_v31 = vld [vmem:[%s4726_s1 + $0x3ec] ss:$16 sps:$4 sm:$0xff]  }
  0x84   :  { %1764 = vmatpush1.bf16.msra.mxu0 %v3247_v30  ;;  %1847 = vmatprep.subr.bf16.mxu1 %v3258_v33  ;;  %v3339_v30 = vld [vmem:[%s4726_s1 + $0x7e4] ss:$16 sps:$4 sm:$0xff]   ;;  %v3340_v33 = vld [vmem:[%s4726_s1 + $0x3e8] ss:$16 sps:$4 sm:$0xff]  }
  0x85   :  { %1765 = vmatprep.subr.bf16.mxu0 %v3255_v32  ;;  %1795 = vmatprep.mubr.bf16.mxu0 %v4064_v34  ;;  %v3337_v32 = vld [vmem:[%s4726_s1 + $0x7e0] ss:$16 sps:$4 sm:$0xff]  }
  0x86   :  { %1877 = vmatprep.mubr.bf16.mxu1 %v3790_v3  ;;  %v3270_v3 = vld [vmem:[%s4726_s1 + $0x26c] ss:$16 sps:$4 sm:$0xff]  }
  0x87   :  { %1848 = vmatpush1.bf16.msra.mxu1 %v3256_v36  ;;  %v3344_v36 = vld [vmem:[%s4726_s1 + $0x408] ss:$16 sps:$4 sm:$0xff]  }
  0x88   :  { %1766 = vmatpush1.bf16.msra.mxu0 %v3253_v35  ;;  %1849 = vmatprep.subr.bf16.mxu1 %v3264_v16  ;;  %v3346_v35 = vld [vmem:[%s4726_s1 + $0x40c] ss:$16 sps:$4 sm:$0xff]  }
  0x89   :  { %1767 = vmatprep.subr.bf16.mxu0 %v3261_v37  ;;  %v4252_v37 = vpack.c.bf16 %v4032_v24, %v4032_v24  ;;  %v3349_v16 = vld [vmem:[%s4726_s1 + $0x42c] ss:$16 sps:$4 sm:$0xff]  }
  0x8a   :  { %v3442_v24 = vld [vmem:[%s4728_s3 + $0x4] ss:$8 sps:$4 sm:$0xff]  }
  0x8b   :  { %1850 = vmatpush1.bf16.msra.mxu1 %v3262_v39  ;;  %v3347_v39 = vld [vmem:[%s4726_s1 + $0x428] ss:$16 sps:$4 sm:$0xff]  }
  0x8c   :  { %1768 = vmatpush1.bf16.msra.mxu0 %v3259_v38  ;;  %1851 = vmatprep.subr.bf16.mxu1 %v3270_v3  ;;  %v3440_v38 = vld [vmem:[%s4728_s3] ss:$8 sps:$4 sm:$0xff]   ;;  %v3443_v3 = vld [vmem:[%s4728_s3 + $0x10] ss:$8 sps:$4 sm:$0xff]  }
  0x8d   :  { %1769 = vmatprep.subr.bf16.mxu0 %v3267_v40  ;;  %v3445_v40 = vld [vmem:[%s4728_s3 + $0x14] ss:$8 sps:$4 sm:$0xff]  }
  0x8f   :  { %1852 = vmatpush1.bf16.msra.mxu1 %v3268_v42  ;;  %v3355_v42 = vld [vmem:[%s4726_s1 + $0x46c] ss:$16 sps:$4 sm:$0xff]  }
  0x90   :  { %1770 = vmatpush1.bf16.msra.mxu0 %v3265_v41  ;;  %1853 = vmatprep.subr.bf16.mxu1 %v3276_v45  ;;  %v3350_v41 = vld [vmem:[%s4726_s1 + $0x448] ss:$16 sps:$4 sm:$0xff]  }
  0x91   :  { %1771 = vmatprep.subr.bf16.mxu0 %v3273_v44  ;;  %v3446_v44 = vld [vmem:[%s4728_s3 + $0x20] ss:$8 sps:$4 sm:$0xff]  }
  0x92   :  { %v3353_v45 = vld [vmem:[%s4726_s1 + $0x468] ss:$16 sps:$4 sm:$0xff]  }
  0x93   :  { %1854 = vmatpush1.bf16.msra.mxu1 %v3274_v47  ;;  %v3451_v47 = vld [vmem:[%s4728_s3 + $0x34] ss:$8 sps:$4 sm:$0xff]  }
  0x94   :  { %1772 = vmatpush1.bf16.msra.mxu0 %v3271_v46  ;;  %1855 = vmatprep.subr.bf16.mxu1 %v3282_v50  ;;  %v3358_v46 = vld [vmem:[%s4726_s1 + $0x48c] ss:$16 sps:$4 sm:$0xff]  }
  0x95   :  { %1773 = vmatprep.subr.bf16.mxu0 %v3279_v48  ;;  %v3449_v48 = vld [vmem:[%s4728_s3 + $0x30] ss:$8 sps:$4 sm:$0xff]   ;;  %v3454_v50 = vld [vmem:[%s4728_s3 + $0x44] ss:$8 sps:$4 sm:$0xff]  }
  0x97   :  { %1856 = vmatpush1.bf16.msra.mxu1 %v3280_v53  ;;  %v3361_v53 = vld [vmem:[%s4726_s1 + $0x4ac] ss:$16 sps:$4 sm:$0xff]  }
  0x98   :  { %1774 = vmatpush1.bf16.msra.mxu0 %v3277_v52  ;;  %1857 = vmatprep.subr.bf16.mxu1 %v3288_v55  ;;  %v3356_v52 = vld [vmem:[%s4726_s1 + $0x488] ss:$16 sps:$4 sm:$0xff]   ;;  %v3457_v55 = vld [vmem:[%s4728_s3 + $0x54] ss:$8 sps:$4 sm:$0xff]  }
  0x99   :  { %1775 = vmatprep.subr.bf16.mxu0 %v3285_v54  ;;  %v3452_v54 = vld [vmem:[%s4728_s3 + $0x40] ss:$8 sps:$4 sm:$0xff]  }
  0x9b   :  { %1858 = vmatpush1.bf16.msra.mxu1 %v3286_v57  ;;  %v3364_v57 = vld [vmem:[%s4726_s1 + $0x4cc] ss:$16 sps:$4 sm:$0xff]  }
  0x9c   :  { %1776 = vmatpush1.bf16.msra.mxu0 %v3283_v56  ;;  %1859 = vmatprep.subr.bf16.mxu1 %v3294_v59  ;;  %v3359_v56 = vld [vmem:[%s4726_s1 + $0x4a8] ss:$16 sps:$4 sm:$0xff]  }
  0x9d   :  { %1777 = vmatprep.subr.bf16.mxu0 %v3291_v58 }
  0x9f   :  { %1860 = vmatpush1.bf16.msra.mxu1 %v3292_v61 }
  0xa0   :  { %1778 = vmatpush1.bf16.msra.mxu0 %v3289_v60  ;;  %1861 = vmatprep.subr.bf16.mxu1 %v3300_v63 }
  0xa1   :  { %1779 = vmatprep.subr.bf16.mxu0 %v3297_v62 }
  0xa3   :  { %1862 = vmatpush1.bf16.msra.mxu1 %v3298_v1 }
  0xa4   :  { %1780 = vmatpush1.bf16.msra.mxu0 %v3295_v0  ;;  %1863 = vmatprep.subr.bf16.mxu1 %v3306_v4 }
  0xa5   :  { %1781 = vmatprep.subr.bf16.mxu0 %v3303_v2 }
  0xa7   :  { %1864 = vmatpush1.bf16.msra.mxu1 %v3304_v6 }
  0xa8   :  { %1782 = vmatpush1.bf16.msra.mxu0 %v3301_v5  ;;  %1865 = vmatprep.subr.bf16.mxu1 %v3312_v8 }
  0xa9   :  { %1783 = vmatprep.subr.bf16.mxu0 %v3309_v7 }
  0xab   :  { %1866 = vmatpush1.bf16.msra.mxu1 %v3310_v10 }
  0xac   :  { %1784 = vmatpush1.bf16.msra.mxu0 %v3307_v9  ;;  %1867 = vmatprep.subr.bf16.mxu1 %v3318_v12 }
  0xad   :  { %1785 = vmatprep.subr.bf16.mxu0 %v3315_v11 }
  0xaf   :  { %1868 = vmatpush1.bf16.msra.mxu1 %v3316_v14 }
  0xb0   :  { %1786 = vmatpush1.bf16.msra.mxu0 %v3313_v13  ;;  %1869 = vmatprep.subr.bf16.mxu1 %v3324_v17 }
  0xb1   :  { %1787 = vmatprep.subr.bf16.mxu0 %v3321_v15 }
  0xb3   :  { %1870 = vmatpush1.bf16.msra.mxu1 %v3322_v20 }
  0xb4   :  { %1788 = vmatpush1.bf16.msra.mxu0 %v3319_v19  ;;  %1871 = vmatprep.subr.bf16.mxu1 %v3330_v22 }
  0xb5   :  { %1789 = vmatprep.subr.bf16.mxu0 %v3327_v21 }
  0xb7   :  { %1872 = vmatpush1.bf16.msra.mxu1 %v3328_v25 }
  0xb8   :  { %1790 = vmatpush1.bf16.msra.mxu0 %v3325_v23  ;;  %1873 = vmatprep.subr.bf16.mxu1 %v3336_v27 }
  0xb9   :  { %1791 = vmatprep.subr.bf16.mxu0 %v3333_v26 }
  0xbb   :  { %1874 = vmatpush1.bf16.msra.mxu1 %v3334_v28 }
  0xbc   :  { %1792 = vmatpush1.bf16.msra.mxu0 %v3331_v49  ;;  %1875 = vmatprep.subr.bf16.mxu1 %v3342_v31 }
  0xbd   :  { %1793 = vmatprep.subr.bf16.mxu0 %v3339_v30 }
  0xbf   :  { %1876 = vmatpush1.bf16.msra.mxu1 %v3340_v33 }
  0xc0   :  { %1794 = vmatpush1.bf16.msra.mxu0 %v3337_v32  ;;  %1886 = vmatprep.subr.bf16.mxu1 %v3346_v35 }
  0xc1   :  { %2380 = vmatprep.subr.bf16.mxu0 %v3442_v24 }
  0xc2   :  { %1878 = vmatmul.mubr.bf16.vlgmr.msra.gmra.mrb[4].mxu1 %v3834_v18  ;;  %v3352_v18 = vld [vmem:[%s4726_s1 + $0x44c] ss:$16 sps:$4 sm:$0xff]  }
  0xc3   :  { %1796 = vmatmul.mubr.bf16.vlgmr.msra.gmra.mrb[0].mxu0 %v4252_v37  ;;  %1887 = vmatpush1.bf16.msra.mxu1 %v3344_v36 }
  0xc4   :  { %1918 = vmatprep.mubr.bf16.mxu1 %v3930_v51  ;;  %1888 = vmatprep.subr.bf16.mxu1 %v3349_v16  ;;  %v3448_v51 = vld [vmem:[%s4728_s3 + $0x24] ss:$8 sps:$4 sm:$0xff]  }
  0xc5   :  { %2381 = vmatpush1.bf16.msra.mxu0 %v3440_v38 }
  0xc6   :  { %2382 = vmatprep.subr.bf16.mxu0 %v3445_v40 }
  0xc7   :  { %1889 = vmatpush1.bf16.msra.mxu1 %v3347_v39 }
  0xc8   :  { %1890 = vmatprep.subr.bf16.mxu1 %v3352_v18 }
  0xc9   :  { %2383 = vmatpush1.bf16.msra.mxu0 %v3443_v3 }
  0xca   :  { %2384 = vmatprep.subr.bf16.mxu0 %v3448_v51 }
  0xcb   :  { %1891 = vmatpush1.bf16.msra.mxu1 %v3350_v41 }
  0xcc   :  { %1892 = vmatprep.subr.bf16.mxu1 %v3355_v42 }
  0xcd   :  { %2385 = vmatpush1.bf16.msra.mxu0 %v3446_v44 }
  0xce   :  { %2386 = vmatprep.subr.bf16.mxu0 %v3451_v47 }
  0xcf   :  { %1893 = vmatpush1.bf16.msra.mxu1 %v3353_v45 }
  0xd0   :  { %1894 = vmatprep.subr.bf16.mxu1 %v3358_v46 }
  0xd1   :  { %2387 = vmatpush1.bf16.msra.mxu0 %v3449_v48 }
  0xd2   :  { %2388 = vmatprep.subr.bf16.mxu0 %v3454_v50 }
  0xd3   :  { %1895 = vmatpush1.bf16.msra.mxu1 %v3356_v52 }
  0xd4   :  { %1896 = vmatprep.subr.bf16.mxu1 %v3361_v53 }
  0xd5   :  { %12 = vsyncpa [#allocation3], 0  ;;  %2389 = vmatpush1.bf16.msra.mxu0 %v3452_v54  ;;  %v3455_v58 = vld [vmem:[%s4728_s3 + $0x50] ss:$8 sps:$4 sm:$0xff]   ;;  %v3460_v59 = vld [vmem:[%s4728_s3 + $0x64] ss:$8 sps:$4 sm:$0xff]  }
  0xd6   :  { %2390 = vmatprep.subr.bf16.mxu0 %v3457_v55  ;;  %v3362_v60 = vld [vmem:[%s4726_s1 + $0x4c8] ss:$16 sps:$4 sm:$0xff]   ;;  %v3367_v61 = vld [vmem:[%s4726_s1 + $0x4ec] ss:$16 sps:$4 sm:$0xff]   ;;  %s3577_s30 = smov [#allocation2]   ;;  %vm2645_vm6 = vcmask 58368  }
  0xd7   :  { %1897 = vmatpush1.bf16.msra.mxu1 %v3359_v56  ;;  %v3458_v62 = vld [vmem:[%s4728_s3 + $0x60] ss:$8 sps:$4 sm:$0xff]   ;;  %v3463_v63 = vld [vmem:[%s4728_s3 + $0x74] ss:$8 sps:$4 sm:$0xff]   ;;  %v3461_v2 = vld [vmem:[%s4728_s3 + $0x70] ss:$8 sps:$4 sm:$0xff]  }
  0xd8   :  { %1898 = vmatprep.subr.bf16.mxu1 %v3364_v57  ;;  %v3365_v0 = vld [vmem:[%s4726_s1 + $0x4e8] ss:$16 sps:$4 sm:$0xff]   ;;  %v3370_v1 = vld [vmem:[%s4726_s1 + $0x50c] ss:$16 sps:$4 sm:$0xff]   ;;  %s2653_s8 = sshll.u32 %s3577_s30, 4  ;;  %s2654_s8 = int_to_ptr.vmem [resolvable:$true] %s2653_s8 }
  0xd9   :  { %2391 = vmatpush1.bf16.msra.mxu0 %v3455_v58  ;;  %v3466_v4 = vld [vmem:[%s4728_s3 + $0x84] ss:$8 sps:$4 sm:$0xff]   ;;  %v3368_v5 = vld [vmem:[%s4726_s1 + $0x508] ss:$16 sps:$4 sm:$0xff]   ;;  %v3469_v8 = vld [vmem:[%s4728_s3 + $0x94] ss:$8 sps:$4 sm:$0xff]   ;;  %p3557_p1 = scmp.lt.s32.totalorder %s2654_s8, %s2654_s8 }
  0xda   :  { %2392 = vmatprep.subr.bf16.mxu0 %v3460_v59  ;;  %v3373_v6 = vld [vmem:[%s4726_s1 + $0x52c] ss:$16 sps:$4 sm:$0xff]   ;;  %v3464_v7 = vld [vmem:[%s4728_s3 + $0x80] ss:$8 sps:$4 sm:$0xff]   ;;  %v3467_v11 = vld [vmem:[%s4728_s3 + $0x90] ss:$8 sps:$4 sm:$0xff]  }
  0xdb   :  { %1899 = vmatpush1.bf16.msra.mxu1 %v3362_v60  ;;  %v3371_v9 = vld [vmem:[%s4726_s1 + $0x528] ss:$16 sps:$4 sm:$0xff]   ;;  %v3376_v10 = vld [vmem:[%s4726_s1 + $0x54c] ss:$16 sps:$4 sm:$0xff]   ;;  %s3552_s9 = scalar_lea.vmem %s2654_s8, 32 }
  0xdc   :  { %1900 = vmatprep.subr.bf16.mxu1 %v3367_v61  ;;  %v3472_v12 = vld [vmem:[%s4728_s3 + $0xa4] ss:$8 sps:$4 sm:$0xff]   ;;  %v3374_v13 = vld [vmem:[%s4726_s1 + $0x548] ss:$16 sps:$4 sm:$0xff]   ;;  %v3475_v17 = vld [vmem:[%s4728_s3 + $0xb4] ss:$8 sps:$4 sm:$0xff]   ;;  %p3553_p0 = scmp.ne.s32.totalorder %s2654_s8, %s3552_s9  ;;  %p3558_p2 = scmp.lt.s32.totalorder %s3552_s9, %s3552_s9 }
  0xdd   :  { %2393 = vmatpush1.bf16.msra.mxu0 %v3458_v62  ;;  %v3379_v14 = vld [vmem:[%s4726_s1 + $0x56c] ss:$16 sps:$4 sm:$0xff]   ;;  %v3470_v15 = vld [vmem:[%s4728_s3 + $0xa0] ss:$8 sps:$4 sm:$0xff]   ;;  %v3473_v21 = vld [vmem:[%s4728_s3 + $0xb0] ss:$8 sps:$4 sm:$0xff]  }
  0xde   :  { %2394 = vmatprep.subr.bf16.mxu0 %v3463_v63  ;;  %v3377_v19 = vld [vmem:[%s4726_s1 + $0x568] ss:$16 sps:$4 sm:$0xff]   ;;  %v3382_v20 = vld [vmem:[%s4726_s1 + $0x58c] ss:$16 sps:$4 sm:$0xff]   ;;  %p3559_p3 = por %p3558_p2, %p3557_p1 }
  0xdf   :  { %1901 = vmatpush1.bf16.msra.mxu1 %v3365_v0  ;;  %v3478_v22 = vld [vmem:[%s4728_s3 + $0xc4] ss:$8 sps:$4 sm:$0xff]   ;;  %v3380_v23 = vld [vmem:[%s4726_s1 + $0x588] ss:$16 sps:$4 sm:$0xff]   ;;  %v3481_v27 = vld [vmem:[%s4728_s3 + $0xd4] ss:$8 sps:$4 sm:$0xff]  }
  0xe0   :  { %1902 = vmatprep.subr.bf16.mxu1 %v3370_v1  ;;  %v3385_v25 = vld [vmem:[%s4726_s1 + $0x5ac] ss:$16 sps:$4 sm:$0xff]   ;;  %v3476_v26 = vld [vmem:[%s4728_s3 + $0xc0] ss:$8 sps:$4 sm:$0xff]   ;;  %v3479_v30 = vld [vmem:[%s4728_s3 + $0xd0] ss:$8 sps:$4 sm:$0xff]   ;;  %p3560_p4 = pnand %p3559_p3, %p3553_p0 }
  0xe1   :  { %2395 = vmatpush1.bf16.msra.mxu0 %v3461_v2  ;;  %v3383_v49 = vld [vmem:[%s4726_s1 + $0x5a8] ss:$16 sps:$4 sm:$0xff]   ;;  %v3388_v28 = vld [vmem:[%s4726_s1 + $0x5cc] ss:$16 sps:$4 sm:$0xff]  }
  0xe2   :  { %2396 = vmatprep.subr.bf16.mxu0 %v3466_v4  ;;  %v3386_v31 = vld [vmem:[%s4726_s1 + $0x5c8] ss:$16 sps:$4 sm:$0xff]   ;;  %v3391_v32 = vld [vmem:[%s4726_s1 + $0x5ec] ss:$16 sps:$4 sm:$0xff]  }
  0xe3   :  { %1903 = vmatpush1.bf16.msra.mxu1 %v3368_v5  ;;  %v3389_v33 = vld [vmem:[%s4726_s1 + $0x5e8] ss:$16 sps:$4 sm:$0xff]   ;;  %v3394_v35 = vld [vmem:[%s4726_s1 + $0x60c] ss:$16 sps:$4 sm:$0xff]  }
  0xe4   :  { %1904 = vmatprep.subr.bf16.mxu1 %v3373_v6  ;;  %v3392_v36 = vld [vmem:[%s4726_s1 + $0x608] ss:$16 sps:$4 sm:$0xff]   ;;  %v3397_v16 = vld [vmem:[%s4726_s1 + $0x62c] ss:$16 sps:$4 sm:$0xff]  }
  0xe5   :  { %2397 = vmatpush1.bf16.msra.mxu0 %v3464_v7  ;;  %v3395_v38 = vld [vmem:[%s4726_s1 + $0x628] ss:$16 sps:$4 sm:$0xff]   ;;  %v3400_v24 = vld [vmem:[%s4726_s1 + $0x64c] ss:$16 sps:$4 sm:$0xff]  }
  0xe6   :  { %2398 = vmatprep.subr.bf16.mxu0 %v3469_v8  ;;  %v3398_v39 = vld [vmem:[%s4726_s1 + $0x648] ss:$16 sps:$4 sm:$0xff]   ;;  %v3406_v40 = vld [vmem:[%s4726_s1 + $0x68c] ss:$16 sps:$4 sm:$0xff]  }
  0xe7   :  { %1905 = vmatpush1.bf16.msra.mxu1 %v3371_v9  ;;  %v3404_v18 = vld [vmem:[%s4726_s1 + $0x688] ss:$16 sps:$4 sm:$0xff]   ;;  %v3409_v3 = vld [vmem:[%s4726_s1 + $0x6ac] ss:$16 sps:$4 sm:$0xff]  }
  0xe8   :  { %1906 = vmatprep.subr.bf16.mxu1 %v3376_v10  ;;  %v3407_v51 = vld [vmem:[%s4726_s1 + $0x6a8] ss:$16 sps:$4 sm:$0xff]   ;;  %v3412_v41 = vld [vmem:[%s4726_s1 + $0x6cc] ss:$16 sps:$4 sm:$0xff]   ;;  %v342_v10 = vsub.s32 0, %v3735_v43 }
  0xe9   :  { %2399 = vmatpush1.bf16.msra.mxu0 %v3467_v11  ;;  %v3484_v44 = vld [vmem:[%s4728_s3 + $0xe4] ss:$8 sps:$4 sm:$0xff]   ;;  %v3482_v46 = vld [vmem:[%s4728_s3 + $0xe0] ss:$8 sps:$4 sm:$0xff]   ;;  %v3487_v53 = vld [vmem:[%s4728_s3 + $0xf4] ss:$8 sps:$4 sm:$0xff]  }
  0xea   :  { %2400 = vmatprep.subr.bf16.mxu0 %v3472_v12  ;;  %v3410_v48 = vld [vmem:[%s4726_s1 + $0x6c8] ss:$16 sps:$4 sm:$0xff]   ;;  %v3415_v52 = vld [vmem:[%s4726_s1 + $0x6ec] ss:$16 sps:$4 sm:$0xff]   ;;  %v4549_v11 = vld [vmem:[%s4727_s2] sm:$0xf] }
  0xeb   :  { %1907 = vmatpush1.bf16.msra.mxu1 %v3374_v13  ;;  %v3485_v54 = vld [vmem:[%s4728_s3 + $0xf0] ss:$8 sps:$4 sm:$0xff]   ;;  %v3418_v56 = vld [vmem:[%s4726_s1 + $0x70c] ss:$16 sps:$4 sm:$0xff]   ;;  %v346_v12 = vsub.s32 1, %v3735_v43  ;;  %v343_v13 = vrot.slane %v4549_v11, %v342_v10 }
  0xec   :  { %1908 = vmatprep.subr.bf16.mxu1 %v3379_v14  ;;  %v3413_v55 = vld [vmem:[%s4726_s1 + $0x6e8] ss:$16 sps:$4 sm:$0xff]   ;;  %v3490_v58 = vld [vmem:[%s4728_s3 + $0x104] ss:$8 sps:$4 sm:$0xff]  }
  0xed   :  { %2401 = vmatpush1.bf16.msra.mxu0 %v3470_v15  ;;  %v3416_v57 = vld [vmem:[%s4726_s1 + $0x708] ss:$16 sps:$4 sm:$0xff]   ;;  %v3421_v59 = vld [vmem:[%s4726_s1 + $0x72c] ss:$16 sps:$4 sm:$0xff]   ;;  %v347_v14 = vrot.slane %v4549_v11, %v346_v12 }
  0xee   :  { %2402 = vmatprep.subr.bf16.mxu0 %v3475_v17  ;;  %v3419_v60 = vld [vmem:[%s4726_s1 + $0x728] ss:$16 sps:$4 sm:$0xff]   ;;  %v3424_v61 = vld [vmem:[%s4726_s1 + $0x74c] ss:$16 sps:$4 sm:$0xff]  }
  0xef   :  { %1909 = vmatpush1.bf16.msra.mxu1 %v3377_v19  ;;  %v3422_v62 = vld [vmem:[%s4726_s1 + $0x748] ss:$16 sps:$4 sm:$0xff]   ;;  %v3427_v63 = vld [vmem:[%s4726_s1 + $0x76c] ss:$16 sps:$4 sm:$0xff]  }
  0xf0   :  { %1910 = vmatprep.subr.bf16.mxu1 %v3382_v20  ;;  %v3425_v0 = vld [vmem:[%s4726_s1 + $0x768] ss:$16 sps:$4 sm:$0xff]   ;;  %v3430_v1 = vld [vmem:[%s4726_s1 + $0x78c] ss:$16 sps:$4 sm:$0xff]  }
  0xf1   :  { %2403 = vmatpush1.bf16.msra.mxu0 %v3473_v21  ;;  %v3428_v2 = vld [vmem:[%s4726_s1 + $0x788] ss:$16 sps:$4 sm:$0xff]   ;;  %v3433_v4 = vld [vmem:[%s4726_s1 + $0x7ac] ss:$16 sps:$4 sm:$0xff]  }
  0xf2   :  { %2404 = vmatprep.subr.bf16.mxu0 %v3478_v22  ;;  %v3431_v5 = vld [vmem:[%s4726_s1 + $0x7a8] ss:$16 sps:$4 sm:$0xff]   ;;  %v3436_v6 = vld [vmem:[%s4726_s1 + $0x7cc] ss:$16 sps:$4 sm:$0xff]  }
  0xf3   :  { %1911 = vmatpush1.bf16.msra.mxu1 %v3380_v23  ;;  %v3434_v7 = vld [vmem:[%s4726_s1 + $0x7c8] ss:$16 sps:$4 sm:$0xff]   ;;  %v3439_v8 = vld [vmem:[%s4726_s1 + $0x7ec] ss:$16 sps:$4 sm:$0xff]  }
  0xf4   :  { %1912 = vmatprep.subr.bf16.mxu1 %v3385_v25  ;;  %v3437_v9 = vld [vmem:[%s4726_s1 + $0x7e8] ss:$16 sps:$4 sm:$0xff]  }
  0xf5   :  { %2405 = vmatpush1.bf16.msra.mxu0 %v3476_v26 }
  0xf6   :  { %2406 = vmatprep.subr.bf16.mxu0 %v3481_v27 }
  0xf7   :  { %1913 = vmatpush1.bf16.msra.mxu1 %v3383_v49 }
  0xf8   :  { %1914 = vmatprep.subr.bf16.mxu1 %v3388_v28 }
  0xf9   :  { %2407 = vmatpush1.bf16.msra.mxu0 %v3479_v30  ;;  %v3488_v30 = vld [vmem:[%s4728_s3 + $0x100] ss:$8 sps:$4 sm:$0xff]  }
  0xfa   :  { %2408 = vmatprep.subr.bf16.mxu0 %v3484_v44  ;;  %v3500_v44 = vld [vmem:[%s4728_s3 + $0x140] ss:$8 sps:$4 sm:$0xff]  }
  0xfb   :  { %1915 = vmatpush1.bf16.msra.mxu1 %v3386_v31 }
  0xfc   :  { %1916 = vmatprep.subr.bf16.mxu1 %v3391_v32  ;;  %v3493_v32 = vld [vmem:[%s4728_s3 + $0x114] ss:$8 sps:$4 sm:$0xff]  }
  0xfd   :  { %2409 = vmatpush1.bf16.msra.mxu0 %v3482_v46  ;;  %v3545_v46 = vld [vmem:[%s4730_s5 + $0x20] sm:$0xff]  }
  0xfe   :  { %2410 = vmatprep.subr.bf16.mxu0 %v3487_v53  ;;  %v3506_v53 = vld [vmem:[%s4728_s3 + $0x160] ss:$8 sps:$4 sm:$0xff]  }
  0xff   :  { %1917 = vmatpush1.bf16.msra.mxu1 %v3389_v33  ;;  %v3536_v33 = vld [vmem:[%s4730_s5 + $0x40] sm:$0xff]  }
 0x100   :  { %1927 = vmatprep.subr.bf16.mxu1 %v3394_v35  ;;  %v3537_v35 = vld [vmem:[%s4730_s5] sm:$0xff]  }
 0x101   :  { %2411 = vmatpush1.bf16.msra.mxu0 %v3485_v54  ;;  %v3511_v54 = vld [vmem:[%s4728_s3 + $0x174] ss:$8 sps:$4 sm:$0xff]  }
 0x102   :  { %1919 = vmatmul.mubr.bf16.vlgmr.msra.gmra.mrb[4].mxu1 %v4050_v29  ;;  %v3403_v29 = vld [vmem:[%s4726_s1 + $0x66c] ss:$16 sps:$4 sm:$0xff]   ;;  %2421 = vmatprep.subr.bf16.mxu0 %v3490_v58 }
 0x103   :  { %1928 = vmatpush1.bf16.msra.mxu1 %v3392_v36  ;;  %1959 = vmatprep.mubr.bf16.mxu1 %v4064_v34  ;;  %v3401_v34 = vld [vmem:[%s4726_s1 + $0x668] ss:$16 sps:$4 sm:$0xff]   ;;  %v3517_v58 = vld [vmem:[%s4728_s3 + $0x194] ss:$8 sps:$4 sm:$0xff]  }
 0x104   :  { %1929 = vmatprep.subr.bf16.mxu1 %v3397_v16  ;;  %v3538_v36 = vld [vmem:[%s4730_s5 + $0x48] sm:$0xff]   ;;  %v3491_v16 = vld [vmem:[%s4728_s3 + $0x110] ss:$8 sps:$4 sm:$0xff]  }
 0x107   :  { %1930 = vmatpush1.bf16.msra.mxu1 %v3395_v38  ;;  %v3496_v38 = vld [vmem:[%s4728_s3 + $0x124] ss:$8 sps:$4 sm:$0xff]  }
 0x108   :  { %1931 = vmatprep.subr.bf16.mxu1 %v3400_v24  ;;  %v3539_v24 = vld [vmem:[%s4730_s5 + $0x8] sm:$0xff]  }
 0x10b   :  { %1932 = vmatpush1.bf16.msra.mxu1 %v3398_v39  ;;  %v3540_v39 = vld [vmem:[%s4730_s5 + $0x50] sm:$0xff]  }
 0x10c   :  { %1933 = vmatprep.subr.bf16.mxu1 %v3403_v29  ;;  %v3494_v29 = vld [vmem:[%s4728_s3 + $0x120] ss:$8 sps:$4 sm:$0xff]  }
 0x10f   :  { %1934 = vmatpush1.bf16.msra.mxu1 %v3401_v34  ;;  %v3499_v34 = vld [vmem:[%s4728_s3 + $0x134] ss:$8 sps:$4 sm:$0xff]  }
 0x110   :  { %1935 = vmatprep.subr.bf16.mxu1 %v3406_v40  ;;  %v3541_v40 = vld [vmem:[%s4730_s5 + $0x10] sm:$0xff]  }
 0x113   :  { %1936 = vmatpush1.bf16.msra.mxu1 %v3404_v18  ;;  %v3542_v18 = vld [vmem:[%s4730_s5 + $0x58] sm:$0xff]  }
 0x114   :  { %1937 = vmatprep.subr.bf16.mxu1 %v3409_v3  ;;  %v3497_v3 = vld [vmem:[%s4728_s3 + $0x130] ss:$8 sps:$4 sm:$0xff]  }
 0x115   :  { %v1674_v42 = vpop.f32.mrb[0].mxu1 }
 0x116   :  { %v1676_v45 = vpop.f32.mrb[1].mxu1  ;;  %v1675_v15 = vadd.f32 %v1674_v42, %v343_v13  ;;  %v3544_v42 = vld [vmem:[%s4730_s5 + $0x60] sm:$0xff]   ;;  %v354_v13 = vsub.s32 3, %v3735_v43 }
 0x117   :  { %v1678_v47 = vpop.f32.mrb[2].mxu1  ;;  %1938 = vmatpush1.bf16.msra.mxu1 %v3407_v51  ;;  %v1677_v17 = vadd.f32 %v1676_v45, %v347_v14  ;;  %v3502_v51 = vld [vmem:[%s4728_s3 + $0x144] ss:$8 sps:$4 sm:$0xff]   ;;  %v3505_v45 = vld [vmem:[%s4728_s3 + $0x154] ss:$8 sps:$4 sm:$0xff]  }
 0x118   :  { %v1679_v50 = vpop.f32.mrb[3].mxu1  ;;  %1939 = vmatprep.subr.bf16.mxu1 %v3412_v41  ;;  %v3543_v41 = vld [vmem:[%s4730_s5 + $0x18] sm:$0xff]   ;;  %v3546_v47 = vld [vmem:[%s4730_s5 + $0x68] sm:$0xff]  }
 0x119   :  { %v3508_v50 = vld [vmem:[%s4728_s3 + $0x164] ss:$8 sps:$4 sm:$0xff]  }
 0x11b   :  { %1940 = vmatpush1.bf16.msra.mxu1 %v3410_v48  ;;  %v3503_v48 = vld [vmem:[%s4728_s3 + $0x150] ss:$8 sps:$4 sm:$0xff]  }
 0x11c   :  { %1941 = vmatprep.subr.bf16.mxu1 %v3415_v52  ;;  %v3547_v52 = vld [vmem:[%s4730_s5 + $0x28] sm:$0xff]  }
 0x11f   :  { %1942 = vmatpush1.bf16.msra.mxu1 %v3413_v55  ;;  %v3509_v55 = vld [vmem:[%s4728_s3 + $0x170] ss:$8 sps:$4 sm:$0xff]  }
 0x120   :  { %1943 = vmatprep.subr.bf16.mxu1 %v3418_v56  ;;  %v3514_v56 = vld [vmem:[%s4728_s3 + $0x184] ss:$8 sps:$4 sm:$0xff]  }
 0x123   :  { %1944 = vmatpush1.bf16.msra.mxu1 %v3416_v57  ;;  %v3512_v57 = vld [vmem:[%s4728_s3 + $0x180] ss:$8 sps:$4 sm:$0xff]  }
 0x124   :  { %1945 = vmatprep.subr.bf16.mxu1 %v3421_v59  ;;  %v3515_v59 = vld [vmem:[%s4728_s3 + $0x190] ss:$8 sps:$4 sm:$0xff]  }
 0x127   :  { %1946 = vmatpush1.bf16.msra.mxu1 %v3419_v60  ;;  %v3520_v60 = vld [vmem:[%s4728_s3 + $0x1a4] ss:$8 sps:$4 sm:$0xff]  }
 0x128   :  { %1947 = vmatprep.subr.bf16.mxu1 %v3424_v61  ;;  %v3518_v61 = vld [vmem:[%s4728_s3 + $0x1a0] ss:$8 sps:$4 sm:$0xff]  }
 0x12b   :  { %1948 = vmatpush1.bf16.msra.mxu1 %v3422_v62  ;;  %v3523_v62 = vld [vmem:[%s4728_s3 + $0x1b4] ss:$8 sps:$4 sm:$0xff]  }
 0x12c   :  { %1949 = vmatprep.subr.bf16.mxu1 %v3427_v63  ;;  %v3521_v63 = vld [vmem:[%s4728_s3 + $0x1b0] ss:$8 sps:$4 sm:$0xff]  }
 0x12f   :  { %1950 = vmatpush1.bf16.msra.mxu1 %v3425_v0  ;;  %v3526_v0 = vld [vmem:[%s4728_s3 + $0x1c4] ss:$8 sps:$4 sm:$0xff]  }
 0x130   :  { %1951 = vmatprep.subr.bf16.mxu1 %v3430_v1  ;;  %v3524_v1 = vld [vmem:[%s4728_s3 + $0x1c0] ss:$8 sps:$4 sm:$0xff]  }
 0x133   :  { %1952 = vmatpush1.bf16.msra.mxu1 %v3428_v2  ;;  %v3529_v2 = vld [vmem:[%s4728_s3 + $0x1d4] ss:$8 sps:$4 sm:$0xff]  }
 0x134   :  { %1953 = vmatprep.subr.bf16.mxu1 %v3433_v4  ;;  %v3527_v4 = vld [vmem:[%s4728_s3 + $0x1d0] ss:$8 sps:$4 sm:$0xff]  }
 0x137   :  { %1954 = vmatpush1.bf16.msra.mxu1 %v3431_v5  ;;  %v3532_v5 = vld [vmem:[%s4728_s3 + $0x1e4] ss:$8 sps:$4 sm:$0xff]  }
 0x138   :  { %1955 = vmatprep.subr.bf16.mxu1 %v3436_v6  ;;  %v3530_v6 = vld [vmem:[%s4728_s3 + $0x1e0] ss:$8 sps:$4 sm:$0xff]  }
 0x13b   :  { %1956 = vmatpush1.bf16.msra.mxu1 %v3434_v7  ;;  %v3535_v7 = vld [vmem:[%s4728_s3 + $0x1f4] ss:$8 sps:$4 sm:$0xff]  }
 0x13c   :  { %1957 = vmatprep.subr.bf16.mxu1 %v3439_v8  ;;  %v3533_v8 = vld [vmem:[%s4728_s3 + $0x1f0] ss:$8 sps:$4 sm:$0xff]  }
 0x13f   :  { %1958 = vmatpush1.bf16.msra.mxu1 %v3437_v9  ;;  %v350_v9 = vsub.s32 2, %v3735_v43  ;;  %v2981_v43 = vld [vmem:[%s4731_s6] ss:$0 sm:$0xff] }
 0x140   :  { %2998 = vmatprep.subr.bf16.mxu1 %v3536_v33  ;;  %v2048_v33 = vld [vmem:[%s4729_s4] sm:$0x3] }
 0x141   :  { %v351_v14 = vrot.slane %v4549_v11, %v350_v9 }
 0x142   :  { %1960 = vmatmul.mubr.bf16.vlgmr.msra.gmra.mrb[4].mxu1 %v4252_v37 }
 0x143   :  { %2999 = vmatpush3.bf16.msra.mxu1 %v3537_v35  ;;  %v2053_v35 = vrot.slane %v2048_v33, %v342_v10 }
 0x144   :  { %3000 = vmatprep.subr.bf16.mxu1 %v3538_v36  ;;  %v2057_v36 = vrot.slane %v2048_v33, %v346_v12 }
 0x147   :  { %3001 = vmatpush3.bf16.msra.mxu1 %v3539_v24 }
 0x148   :  { %3002 = vmatprep.subr.bf16.mxu1 %v3540_v39 }
 0x14b   :  { %3003 = vmatpush3.bf16.msra.mxu1 %v3541_v40 }
 0x14c   :  { %3004 = vmatprep.subr.bf16.mxu1 %v3542_v18 }
 0x14f   :  { %3005 = vmatpush3.bf16.msra.mxu1 %v3543_v41 }
 0x150   :  { %3006 = vmatprep.subr.bf16.mxu1 %v3544_v42 }
 0x153   :  { %3007 = vmatpush3.bf16.msra.mxu1 %v3545_v46 }
 0x154   :  { %3008 = vmatprep.subr.bf16.mxu1 %v3546_v47 }
 0x157   :  { %3009 = vmatpush3.bf16.msra.mxu1 %v3547_v52 }
 0x196   :  { %v1797_v37 = vpop.f32.mrb[0].mxu0 }
 0x197   :  { %v3021_v19 = vadd.f32 %v1797_v37, %v1675_v15  ;;  %v1799_v20 = vpop.f32.mrb[1].mxu0  ;;  %v355_v15 = vrot.slane %v4549_v11, %v354_v13  ;;  %v3548_v11 = vld [vmem:[%s4730_s5 + $0x70] sm:$0xff]  }
 0x198   :  { %v3023_v21 = vadd.f32 %v1799_v20, %v1677_v17  ;;  %v1801_v22 = vpop.f32.mrb[2].mxu0  ;;  %3010 = vmatprep.subr.bf16.mxu1 %v3548_v11 }
 0x199   :  { %vm1968_vm0 = vcmp.ge.f32.partialorder %v3021_v19, 0.0  ;;  %v1972_v23 = vmul.f32 0.2, %v3021_v19  ;;  %v1802_v25 = vpop.f32.mrb[3].mxu0 }
 0x19a   :  { %vm1969_vm1 = vcmp.ge.f32.partialorder %v3023_v21, 0.0  ;;  %v1973_v26 = vmul.f32 0.2, %v3023_v21 }
 0x19b   :  { %v1976_v27 = vsel %vm1968_vm0, %v3021_v19, %v1972_v23 }
 0x19c   :  { %v1977_v49 = vsel %vm1969_vm1, %v3023_v21, %v1973_v26  ;;  %v1980_v31 = vpack.c.bf16 %v1976_v27, %v1976_v27 }
 0x19d   :  { %v1981_v28 = vpack.c.bf16 %v1977_v49, %v1977_v49 }
 0x19f   :  { %2412 = vmatprep.mubr.bf16.mxu0 %v1981_v28 }
 0x1a0   :  { %2413 = vmatmul.mubr.bf16.vlgmr.msra.gmra.mrb[4].mxu0 %v1980_v31  ;;  %v3550_v31 = vld [vmem:[%s4730_s5 + $0x78] sm:$0xff]  }
 0x1a1   :  { %2422 = vmatpush1.bf16.msra.mxu0 %v3488_v30  ;;  %v3549_v30 = vld [vmem:[%s4730_s5 + $0x30] sm:$0xff]  }
 0x1a2   :  { %2423 = vmatprep.subr.bf16.mxu0 %v3493_v32  ;;  %3011 = vmatpush3.bf16.msra.mxu1 %v3549_v30  ;;  %v3551_v32 = vld [vmem:[%s4730_s5 + $0x38] sm:$0xff]  }
 0x1a3   :  { %3012 = vmatprep.subr.bf16.mxu1 %v3550_v31 }
 0x1a5   :  { %2424 = vmatpush1.bf16.msra.mxu0 %v3491_v16 }
 0x1a6   :  { %2425 = vmatprep.subr.bf16.mxu0 %v3496_v38  ;;  %3013 = vmatpush3.bf16.msra.mxu1 %v3551_v32 }
 0x1a9   :  { %2426 = vmatpush1.bf16.msra.mxu0 %v3494_v29 }
 0x1aa   :  { %2427 = vmatprep.subr.bf16.mxu0 %v3499_v34 }
 0x1ad   :  { %2428 = vmatpush1.bf16.msra.mxu0 %v3497_v3 }
 0x1ae   :  { %2429 = vmatprep.subr.bf16.mxu0 %v3502_v51 }
 0x1b1   :  { %2430 = vmatpush1.bf16.msra.mxu0 %v3500_v44 }
 0x1b2   :  { %2431 = vmatprep.subr.bf16.mxu0 %v3505_v45 }
 0x1b5   :  { %2432 = vmatpush1.bf16.msra.mxu0 %v3503_v48 }
 0x1b6   :  { %2433 = vmatprep.subr.bf16.mxu0 %v3508_v50 }
 0x1b9   :  { %2434 = vmatpush1.bf16.msra.mxu0 %v3506_v53 }
 0x1ba   :  { %2435 = vmatprep.subr.bf16.mxu0 %v3511_v54 }
 0x1bd   :  { %2436 = vmatpush1.bf16.msra.mxu0 %v3509_v55 }
 0x1be   :  { %2437 = vmatprep.subr.bf16.mxu0 %v3514_v56 }
 0x1c1   :  { %2438 = vmatpush1.bf16.msra.mxu0 %v3512_v57 }
 0x1c2   :  { %2439 = vmatprep.subr.bf16.mxu0 %v3517_v58 }
 0x1c5   :  { %2440 = vmatpush1.bf16.msra.mxu0 %v3515_v59 }
 0x1c6   :  { %2441 = vmatprep.subr.bf16.mxu0 %v3520_v60 }
 0x1c9   :  { %2442 = vmatpush1.bf16.msra.mxu0 %v3518_v61 }
 0x1ca   :  { %2443 = vmatprep.subr.bf16.mxu0 %v3523_v62 }
 0x1cd   :  { %2444 = vmatpush1.bf16.msra.mxu0 %v3521_v63 }
 0x1ce   :  { %2445 = vmatprep.subr.bf16.mxu0 %v3526_v0 }
 0x1d1   :  { %2446 = vmatpush1.bf16.msra.mxu0 %v3524_v1 }
 0x1d2   :  { %2447 = vmatprep.subr.bf16.mxu0 %v3529_v2 }
 0x1d5   :  { %2448 = vmatpush1.bf16.msra.mxu0 %v3527_v4 }
 0x1d6   :  { %2449 = vmatprep.subr.bf16.mxu0 %v3532_v5 }
 0x1d9   :  { %2450 = vmatpush1.bf16.msra.mxu0 %v3530_v6 }
 0x1da   :  { %2451 = vmatprep.subr.bf16.mxu0 %v3535_v7 }
 0x1dd   :  { %2452 = vmatpush1.bf16.msra.mxu0 %v3533_v8 }
 0x215   :  { %v1961_v17 = vpop.f32.mrb[4].mxu1 }
 0x216   :  { %v3024_v37 = vadd.f32 %v1961_v17, %v351_v14  ;;  %v1963_v19 = vpop.f32.mrb[5].mxu1 }
 0x217   :  { %v3025_v20 = vadd.f32 %v1963_v19, %v355_v15  ;;  %v1965_v21 = vpop.f32.mrb[6].mxu1 }
 0x218   :  { %vm1970_vm2 = vcmp.ge.f32.partialorder %v3024_v37, 0.0  ;;  %v1974_v22 = vmul.f32 0.2, %v3024_v37  ;;  %v1966_v23 = vpop.f32.mrb[7].mxu1 }
 0x219   :  { %vm1971_vm3 = vcmp.ge.f32.partialorder %v3025_v20, 0.0  ;;  %v1975_v25 = vmul.f32 0.2, %v3025_v20 }
 0x21a   :  { %v1978_v26 = vsel %vm1970_vm2, %v3024_v37, %v1974_v22 }
 0x21b   :  { %v1979_v27 = vsel %vm1971_vm3, %v3025_v20, %v1975_v25  ;;  %v1982_v28 = vpack.c.bf16 %v1978_v26, %v1978_v26 }
 0x21c   :  { %v1983_v49 = vpack.c.bf16 %v1979_v27, %v1979_v27 }
 0x21e   :  { %2453 = vmatprep.mubr.bf16.mxu0 %v1983_v49 }
 0x21f   :  { %2454 = vmatmul.mubr.bf16.vlgmr.msra.gmra.mrb[4].mxu0 %v1982_v28 }
 0x2f2   :  { %v2455_v16 = vpop.f32.mrb[4].mxu0 }
 0x2f3   :  { %v3026_v38 = vadd.f32 %v2455_v16, %v2053_v35  ;;  %v2457_v24 = vpop.f32.mrb[5].mxu0 }
 0x2f4   :  { %v3027_v39 = vadd.f32 %v2457_v24, %v2057_v36  ;;  %v2459_v29 = vpop.f32.mrb[6].mxu0 }
 0x2f5   :  { %vm2462_vm4 = vcmp.ge.f32.partialorder %v3026_v38, 0.0  ;;  %v2464_v34 = vmul.f32 0.2, %v3026_v38  ;;  %v2460_v40 = vpop.f32.mrb[7].mxu0 }
 0x2f6   :  { %vm2463_vm5 = vcmp.ge.f32.partialorder %v3027_v39, 0.0  ;;  %v2465_v18 = vmul.f32 0.2, %v3027_v39 }
 0x2f7   :  { %v2466_v3 = vsel %vm2462_vm4, %v3026_v38, %v2464_v34 }
 0x2f8   :  { %v2467_v51 = vsel %vm2463_vm5, %v3027_v39, %v2465_v18  ;;  %v2468_v42 = vpack.c.bf16 %v2466_v3, %v2466_v3 }
 0x2f9   :  { %v2469_v41 = vpack.c.bf16 %v2467_v51, %v2467_v51 }
 0x2fb   :  { %2637 = vmatprep.mubr.bf16.mxu1 %v2469_v41 }
 0x2fc   :  { %2638 = vmatmul.mubr.bf16.vlgmr.msra.gmra.mrb[8].mxu1 %v2468_v42 }
 0x3cf   :  { %v3014_v10 = vpop.f32.mrb[8].mxu1 }
 0x3d0   :  { %v3015_v12 = vpop.f32.mrb[9].mxu1 }
 0x3d1   :  { %v3016_v44 = vadd.f32 %v3015_v12, %v3014_v10  ;;  %v3017_v45 = vpop.f32.mrb[10].mxu1 }
 0x3d2   :  { %v3018_v46 = vpop.f32.mrb[11].mxu1 }
 0x3d3   :  { %v2640_v47 = vadd.f32 %v3016_v44, %v2981_v43 }
 0x3d5   :  { %2646 = vst.msk [vmem:[#allocation2] sm:$0x3] %vm2645_vm6, %v2640_v47 }
 0x3d6   :  { %3563 = shalt.err (!%p3560_p4)
}
 0x3d7   :  { %s3564_s6 = scalar_lea.hbm %s4732_s7, 32 }
 0x3d8   :  { %p3565_p5 = scmp.ne.s32.totalorder %s4732_s7, %s3564_s6  ;;  %p3568_p6 = scmp.lt.u32.totalorder %s3564_s6, %s4732_s7 }
 0x3da   :  { %p3570_p7 = pnand %p3568_p6, %p3565_p5 }
 0x3dc   :  { %3573 = shalt.err (!%p3570_p7)
}
 0x3dd   :  { %2656 = dma.vmem_to_hbm [thread:$0]  %s2654_s8, 32, %s4732_s7, [#allocation3]  }
 0x3de   :  { %3574 = dma.done.wait [#allocation3], 32  }
 0x3df   :  { %3575 = vsyncadd [#allocation3], 4294967264 }
 0x3e0   :  { %2660 = vsyncpa [#allocation3], 1 }

</bundles_post_ra>
